<compile_context>
chip_gen: v6e
topology: v6e:2x2x1
jax: 0.10.0
libtpu: 0.0.40
codegen_flags: <defaults>
</compile_context>

<pallas_src>
import functools

import numpy as np
import jax
import jax.numpy as jnp
from jax.experimental import pallas as pl
from jax.experimental.pallas import tpu as pltpu


# ============================ A) fully fused kernel ============================

def fused_block_kernel(x_ref, gamma_ref, beta_ref, m_ref, mt_ref,
                       wqkv_ref, bqkv_ref, w3_ref, b3_ref, o_ref,
                       *, C, n_per_group, eps, sm_scale, res_scale):
    x = x_ref[...]                                            # (L, C) f32

    # ---- GroupNorm: per-channel sums -> group stats via one-hot matmul ----
    ch_sum = jnp.sum(x, axis=0, keepdims=True)                # (1, C)
    ch_sq = jnp.sum(x * x, axis=0, keepdims=True)             # (1, C)
    grp_sum = jnp.dot(ch_sum, m_ref[...], preferred_element_type=jnp.float32)
    grp_sq = jnp.dot(ch_sq, m_ref[...], preferred_element_type=jnp.float32)
    mean_g = grp_sum / n_per_group
    var_g = jnp.maximum(grp_sq / n_per_group - mean_g * mean_g, 0.0)  # clamp
    inv_g = jax.lax.rsqrt(var_g + eps)
    mean_c = jnp.dot(mean_g, mt_ref[...], preferred_element_type=jnp.float32)
    inv_c = jnp.dot(inv_g, mt_ref[...], preferred_element_type=jnp.float32)
    scale = inv_c * gamma_ref[...]
    shift = beta_ref[...] - mean_c * scale
    xn = x * scale + shift                                    # (L, C) f32

    # ---- fused QKV projection (bf16 operands, f32 accumulation) ----
    qkv = jnp.dot(xn.astype(jnp.bfloat16), wqkv_ref[...],
                  preferred_element_type=jnp.float32) + bqkv_ref[...]   # (L, 3C)
    # sm_scale folded into q once (no per-score multiply later).
    q = (qkv[:, 0:C] * sm_scale).astype(jnp.bfloat16)
    k = qkv[:, C:2 * C].astype(jnp.bfloat16)
    v = qkv[:, 2 * C:3 * C].astype(jnp.bfloat16)

    # ---- dense attention over the full slab ----
    s = jax.lax.dot_general(q, k, (((1,), (1,)), ((), ())),
                            preferred_element_type=jnp.float32)         # (L, L)
    s_max = jnp.max(s, axis=-1, keepdims=True)
    p = jnp.exp(s - s_max)
    denom = jnp.sum(p, axis=-1, keepdims=True)
    attn = jnp.dot(p.astype(jnp.bfloat16), v,
                   preferred_element_type=jnp.float32) / denom          # (L, C)

    # ---- NIN_3 + residual ----
    h = jnp.dot(attn.astype(jnp.bfloat16), w3_ref[...],
                preferred_element_type=jnp.float32) + b3_ref[...]
    out = x + h
    if res_scale != 1.0:
        out = out * res_scale
    o_ref[...] = out.astype(o_ref.dtype)


# ========================= B) multi-pass fallback kernels ======================

# ----------------------------- pass 1: GN stats --------------------------------

def gn_stats_kernel(x_ref, gamma_ref, beta_ref, m_ref, mt_ref,
                    scale_ref, shift_ref, sum_sc, sq_sc, *, n_per_group, eps):
    l = pl.program_id(1)

    @pl.when(l == 0)
    def _():
        sum_sc[...] = jnp.zeros_like(sum_sc)
        sq_sc[...] = jnp.zeros_like(sq_sc)

    x = x_ref[...]                                            # (TL, C) f32
    sum_sc[...] += jnp.sum(x, axis=0, keepdims=True)
    sq_sc[...] += jnp.sum(x * x, axis=0, keepdims=True)

    @pl.when(l == pl.num_programs(1) - 1)
    def _():
        grp_sum = jnp.dot(sum_sc[...], m_ref[...], preferred_element_type=jnp.float32)
        grp_sq = jnp.dot(sq_sc[...], m_ref[...], preferred_element_type=jnp.float32)
        mean_g = grp_sum / n_per_group
        var_g = jnp.maximum(grp_sq / n_per_group - mean_g * mean_g, 0.0)
        inv_g = jax.lax.rsqrt(var_g + eps)
        mean_c = jnp.dot(mean_g, mt_ref[...], preferred_element_type=jnp.float32)
        inv_c = jnp.dot(inv_g, mt_ref[...], preferred_element_type=jnp.float32)
        scale = inv_c * gamma_ref[...]
        scale_ref[...] = scale
        shift_ref[...] = beta_ref[...] - mean_c * scale


# ------------------------ pass 2: normalize + packed K/V -----------------------

def kv_kernel(x_ref, scale_ref, shift_ref, wkv_ref, bkv_ref, kv_ref):
    xn = x_ref[...] * scale_ref[...] + shift_ref[...]         # (TL, C) f32
    kv = jnp.dot(xn.astype(jnp.bfloat16), wkv_ref[...],
                 preferred_element_type=jnp.float32) + bkv_ref[...]     # (TL, 2C)
    kv_ref[...] = kv.astype(kv_ref.dtype)


# ------------- pass 3: flash attention + fused Q proj + NIN_3 + skip -----------

def flash_attn_kernel(x_ref, scale_ref, shift_ref, wq_ref, bq_ref, kv_ref,
                      w3_ref, b3_ref, o_ref,
                      q_sc, m_sc, l_sc, acc_sc, *, C, sm_scale, res_scale):
    ki = pl.program_id(2)

    @pl.when(ki == 0)
    def _():
        # Q projection fused here: no Q round trip through HBM.
        xn = x_ref[...] * scale_ref[...] + shift_ref[...]
        q = jnp.dot(xn.astype(jnp.bfloat16), wq_ref[...],
                    preferred_element_type=jnp.float32) + bq_ref[...]
        q_sc[...] = (q * sm_scale).astype(q_sc.dtype)         # sm_scale folded in
        m_sc[...] = jnp.full_like(m_sc, -jnp.inf)
        l_sc[...] = jnp.zeros_like(l_sc)
        acc_sc[...] = jnp.zeros_like(acc_sc)

    k = kv_ref[:, 0:C]                                        # (Tk, C) bf16
    v = kv_ref[:, C:2 * C]                                    # (Tk, C) bf16
    # scores[l, d] = sum_c q[l, c] * k[d, c]
    s = jax.lax.dot_general(q_sc[...], k, (((1,), (1,)), ((), ())),
                            preferred_element_type=jnp.float32)

    m_prev = m_sc[...]
    m_new = jnp.maximum(m_prev, jnp.max(s, axis=-1, keepdims=True))
    alpha = jnp.exp(m_prev - m_new)
    p = jnp.exp(s - m_new)
    l_sc[...] = alpha * l_sc[...] + jnp.sum(p, axis=-1, keepdims=True)
    acc_sc[...] = alpha * acc_sc[...] + jnp.dot(
        p.astype(jnp.bfloat16), v, preferred_element_type=jnp.float32)
    m_sc[...] = m_new

    @pl.when(ki == pl.num_programs(2) - 1)
    def _():
        attn = acc_sc[...] / l_sc[...]                        # exact division
        h = jnp.dot(attn.astype(jnp.bfloat16), w3_ref[...],
                    preferred_element_type=jnp.float32) + b3_ref[...]
        out = x_ref[...] + h                                  # skip connection
        if res_scale != 1.0:
            out = out * res_scale
        o_ref[...] = out.astype(o_ref.dtype)


# ----------------------------------- wrapper -----------------------------------

def attn_block_pp(x_blc, params, *, skip_rescale=False, fused=None,
                  l_tile=512, q_tile=256, k_tile=256):
    B, L, C = x_blc.shape
    G = params["m"].shape[1]
    eps = 1e-6
    sm_scale = float(C) ** -0.5
    res_scale = float(1.0 / np.sqrt(2.0)) if skip_rescale else 1.0
    n_per_group = float(L * (C // G))

    cp = lambda sem: pltpu.CompilerParams(
        dimension_semantics=sem, vmem_limit_bytes=32 * 1024 * 1024)

    if fused is None:
        # Rough peak-VMEM estimate of the fused body (scores + p + slabs).
        est_bytes = 6 * L * L + 48 * L * C + 8 * C * C
        fused = est_bytes <= 18 * 1024 * 1024

    # ------------------------------ fused path ------------------------------
    if fused:
        cost = pl.CostEstimate(
            flops=B * (4 * L * L * C + 8 * L * C * C),
            transcendentals=B * L * L,
            bytes_accessed=B * L * C * 8 + 8 * C * C)
        return pl.pallas_call(
            functools.partial(fused_block_kernel, C=C, n_per_group=n_per_group,
                              eps=eps, sm_scale=sm_scale, res_scale=res_scale),
            out_shape=jax.ShapeDtypeStruct((B, L, C), jnp.float32),
            grid=(B,),
            in_specs=[pl.BlockSpec((None, L, C), lambda b: (b, 0, 0)),
                      pl.BlockSpec((1, C), lambda b: (0, 0)),
                      pl.BlockSpec((1, C), lambda b: (0, 0)),
                      pl.BlockSpec((C, G), lambda b: (0, 0)),
                      pl.BlockSpec((G, C), lambda b: (0, 0)),
                      pl.BlockSpec((C, 3 * C), lambda b: (0, 0)),
                      pl.BlockSpec((1, 3 * C), lambda b: (0, 0)),
                      pl.BlockSpec((C, C), lambda b: (0, 0)),
                      pl.BlockSpec((1, C), lambda b: (0, 0))],
            out_specs=pl.BlockSpec((None, L, C), lambda b: (b, 0, 0)),
            compiler_params=cp(("parallel",)),
            cost_estimate=cost,
        )(x_blc, params["gamma"], params["beta"], params["m"], params["mt"],
          params["wqkv"], params["bqkv"], params["w3"], params["b3"])

    # ---------------------------- multi-pass path ----------------------------
    l_t = min(l_tile, L)
    q_t = min(q_tile, L)
    k_t = min(k_tile, L)
    assert L % l_t == 0 and L % q_t == 0 and L % k_t == 0

    # ---- pass 1: GroupNorm stats -> per-(batch, channel) scale / shift ----
    scale, shift = pl.pallas_call(
        functools.partial(gn_stats_kernel, n_per_group=n_per_group, eps=eps),
        out_shape=(jax.ShapeDtypeStruct((B, 1, C), jnp.float32),
                   jax.ShapeDtypeStruct((B, 1, C), jnp.float32)),
        grid=(B, L // l_t),
        in_specs=[pl.BlockSpec((None, l_t, C), lambda b, l: (b, l, 0)),
                  pl.BlockSpec((1, C), lambda b, l: (0, 0)),
                  pl.BlockSpec((1, C), lambda b, l: (0, 0)),
                  pl.BlockSpec((C, G), lambda b, l: (0, 0)),
                  pl.BlockSpec((G, C), lambda b, l: (0, 0))],
        out_specs=(pl.BlockSpec((None, 1, C), lambda b, l: (b, 0, 0)),
                   pl.BlockSpec((None, 1, C), lambda b, l: (b, 0, 0))),
        scratch_shapes=[pltpu.VMEM((1, C), jnp.float32),
                        pltpu.VMEM((1, C), jnp.float32)],
        compiler_params=cp(("parallel", "arbitrary")),
    )(x_blc, params["gamma"], params["beta"], params["m"], params["mt"])

    wqkv, bqkv = params["wqkv"], params["bqkv"]
    wq, bq = wqkv[:, :C], bqkv[:, :C]
    wkv, bkv = wqkv[:, C:], bqkv[:, C:]

    # ---- pass 2: normalize + packed K/V projection (Q not written to HBM) ----
    kv = pl.pallas_call(
        kv_kernel,
        out_shape=jax.ShapeDtypeStruct((B, L, 2 * C), jnp.bfloat16),
        grid=(B, L // l_t),
        in_specs=[pl.BlockSpec((None, l_t, C), lambda b, l: (b, l, 0)),
                  pl.BlockSpec((None, 1, C), lambda b, l: (b, 0, 0)),
                  pl.BlockSpec((None, 1, C), lambda b, l: (b, 0, 0)),
                  pl.BlockSpec((C, 2 * C), lambda b, l: (0, 0)),
                  pl.BlockSpec((1, 2 * C), lambda b, l: (0, 0))],
        out_specs=pl.BlockSpec((None, l_t, 2 * C), lambda b, l: (b, l, 0)),
        compiler_params=cp(("parallel", "parallel")),
    )(x_blc, scale, shift, wkv, bkv)

    # ---- pass 3: flash attention + fused Q projection + NIN_3 + residual ----
    n_q = L // q_t
    cost = pl.CostEstimate(
        flops=B * (4 * L * L * C + 4 * L * C * C),
        transcendentals=B * L * L,
        bytes_accessed=B * L * C * (8 + 4 * n_q) + 4 * C * C)
    out = pl.pallas_call(
        functools.partial(flash_attn_kernel, C=C, sm_scale=sm_scale,
                          res_scale=res_scale),
        out_shape=jax.ShapeDtypeStruct((B, L, C), jnp.float32),
        grid=(B, L // q_t, L // k_t),
        in_specs=[pl.BlockSpec((None, q_t, C), lambda b, qi, ki: (b, qi, 0)),
                  pl.BlockSpec((None, 1, C), lambda b, qi, ki: (b, 0, 0)),
                  pl.BlockSpec((None, 1, C), lambda b, qi, ki: (b, 0, 0)),
                  pl.BlockSpec((C, C), lambda b, qi, ki: (0, 0)),
                  pl.BlockSpec((1, C), lambda b, qi, ki: (0, 0)),
                  pl.BlockSpec((None, k_t, 2 * C), lambda b, qi, ki: (b, ki, 0)),
                  pl.BlockSpec((C, C), lambda b, qi, ki: (0, 0)),
                  pl.BlockSpec((1, C), lambda b, qi, ki: (0, 0))],
        out_specs=pl.BlockSpec((None, q_t, C), lambda b, qi, ki: (b, qi, 0)),
        scratch_shapes=[pltpu.VMEM((q_t, C), jnp.bfloat16),
                        pltpu.VMEM((q_t, 1), jnp.float32),
                        pltpu.VMEM((q_t, 1), jnp.float32),
                        pltpu.VMEM((q_t, C), jnp.float32)],
        compiler_params=cp(("parallel", "parallel", "arbitrary")),
        cost_estimate=cost,
    )(x_blc, scale, shift, wq, bq, kv, params["w3"], params["b3"])
    return out


# ----------------------- deterministic parameter init -------------------------

def _variance_scaling_uniform(key, shape, scale, fan_in, fan_out):
    # variance_scaling(scale, 'fan_avg', 'uniform') from the torch module.
    scale = 1e-10 if scale == 0 else scale
    variance = scale / ((fan_in + fan_out) / 2.0)
    return jax.random.uniform(key, shape, jnp.float32, -1.0, 1.0) * np.sqrt(3.0 * variance)


def _group_indicator(C, G):
    cpg = C // G
    c = np.arange(C)
    m = (c[:, None] // cpg == np.arange(G)[None, :]).astype(np.float32)
    return jnp.asarray(m)


def make_params(key, channels, init_scale=0.0):
    C = channels
    G = min(C // 4, 32)
    kq, kk, kv, ko = jax.random.split(key, 4)
    # NIN weight: torch shape (in_dim, num_units) = (C, C); fan_in = fan_out = C.
    wq = _variance_scaling_uniform(kq, (C, C), 0.1, C, C)
    wk = _variance_scaling_uniform(kk, (C, C), 0.1, C, C)
    wv = _variance_scaling_uniform(kv, (C, C), 0.1, C, C)
    w3 = _variance_scaling_uniform(ko, (C, C), init_scale, C, C)
    m = _group_indicator(C, G)
    return dict(
        gamma=jnp.ones((1, C), jnp.float32),
        beta=jnp.zeros((1, C), jnp.float32),
        m=m, mt=m.T,
        wqkv=jnp.concatenate([wq, wk, wv], axis=1).astype(jnp.bfloat16),
        bqkv=jnp.zeros((1, 3 * C), jnp.float32),
        w3=w3.astype(jnp.bfloat16),
        b3=jnp.zeros((1, C), jnp.float32),
    )


# ------------------------------ pure-JAX reference -----------------------------

def reference(x_blc, params, skip_rescale=False):
    B, L, C = x_blc.shape
    G = params["m"].shape[1]
    cpg = C // G
    xg = x_blc.reshape(B, L, G, cpg)
    mean = xg.mean(axis=(1, 3), keepdims=True)
    var = xg.var(axis=(1, 3), keepdims=True)
    h = ((xg - mean) / jnp.sqrt(var + 1e-6)).reshape(B, L, C)
    h = h * params["gamma"] + params["beta"]

    wqkv = params["wqkv"].astype(jnp.float32)
    qkv = h @ wqkv + params["bqkv"]
    q, k, v = qkv[..., :C], qkv[..., C:2 * C], qkv[..., 2 * C:]

    w = jnp.einsum("blc,bdc->bld", q, k) * (float(C) ** -0.5)
    w = jax.nn.softmax(w, axis=-1)
    a = jnp.einsum("bld,bdc->blc", w, v)
    h = a @ params["w3"].astype(jnp.float32) + params["b3"]
    out = x_blc + h
    if skip_rescale:
        out = out / np.sqrt(2.0)
    return out


# ----------------------------------- main --------------------------------------

if __name__ == "__main__":
    B, C, L = 2, 128, 256          # C multiple of 128 (lane-dense)

    key = jax.random.PRNGKey(0)
    kx, kp = jax.random.split(key)
    x_ncl = jax.random.normal(kx, (B, C, L), jnp.float32)      # PyTorch NCL input
    # init_scale=0.1 for NIN_3 so the attention branch is numerically non-trivial
    # (with the module default init_scale=0.0 the attention output collapses to ~0).
    params = make_params(kp, C, init_scale=0.1)

    x_blc = jnp.transpose(x_ncl, (0, 2, 1))                    # NCL -> (B, L, C)

    # Fused single-kernel path (typical DDPM++ sequence lengths).
    out_fused = attn_block_pp(x_blc, params, skip_rescale=False)
    jax.block_until_ready(out_fused)

    # Multi-pass flash fallback (large-L path), forced with small tiles so the
    # online-softmax accumulation across >= 2 k tiles is exercised.
    out_multi = attn_block_pp(x_blc, params, skip_rescale=False, fused=False,
                              l_tile=128, q_tile=128, k_tile=128)
    jax.block_until_ready(out_multi)

    ref_blc = reference(x_blc, params, skip_rescale=False)
    np.testing.assert_allclose(np.asarray(out_fused), np.asarray(ref_blc),
                               rtol=2e-3, atol=2e-3)
    np.testing.assert_allclose(np.asarray(out_multi), np.asarray(ref_blc),
                               rtol=2e-3, atol=2e-3)

    out_ncl = jnp.transpose(out_fused, (0, 2, 1))               # back to NCL
    jax.block_until_ready(out_ncl)
    print("KERNEL_OK")
</pallas_src>

<mosaic_0001>
module attributes {stable_mosaic.version = 11 : i64} {
  func.func @fused_block_kernel(%arg0: i32, %arg1: memref<1x256x128xf32, #tpu.memory_space<vmem>>, %arg2: memref<1x128xf32, #tpu.memory_space<vmem>>, %arg3: memref<1x128xf32, #tpu.memory_space<vmem>>, %arg4: memref<128x32xf32, #tpu.memory_space<vmem>>, %arg5: memref<32x128xf32, #tpu.memory_space<vmem>>, %arg6: memref<128x384xbf16, #tpu.memory_space<vmem>>, %arg7: memref<1x384xf32, #tpu.memory_space<vmem>>, %arg8: memref<128x128xbf16, #tpu.memory_space<vmem>>, %arg9: memref<1x128xf32, #tpu.memory_space<vmem>>, %arg10: memref<1x256x128xf32, #tpu.memory_space<vmem>>) attributes {dimension_semantics = [#tpu.dimension_semantics<parallel>], iteration_bounds = array<i64: 2>, scalar_prefetch = 0 : i64, scratch_operands = 0 : i64, tpu.core_type = #tpu.core_type<tc>, window_params = [{transform_indices = @transform_0, window_bounds = array<i64: 1, 256, 128>}, {pipeline_mode = #tpu.pipeline_mode<synchronous>, transform_indices = @transform_1, window_bounds = array<i64: 1, 128>}, {pipeline_mode = #tpu.pipeline_mode<synchronous>, transform_indices = @transform_2, window_bounds = array<i64: 1, 128>}, {pipeline_mode = #tpu.pipeline_mode<synchronous>, transform_indices = @transform_3, window_bounds = array<i64: 128, 32>}, {pipeline_mode = #tpu.pipeline_mode<synchronous>, transform_indices = @transform_4, window_bounds = array<i64: 32, 128>}, {pipeline_mode = #tpu.pipeline_mode<synchronous>, transform_indices = @transform_5, window_bounds = array<i64: 128, 384>}, {pipeline_mode = #tpu.pipeline_mode<synchronous>, transform_indices = @transform_6, window_bounds = array<i64: 1, 384>}, {pipeline_mode = #tpu.pipeline_mode<synchronous>, transform_indices = @transform_7, window_bounds = array<i64: 128, 128>}, {pipeline_mode = #tpu.pipeline_mode<synchronous>, transform_indices = @transform_8, window_bounds = array<i64: 1, 128>}, {transform_indices = @transform_9, window_bounds = array<i64: 1, 256, 128>}]} {
    %c0 = arith.constant 0 : index
    %c0_0 = arith.constant 0 : index
    %c0_1 = arith.constant 0 : index
    %0 = vector.load %arg1[%c0, %c0_0, %c0_1] : memref<1x256x128xf32, #tpu.memory_space<vmem>>, vector<1x256x128xf32>
    %1 = vector.shape_cast %0 : vector<1x256x128xf32> to vector<256x128xf32>
    %cst = arith.constant dense<0.000000e+00> : vector<128xf32>
    %2 = vector.multi_reduction <add>, %1, %cst [0] : vector<256x128xf32> to vector<128xf32>
    %3 = vector.shape_cast %2 : vector<128xf32> to vector<1x128xf32>
    %4 = arith.mulf %1, %1 : vector<256x128xf32>
    %cst_2 = arith.constant dense<0.000000e+00> : vector<128xf32>
    %5 = vector.multi_reduction <add>, %4, %cst_2 [0] : vector<256x128xf32> to vector<128xf32>
    %6 = vector.shape_cast %5 : vector<128xf32> to vector<1x128xf32>
    %c0_3 = arith.constant 0 : index
    %c0_4 = arith.constant 0 : index
    %7 = vector.load %arg4[%c0_3, %c0_4] : memref<128x32xf32, #tpu.memory_space<vmem>>, vector<128x32xf32>
    %cst_5 = arith.constant dense<0.000000e+00> : vector<1x32xf32>
    %8 = tpu.matmul %3, %7, %cst_5 {dimension_numbers = #tpu.dot_dimension_numbers<[1], [0], [0], [1], [0, 0, 1, 1], [], []>} : vector<1x128xf32>, vector<128x32xf32>, vector<1x32xf32> -> vector<1x32xf32>
    %c0_6 = arith.constant 0 : index
    %c0_7 = arith.constant 0 : index
    %9 = vector.load %arg4[%c0_6, %c0_7] : memref<128x32xf32, #tpu.memory_space<vmem>>, vector<128x32xf32>
    %cst_8 = arith.constant dense<0.000000e+00> : vector<1x32xf32>
    %10 = tpu.matmul %6, %9, %cst_8 {dimension_numbers = #tpu.dot_dimension_numbers<[1], [0], [0], [1], [0, 0, 1, 1], [], []>} : vector<1x128xf32>, vector<128x32xf32>, vector<1x32xf32> -> vector<1x32xf32>
    %cst_9 = arith.constant 1.024000e+03 : f32
    %11 = vector.broadcast %cst_9 : f32 to vector<1x32xf32>
    %12 = arith.divf %8, %11 : vector<1x32xf32>
    %cst_10 = arith.constant 1.024000e+03 : f32
    %13 = vector.broadcast %cst_10 : f32 to vector<1x32xf32>
    %14 = arith.divf %10, %13 : vector<1x32xf32>
    %15 = arith.mulf %12, %12 : vector<1x32xf32>
    %16 = arith.subf %14, %15 : vector<1x32xf32>
    %cst_11 = arith.constant 0.000000e+00 : f32
    %17 = vector.broadcast %cst_11 : f32 to vector<1x32xf32>
    %18 = arith.maximumf %16, %17 : vector<1x32xf32>
    %cst_12 = arith.constant 9.99999997E-7 : f32
    %19 = vector.broadcast %cst_12 : f32 to vector<1x32xf32>
    %20 = arith.addf %18, %19 : vector<1x32xf32>
    %21 = math.rsqrt %20 : vector<1x32xf32>
    %c0_13 = arith.constant 0 : index
    %c0_14 = arith.constant 0 : index
    %22 = vector.load %arg5[%c0_13, %c0_14] : memref<32x128xf32, #tpu.memory_space<vmem>>, vector<32x128xf32>
    %cst_15 = arith.constant dense<0.000000e+00> : vector<1x128xf32>
    %23 = tpu.matmul %12, %22, %cst_15 {dimension_numbers = #tpu.dot_dimension_numbers<[1], [0], [0], [1], [0, 0, 1, 1], [], []>} : vector<1x32xf32>, vector<32x128xf32>, vector<1x128xf32> -> vector<1x128xf32>
    %c0_16 = arith.constant 0 : index
    %c0_17 = arith.constant 0 : index
    %24 = vector.load %arg5[%c0_16, %c0_17] : memref<32x128xf32, #tpu.memory_space<vmem>>, vector<32x128xf32>
    %cst_18 = arith.constant dense<0.000000e+00> : vector<1x128xf32>
    %25 = tpu.matmul %21, %24, %cst_18 {dimension_numbers = #tpu.dot_dimension_numbers<[1], [0], [0], [1], [0, 0, 1, 1], [], []>} : vector<1x32xf32>, vector<32x128xf32>, vector<1x128xf32> -> vector<1x128xf32>
    %c0_19 = arith.constant 0 : index
    %c0_20 = arith.constant 0 : index
    %26 = vector.load %arg2[%c0_19, %c0_20] : memref<1x128xf32, #tpu.memory_space<vmem>>, vector<1x128xf32>
    %27 = arith.mulf %25, %26 : vector<1x128xf32>
    %c0_21 = arith.constant 0 : index
    %c0_22 = arith.constant 0 : index
    %28 = vector.load %arg3[%c0_21, %c0_22] : memref<1x128xf32, #tpu.memory_space<vmem>>, vector<1x128xf32>
    %29 = arith.mulf %23, %27 : vector<1x128xf32>
    %30 = arith.subf %28, %29 : vector<1x128xf32>
    %31 = vector.broadcast %27 : vector<1x128xf32> to vector<256x128xf32>
    %32 = arith.mulf %1, %31 : vector<256x128xf32>
    %33 = vector.broadcast %30 : vector<1x128xf32> to vector<256x128xf32>
    %34 = arith.addf %32, %33 : vector<256x128xf32>
    %35 = arith.truncf %34 : vector<256x128xf32> to vector<256x128xbf16>
    %c0_23 = arith.constant 0 : index
    %c0_24 = arith.constant 0 : index
    %36 = vector.load %arg6[%c0_23, %c0_24] : memref<128x384xbf16, #tpu.memory_space<vmem>>, vector<128x384xbf16>
    %cst_25 = arith.constant dense<0.000000e+00> : vector<256x384xf32>
    %37 = tpu.matmul %35, %36, %cst_25 {dimension_numbers = #tpu.dot_dimension_numbers<[1], [0], [0], [1], [0, 0, 1, 1], [], []>} : vector<256x128xbf16>, vector<128x384xbf16>, vector<256x384xf32> -> vector<256x384xf32>
    %c0_26 = arith.constant 0 : index
    %c0_27 = arith.constant 0 : index
    %38 = vector.load %arg7[%c0_26, %c0_27] : memref<1x384xf32, #tpu.memory_space<vmem>>, vector<1x384xf32>
    %39 = vector.broadcast %38 : vector<1x384xf32> to vector<256x384xf32>
    %40 = arith.addf %37, %39 : vector<256x384xf32>
    %41 = vector.extract_strided_slice %40 {offsets = [0, 0], sizes = [256, 128], strides = [1, 1]} : vector<256x384xf32> to vector<256x128xf32>
    %cst_28 = arith.constant 0.0883883461 : f32
    %42 = vector.broadcast %cst_28 : f32 to vector<256x128xf32>
    %43 = arith.mulf %41, %42 : vector<256x128xf32>
    %44 = arith.truncf %43 : vector<256x128xf32> to vector<256x128xbf16>
    %45 = vector.extract_strided_slice %40 {offsets = [0, 128], sizes = [256, 128], strides = [1, 1]} : vector<256x384xf32> to vector<256x128xf32>
    %46 = arith.truncf %45 : vector<256x128xf32> to vector<256x128xbf16>
    %47 = vector.extract_strided_slice %40 {offsets = [0, 256], sizes = [256, 128], strides = [1, 1]} : vector<256x384xf32> to vector<256x128xf32>
    %48 = arith.truncf %47 : vector<256x128xf32> to vector<256x128xbf16>
    %cst_29 = arith.constant dense<0.000000e+00> : vector<256x256xf32>
    %49 = tpu.matmul %44, %46, %cst_29 {dimension_numbers = #tpu.dot_dimension_numbers<[1], [1], [0], [0], [0, 0, 1, 0], [], []>} : vector<256x128xbf16>, vector<256x128xbf16>, vector<256x256xf32> -> vector<256x256xf32>
    %cst_30 = arith.constant dense<0xFF800000> : vector<256xf32>
    %50 = vector.multi_reduction <maximumf>, %49, %cst_30 [1] : vector<256x256xf32> to vector<256xf32>
    %51 = vector.shape_cast %50 : vector<256xf32> to vector<256x1xf32>
    %52 = vector.broadcast %51 : vector<256x1xf32> to vector<256x256xf32>
    %53 = arith.subf %49, %52 : vector<256x256xf32>
    %54 = math.exp %53 : vector<256x256xf32>
    %cst_31 = arith.constant dense<0.000000e+00> : vector<256xf32>
    %55 = vector.multi_reduction <add>, %54, %cst_31 [1] : vector<256x256xf32> to vector<256xf32>
    %56 = vector.shape_cast %55 : vector<256xf32> to vector<256x1xf32>
    %57 = arith.truncf %54 : vector<256x256xf32> to vector<256x256xbf16>
    %cst_32 = arith.constant dense<0.000000e+00> : vector<256x128xf32>
    %58 = tpu.matmul %57, %48, %cst_32 {dimension_numbers = #tpu.dot_dimension_numbers<[1], [0], [0], [1], [0, 0, 1, 1], [], []>} : vector<256x256xbf16>, vector<256x128xbf16>, vector<256x128xf32> -> vector<256x128xf32>
    %59 = vector.broadcast %56 : vector<256x1xf32> to vector<256x128xf32>
    %60 = arith.divf %58, %59 : vector<256x128xf32>
    %61 = arith.truncf %60 : vector<256x128xf32> to vector<256x128xbf16>
    %c0_33 = arith.constant 0 : index
    %c0_34 = arith.constant 0 : index
    %62 = vector.load %arg8[%c0_33, %c0_34] : memref<128x128xbf16, #tpu.memory_space<vmem>>, vector<128x128xbf16>
    %cst_35 = arith.constant dense<0.000000e+00> : vector<256x128xf32>
    %63 = tpu.matmul %61, %62, %cst_35 {dimension_numbers = #tpu.dot_dimension_numbers<[1], [0], [0], [1], [0, 0, 1, 1], [], []>} : vector<256x128xbf16>, vector<128x128xbf16>, vector<256x128xf32> -> vector<256x128xf32>
    %c0_36 = arith.constant 0 : index
    %c0_37 = arith.constant 0 : index
    %64 = vector.load %arg9[%c0_36, %c0_37] : memref<1x128xf32, #tpu.memory_space<vmem>>, vector<1x128xf32>
    %65 = vector.broadcast %64 : vector<1x128xf32> to vector<256x128xf32>
    %66 = arith.addf %63, %65 : vector<256x128xf32>
    %67 = arith.addf %1, %66 : vector<256x128xf32>
    %c0_38 = arith.constant 0 : index
    %c0_39 = arith.constant 0 : index
    %c0_40 = arith.constant 0 : index
    %68 = vector.load %arg10[%c0_38, %c0_39, %c0_40] : memref<1x256x128xf32, #tpu.memory_space<vmem>>, vector<1x256x128xf32>
    %69 = vector.shape_cast %68 : vector<1x256x128xf32> to vector<256x128xf32>
    %70 = vector.shape_cast %67 : vector<256x128xf32> to vector<1x256x128xf32>
    tpu.vector_store %arg10[%c0_38, %c0_39, %c0_40], %70 {strides = array<i32>} : memref<1x256x128xf32, #tpu.memory_space<vmem>>, vector<1x256x128xf32>,
    return
  }
  func.func @transform_0(%arg0: i32) -> (i32, i32, i32) {
    %c0_i32 = arith.constant 0 : i32
    %c0_i32_0 = arith.constant 0 : i32
    %c0_i32_1 = arith.constant 0 : i32
    return %arg0, %c0_i32, %c0_i32_0 : i32, i32, i32
  }
  func.func @transform_1(%arg0: i32) -> (i32, i32) {
    %c0_i32 = arith.constant 0 : i32
    %c0_i32_0 = arith.constant 0 : i32
    %c0_i32_1 = arith.constant 0 : i32
    return %c0_i32, %c0_i32_0 : i32, i32
  }
  func.func @transform_2(%arg0: i32) -> (i32, i32) {
    %c0_i32 = arith.constant 0 : i32
    %c0_i32_0 = arith.constant 0 : i32
    %c0_i32_1 = arith.constant 0 : i32
    return %c0_i32, %c0_i32_0 : i32, i32
  }
  func.func @transform_3(%arg0: i32) -> (i32, i32) {
    %c0_i32 = arith.constant 0 : i32
    %c0_i32_0 = arith.constant 0 : i32
    %c0_i32_1 = arith.constant 0 : i32
    return %c0_i32, %c0_i32_0 : i32, i32
  }
  func.func @transform_4(%arg0: i32) -> (i32, i32) {
    %c0_i32 = arith.constant 0 : i32
    %c0_i32_0 = arith.constant 0 : i32
    %c0_i32_1 = arith.constant 0 : i32
    return %c0_i32, %c0_i32_0 : i32, i32
  }
  func.func @transform_5(%arg0: i32) -> (i32, i32) {
    %c0_i32 = arith.constant 0 : i32
    %c0_i32_0 = arith.constant 0 : i32
    %c0_i32_1 = arith.constant 0 : i32
    return %c0_i32, %c0_i32_0 : i32, i32
  }
  func.func @transform_6(%arg0: i32) -> (i32, i32) {
    %c0_i32 = arith.constant 0 : i32
    %c0_i32_0 = arith.constant 0 : i32
    %c0_i32_1 = arith.constant 0 : i32
    return %c0_i32, %c0_i32_0 : i32, i32
  }
  func.func @transform_7(%arg0: i32) -> (i32, i32) {
    %c0_i32 = arith.constant 0 : i32
    %c0_i32_0 = arith.constant 0 : i32
    %c0_i32_1 = arith.constant 0 : i32
    return %c0_i32, %c0_i32_0 : i32, i32
  }
  func.func @transform_8(%arg0: i32) -> (i32, i32) {
    %c0_i32 = arith.constant 0 : i32
    %c0_i32_0 = arith.constant 0 : i32
    %c0_i32_1 = arith.constant 0 : i32
    return %c0_i32, %c0_i32_0 : i32, i32
  }
  func.func @transform_9(%arg0: i32) -> (i32, i32, i32) {
    %c0_i32 = arith.constant 0 : i32
    %c0_i32_0 = arith.constant 0 : i32
    %c0_i32_1 = arith.constant 0 : i32
    return %arg0, %c0_i32, %c0_i32_0 : i32, i32, i32
  }
}

</mosaic_0001>

<bundles_post_ra>
// kernel: tpu_custom_call.1
= control target key start
LH: loop header
LB: loop body
LE: loop exit
PB: predicated region body
PF: predicated region fallthrough
CT: control target
= control target key end

     0   :  { %s5124_s0 = inlined_call_operand.hbm [shape: f32[2,256,128], index: 0, kind: input, shape index: {}]   ;;  %s5125_s1 = inlined_call_operand.vmem [shape: f32[1,128], index: 1, kind: input, shape index: {}]   ;;  %s5126_s2 = inlined_call_operand.vmem [shape: f32[1,128], index: 2, kind: input, shape index: {}]   ;;  %s5127_s3 = inlined_call_operand.vmem [shape: f32[128,32], index: 3, kind: input, shape index: {}]   ;;  %s5128_s4 = inlined_call_operand.vmem [shape: f32[32,128], index: 4, kind: input, shape index: {}]   ;;  %s5129_s5 = inlined_call_operand.hbm [shape: bf16[128,384], index: 5, kind: input, shape index: {}]   ;;  %s5130_s6 = inlined_call_operand.vmem [shape: f32[1,384], index: 6, kind: input, shape index: {}]   ;;  %s5131_s7 = inlined_call_operand.vmem [shape: bf16[128,128], index: 7, kind: input, shape index: {}]   ;;  %s5132_s8 = inlined_call_operand.vmem [shape: f32[1,128], index: 8, kind: input, shape index: {}]   ;;  %s5133_s9 = inlined_call_operand.hbm [shape: f32[2,256,128], index: 9, kind: output, shape index: {}]  }
   0x1   :  { %5161 = sst [smem:[#allocation26_spill]] %s5129_s5 }
   0x2   :  { %14 = vsyncpa [#allocation3], 0 }
   0x3   :  { %16 = vsyncpa [#allocation3 + $0x1], 0 }
   0x4   :  { %17 = vsyncpa [#allocation6], 0 }
   0x5   :  { %18 = vsyncpa [#allocation4], 0 }
   0x6   :  { %20 = vsyncpa [#allocation4 + $0x1], 0  ;;  %s3780_s30 = smov 0   ;;  %s3782_s10 = smov 0  }
   0x7   :  { %s3784_s11 = smov 0   ;;  %s3786_s12 = smov 0  }
   0x8 LB: > { %s3801_s13 = sadd.s32 4294967295, %s3716_s12   ;;  %s2769_s14 = sadd.s32 4294967294, %s3716_s12   ;;  %s3716_s12 = sphi %s3786_s12, %s5229_s12   ;;  %s3712_s11 = sphi %s3784_s11, %s5232_s11   ;;  %s3708_s10 = sphi %s3782_s10, %s5231_s10   ;;  %s3704_s30 = sphi %s3780_s30, %s5230_s30  }
   0x9   : > { %p46_p0 = scmp.ne.s32.totalorder %s3708_s10, %s3704_s30  ;;  %p5137_p1 = scmp.eq.s32.totalorder %s3801_s13, 0 }
   0xa   : > { %p244_p3 = scmp.eq.s32.totalorder %s2769_s14, 1  ;;  %p2770_p5 = scmp.ge.s32.totalorder %s3716_s12, 1 }
   0xb   : > { %p3810_p4 = por %p5137_p1, %p46_p0  ;;  %p251_p7 = scmp.lt.s32.totalorder %s3716_s12, 3 }
   0xc   : > { %p3815_p6 = por %p244_p3, %p46_p0  ;;  %s3718_s18 = smov [#allocation5]  }
   0xd   : > { %s5162_s15 = scalar_select %p3810_p4, 1, 0 }
   0xe   : > { %s5163_s16 = scalar_select %p3815_p6, 1, 0 }
   0xf   : > { %p3820_p8 = pnand %p2770_p5, %p251_p7  ;;  %s275_s19 = sshll.u32 %s3718_s18, 4  ;;  %s276_s19 = int_to_ptr.vmem [resolvable:$true] %s275_s19 }
  0x10   : > { %5164 = sst [smem:[#allocation11_spill]] %s5163_s16  ;;  %s3834_s21 = sadd.s32 1, %s3716_s12  }
  0x11   : > { %s5165_s17 = scalar_select %p3820_p8, 1, 0 }
  0x12   : > { %p3270_p9 = pneg %p3820_p8  ;;  %5167 = sst [smem:[#allocation12_spill]] %s3834_s21 }
  0x13   : > { %s33_s22 = sadd.s32 1, %s3712_s11  ;;  %s30_s23 = ssub.s32 %s3716_s12, %s3834_s21 }
  0x14   : > { %p3829_p11 = pnand %p3270_p9, %p5137_p1  ;;  %s3605_s24 = scalar_lea.vmem %s276_s19, 3072 }
  0x15   : > { %p3606_p13 = scmp.ne.s32.totalorder %s276_s19, %s3605_s24  ;;  %p3613_p5 = scmp.lt.s32.totalorder %s276_s19, %s276_s19 }
  0x16   : > { %p3596_p12 = pneg %p3829_p11  ;;  %p3614_p7 = scmp.lt.s32.totalorder %s3605_s24, %s3605_s24 }
  0x18   : > { %p3608_p0 = pnand %p3606_p13, %p3596_p12  ;;  %p3615_p10 = por %p3614_p7, %p3613_p5 }
  0x1a   : > { %p3609_p3 = pneg %p3608_p0 }
  0x1c   : > { %p3616_p2 = pnand %p3615_p10, %p3609_p3 }
  0x1e   : > { %3619 = shalt.err (!%p3616_p2)
}
  0x1f   : > { %s3719_s25 = smov 192   ;;  %s3720_s26 = smov 12  }
  0x20   : > { %s5168_s5 = sld [smem:[#allocation26_spill]]  ;;  %p31_p9 = scmp.eq.s32.totalorder %s30_s23, 0 }
  0x21   : > { %p40_p12 = scmp.ne.s32.totalorder %s3712_s11, %s3708_s10  ;;  %p41_p10 = scmp.eq.s32.totalorder %s3716_s12, 0 }
  0x22   : > { %p3283_p2 = scmp.lt.s32.totalorder %s3716_s12, 2  ;;  %p5169_p0 = scmp.eq.s32.totalorder %s3801_s13, 1 }
  0x23   : > { %s3851_s29 = scalar_select %p31_p9, %s3712_s11, %s33_s22  }
  0x24   : > { %p42_p13 = por %p41_p10, %p40_p12  ;;  %p3855_p3 = por %p5169_p0, %p40_p12 }
  0x25   : > { %s298_s18 = sand.u32 1, %s3712_s11   ;;  %s2820_s24 = sshll.u32 %s3716_s12, 12 }
  0x26   : > { %3273 = dma.hbm_to_vmem [thread:$0]  (!%p3829_p11), %s5168_s5, 3072, %s276_s19, [#allocation6], %s3719_s25, %s3719_s25, %s3720_s26  }
  0x27   : > { %s5170_s14 = scalar_select %p3855_p3, 1, 0 }
  0x28   : > { %s2773_s21 = sshll.u32 %s298_s18, 8  ;;  %s3864_s27 = scalar_lea.hbm %s5124_s0, %s2820_s24 }
  0x29   : > { %s302_s19 = scalar_lea.vmem [#allocation2], %s2773_s21  ;;  %p3866_p11 = pnand %p3283_p2, %p42_p13 }
  0x2a   : > { %s309_s22 = sshll.u32 %s302_s19, 4  ;;  %s3872_s25 = scalar_lea.sflag [#allocation3], %s298_s18  ;;  %s3870_s22 = int_to_ptr.vmem [resolvable:$true] %s309_s22 }
  0x2b   : > { %s3620_s26 = scalar_lea.hbm %s3864_s27, 4096  ;;  %p3622_p7 = pneg %p3866_p11 }
  0x2c   : > { %p3621_p5 = scmp.ne.s32.totalorder %s3864_s27, %s3620_s26  ;;  %s3625_s21 = scalar_lea.hbm %s5124_s0, 8192 }
  0x2d   : > { %p3626_p10 = scmp.lt.s32.totalorder %s3864_s27, %s5124_s0  ;;  %p3627_p2 = scmp.lt.s32.totalorder %s3625_s21, %s3620_s26 }
  0x2e   : > { %p3623_p9 = pnand %p3622_p7, %p3621_p5 }
  0x2f   : > { %p3628_p13 = por %p3627_p2, %p3626_p10 }
  0x30   : > { %p3624_p12 = pneg %p3623_p9 }
  0x32   : > { %p3629_p0 = pnand %p3628_p13, %p3624_p12 }
  0x34   : > { %3632 = shalt.err (!%p3629_p0)
}
  0x35   : > { %s3633_s18 = scalar_lea.vmem %s3870_s22, 4096  ;;  %s3721_s19 = smov [#allocation2]  }
  0x36   : > { %p3634_p1 = scmp.ne.s32.totalorder %s3870_s22, %s3633_s18  ;;  %s3638_s5 = sshll.u32 %s3721_s19, 4  ;;  %s3639_s5 = int_to_ptr.vmem [resolvable:$false] %s3638_s5 }
  0x37   : > { %s3640_s16 = scalar_lea.vmem %s3639_s5, 8192  ;;  %p3641_p9 = scmp.lt.s32.totalorder %s3870_s22, %s3639_s5 }
  0x38   : > { %p3636_p6 = pnand %p3634_p1, %p3622_p7  ;;  %p3642_p3 = scmp.lt.s32.totalorder %s3640_s16, %s3633_s18 }
  0x3a   : > { %p3637_p5 = pneg %p3636_p6  ;;  %p3643_p4 = por %p3642_p3, %p3641_p9 }
  0x3c   : > { %p3644_p8 = pnand %p3643_p4, %p3637_p5 }
  0x3e   : > { %3647 = shalt.err (!%p3644_p8)
}
  0x3f   : > { %s3722_s26 = smov 128   ;;  %s3723_s28 = smov 8  }
  0x40   : > { %3277 = dma.hbm_to_vmem [thread:$0]  (!%p3866_p11), %s3864_s27, 4096, %s3870_s22, %s3872_s25, %s3722_s26, %s3722_s26, %s3723_s28  }
  0x41   : > { %p5172_p1 = scmp.ne.s32.totalorder %s5165_s17, 0 }
  0x43   : > { %321 = sbr.rel (%p5172_p1) target bundleno = 1868 (0x74c), region = 56 }
  0x48   : > { %s3896_s21 = sand.u32 1, %s3708_s10   ;;  %p5173_p4 = scmp.ne.s32.totalorder %s5162_s15, 0 }
  0x49   : > { %s2777_s5 = sshll.u32 %s3896_s21, 8  ;;  %s324_s24 = scalar_lea.sflag [#allocation3], %s3896_s21 }
  0x4a   : > { %s3902_s20 = scalar_lea.vmem [#allocation2], %s2777_s5 }
  0x4b   : > { %3691 = dma.done.wait (%p5173_p4), %s324_s24, 4096  }
  0x4c   : > { %3693 = vsyncadd (%p5173_p4), %s324_s24, 4294963200  ;;  %p5174_p6 = scmp.eq.s32.totalorder %s3801_s13, 0 }
  0x4e   : > { %3695 = dma.done.wait (%p5174_p6), [#allocation6], 3072   ;;  %p5175_p8 = pmov %p5174_p6 }
  0x4f   : > { %v3724_v0 = vmov 0.0   ;;  %vm3725_vm0 = vmmov 0   ;;  %v520_v1 = vld [vmem:[%s5127_s3 + $0x78] sm:$0xff]  ;;  %v519_v2 = vld [vmem:[%s5127_s3 + $0x70] sm:$0xff]  ;;  %v518_v3 = vld [vmem:[%s5127_s3 + $0x68] sm:$0xff]  ;;  %vm673_vm1 = vcmask 261120  }
  0x50   : > { %3697 = vsyncadd (%p5175_p8), [#allocation6], 4294964224  ;;  %3074 = vmatprep.subr.mxu0 %v3724_v0  ;;  %3109 = vmatprep.subr.mxu1 %v3724_v0  ;;  %v517_v4 = vld [vmem:[%s5127_s3 + $0x60] sm:$0xff]  ;;  %v3938_v6 = vld [vmem:[%s3902_s20 + $0x8] sm:$0xff]  ;;  %s4979_s23 = scalar_lea.vmem [#allocation7], %s2777_s5  ;;  %s2821_s5 = sshll.u32 %s3801_s13, 12 }
  0x51   : > { %3106 = vmatprep.mubr.msk.f32.mxu0 %vm3725_vm0, %v3724_v0  ;;  %3141 = vmatprep.mubr.msk.f32.mxu1 %vm3725_vm0, %v3724_v0  ;;  %v3935_v5 = vld [vmem:[%s3902_s20] sm:$0xff]  ;;  %v516_v7 = vld [vmem:[%s5127_s3 + $0x58] sm:$0xff]  ;;  %v3946_v8 = vld [vmem:[%s3902_s20 + $0x10] sm:$0xff]  ;;  %v437_v25 = vmul.f32 %v3938_v6, %v3938_v6  ;;  %s2686_s25 = sshll.u32 %s4979_s23, 4  ;;  %s5076_s16 = scalar_lea.hbm %s5133_s9, %s2821_s5  ;;  %s5078_s25 = int_to_ptr.vmem [resolvable:$true] %s2686_s25 }
  0x52   : > { %3075 = vmatpush3.msra.mxu0 %v520_v1  ;;  %3110 = vmatpush3.msra.mxu1 %v520_v1  ;;  %v399_v9 = vadd.f32 %v3938_v6, %v3935_v5  ;;  %v3951_v10 = vld [vmem:[%s3902_s20 + $0x18] sm:$0xff]  ;;  %v515_v11 = vld [vmem:[%s5127_s3 + $0x50] sm:$0xff]  ;;  %v3960_v13 = vld [vmem:[%s3902_s20 + $0x20] sm:$0xff]  ;;  %v436_v24 = vmul.f32 %v3935_v5, %v3935_v5  ;;  %v438_v30 = vmul.f32 %v3946_v8, %v3946_v8  ;;  %s2673_s13 = scalar_lea.sflag [#allocation4], %s3896_s21  ;;  %s3648_s26 = scalar_lea.vmem %s5078_s25, 4096 }
  0x53   : > { %3076 = vmatprep.subr.mxu0 %v3724_v0  ;;  %3111 = vmatprep.subr.mxu1 %v3724_v0  ;;  %v514_v14 = vld [vmem:[%s5127_s3 + $0x48] sm:$0xff]  ;;  %v513_v17 = vld [vmem:[%s5127_s3 + $0x40] sm:$0xff]  ;;  %v3978_v19 = vld [vmem:[%s3902_s20 + $0x30] sm:$0xff]  ;;  %v439_v34 = vmul.f32 %v3951_v10, %v3951_v10  ;;  %v440_v39 = vmul.f32 %v3960_v13, %v3960_v13  ;;  %p3649_p3 = scmp.ne.s32.totalorder %s5078_s25, %s3648_s26  ;;  %p5225_p11 = scmp.ne.s32.totalorder %s5170_s14, 0 }
  0x54   : > { %3077 = vmatpush3.msra.mxu0 %v519_v2  ;;  %3112 = vmatpush3.msra.mxu1 %v519_v2  ;;  %v400_v12 = vadd.f32 %v399_v9, %v3946_v8  ;;  %v3969_v16 = vld [vmem:[%s3902_s20 + $0x28] sm:$0xff]  ;;  %v512_v20 = vld [vmem:[%s5127_s3 + $0x38] sm:$0xff]  ;;  %v511_v22 = vld [vmem:[%s5127_s3 + $0x30] sm:$0xff]  ;;  %v468_v35 = vadd.f32 %v437_v25, %v436_v24  ;;  %v442_v49 = vmul.f32 %v3978_v19, %v3978_v19  ;;  %s3727_s28 = smov [#allocation7]  }
  0x55   : > { %3078 = vmatprep.subr.mxu0 %v3724_v0  ;;  %3113 = vmatprep.subr.mxu1 %v3724_v0  ;;  %v3990_v23 = vld [vmem:[%s3902_s20 + $0x38] sm:$0xff]  ;;  %v510_v26 = vld [vmem:[%s5127_s3 + $0x28] sm:$0xff]  ;;  %v4002_v27 = vld [vmem:[%s3902_s20 + $0x40] sm:$0xff]  ;;  %v441_v44 = vmul.f32 %v3969_v16, %v3969_v16  ;;  %p3650_p7 = pnand %p3649_p3, %p5225_p11  ;;  %s3652_s24 = sshll.u32 %s3727_s28, 4  ;;  %s3653_s24 = int_to_ptr.vmem [resolvable:$false] %s3652_s24 }
  0x56   : > { %3079 = vmatpush3.msra.mxu0 %v518_v3  ;;  %3114 = vmatpush3.msra.mxu1 %v518_v3  ;;  %v401_v15 = vadd.f32 %v400_v12, %v3951_v10  ;;  %v4006_v29 = vld [vmem:[%s3902_s20 + $0x48] sm:$0xff]  ;;  %v509_v31 = vld [vmem:[%s5127_s3 + $0x20] sm:$0xff]  ;;  %v4017_v33 = vld [vmem:[%s3902_s20 + $0x50] sm:$0xff]  ;;  %v469_v40 = vadd.f32 %v468_v35, %v438_v30  ;;  %v443_v54 = vmul.f32 %v3990_v23, %v3990_v23  ;;  %s3654_s15 = scalar_lea.vmem %s3653_s24, 8192  ;;  %p3655_p10 = scmp.lt.s32.totalorder %s5078_s25, %s3653_s24 }
  0x57   : > { %3080 = vmatprep.subr.mxu0 %v3724_v0  ;;  %3115 = vmatprep.subr.mxu1 %v3724_v0  ;;  %v508_v36 = vld [vmem:[%s5127_s3 + $0x18] sm:$0xff]  ;;  %v507_v41 = vld [vmem:[%s5127_s3 + $0x10] sm:$0xff]  ;;  %v4039_v43 = vld [vmem:[%s3902_s20 + $0x60] sm:$0xff]  ;;  %v444_v58 = vmul.f32 %v4002_v27, %v4002_v27  ;;  %v445_v61 = vmul.f32 %v4006_v29, %v4006_v29  ;;  %v446_v2 = vmul.f32 %v4017_v33, %v4017_v33  ;;  %p3651_p12 = pneg %p3650_p7  ;;  %p3656_p2 = scmp.lt.s32.totalorder %s3654_s15, %s3648_s26 }
  0x58   : > { %3081 = vmatpush3.msra.mxu0 %v517_v4  ;;  %3116 = vmatpush3.msra.mxu1 %v517_v4  ;;  %v402_v18 = vadd.f32 %v401_v15, %v3960_v13  ;;  %v4028_v38 = vld [vmem:[%s3902_s20 + $0x58] sm:$0xff]  ;;  %v470_v45 = vadd.f32 %v469_v40, %v439_v34  ;;  %v506_v46 = vld [vmem:[%s5127_s3 + $0x8] sm:$0xff]  ;;  %v505_v51 = vld [vmem:[%s5127_s3] sm:$0xff]  ;;  %v448_v15 = vmul.f32 %v4039_v43, %v4039_v43 }
  0x59   : > { %3082 = vmatprep.subr.mxu0 %v3724_v0  ;;  %3117 = vmatprep.subr.mxu1 %v3724_v0  ;;  %v4050_v48 = vld [vmem:[%s3902_s20 + $0x68] sm:$0xff]  ;;  %v4061_v53 = vld [vmem:[%s3902_s20 + $0x70] sm:$0xff]  ;;  %v4069_v57 = vld [vmem:[%s3902_s20 + $0x78] sm:$0xff]  ;;  %v447_v9 = vmul.f32 %v4028_v38, %v4028_v38  ;;  %p3657_p13 = por %p3656_p2, %p3655_p10 }
  0x5a   : > { %3083 = vmatpush3.msra.mxu0 %v516_v7  ;;  %3118 = vmatpush3.msra.mxu1 %v516_v7  ;;  %v403_v21 = vadd.f32 %v402_v18, %v3969_v16  ;;  %v471_v50 = vadd.f32 %v470_v45, %v440_v39  ;;  %v4082_v1 = vld [vmem:[%s3902_s20 + $0x80] sm:$0xff]  ;;  %v4088_v7 = vld [vmem:[%s3902_s20 + $0x88] sm:$0xff] }
  0x5b   : > { %3084 = vmatprep.subr.mxu0 %v3724_v0  ;;  %3119 = vmatprep.subr.mxu1 %v3724_v0  ;;  %v4106_v25 = vld [vmem:[%s3902_s20 + $0xa0] sm:$0xff]  ;;  %p3658_p0 = pnand %p3657_p13, %p3651_p12 }
  0x5c   : > { %3085 = vmatpush3.msra.mxu0 %v515_v11  ;;  %3120 = vmatpush3.msra.mxu1 %v515_v11  ;;  %v404_v28 = vadd.f32 %v403_v21, %v3978_v19  ;;  %v472_v55 = vadd.f32 %v471_v50, %v441_v44  ;;  %v449_v21 = vmul.f32 %v4050_v48, %v4050_v48 }
  0x5d   : > { %3086 = vmatprep.subr.mxu0 %v3724_v0  ;;  %3121 = vmatprep.subr.mxu1 %v3724_v0 }
  0x5e   : > { %3087 = vmatpush3.msra.mxu0 %v514_v14  ;;  %3122 = vmatpush3.msra.mxu1 %v514_v14  ;;  %v405_v32 = vadd.f32 %v404_v28, %v3990_v23  ;;  %v473_v59 = vadd.f32 %v472_v55, %v442_v49  ;;  %v4094_v14 = vld [vmem:[%s3902_s20 + $0x90] sm:$0xff] }
  0x5f   : > { %3088 = vmatprep.subr.mxu0 %v3724_v0  ;;  %3123 = vmatprep.subr.mxu1 %v3724_v0 }
  0x60   : > { %3089 = vmatpush3.msra.mxu0 %v513_v17  ;;  %3124 = vmatpush3.msra.mxu1 %v513_v17  ;;  %v406_v37 = vadd.f32 %v405_v32, %v4002_v27  ;;  %v474_v62 = vadd.f32 %v473_v59, %v443_v54  ;;  %v451_v32 = vmul.f32 %v4069_v57, %v4069_v57 }
  0x61   : > { %3090 = vmatprep.subr.mxu0 %v3724_v0  ;;  %3125 = vmatprep.subr.mxu1 %v3724_v0 }
  0x62   : > { %3091 = vmatpush3.msra.mxu0 %v512_v20  ;;  %3126 = vmatpush3.msra.mxu1 %v512_v20  ;;  %v407_v42 = vadd.f32 %v406_v37, %v4006_v29  ;;  %v475_v3 = vadd.f32 %v474_v62, %v444_v58  ;;  %v4100_v20 = vld [vmem:[%s3902_s20 + $0x98] sm:$0xff]  ;;  %v452_v37 = vmul.f32 %v4082_v1, %v4082_v1 }
  0x63   : > { %3092 = vmatprep.subr.mxu0 %v3724_v0  ;;  %3127 = vmatprep.subr.mxu1 %v3724_v0  ;;  %v456_v58 = vmul.f32 %v4106_v25, %v4106_v25 }
  0x64   : > { %3093 = vmatpush3.msra.mxu0 %v511_v22  ;;  %3128 = vmatpush3.msra.mxu1 %v511_v22  ;;  %v408_v47 = vadd.f32 %v407_v42, %v4017_v33  ;;  %v476_v11 = vadd.f32 %v475_v3, %v445_v61  ;;  %v453_v42 = vmul.f32 %v4088_v7, %v4088_v7  ;;  %v4148_v61 = vld [vmem:[%s3902_s20 + $0xd8] sm:$0xff]  ;;  %v4154_v3 = vld [vmem:[%s3902_s20 + $0xe0] sm:$0xff] }
  0x65   : > { %3094 = vmatprep.subr.mxu0 %v3724_v0  ;;  %3129 = vmatprep.subr.mxu1 %v3724_v0 }
  0x66   : > { %3095 = vmatpush3.msra.mxu0 %v510_v26  ;;  %3130 = vmatpush3.msra.mxu1 %v510_v26  ;;  %v409_v52 = vadd.f32 %v408_v47, %v4028_v38  ;;  %v477_v17 = vadd.f32 %v476_v11, %v446_v2  ;;  %v450_v26 = vmul.f32 %v4061_v53, %v4061_v53 }
  0x67   : > { %3096 = vmatprep.subr.mxu0 %v3724_v0  ;;  %3131 = vmatprep.subr.mxu1 %v3724_v0  ;;  %v454_v47 = vmul.f32 %v4094_v14, %v4094_v14 }
  0x68   : > { %3097 = vmatpush3.msra.mxu0 %v509_v31  ;;  %3132 = vmatpush3.msra.mxu1 %v509_v31  ;;  %v410_v56 = vadd.f32 %v409_v52, %v4039_v43  ;;  %v478_v22 = vadd.f32 %v477_v17, %v447_v9  ;;  %v4112_v31 = vld [vmem:[%s3902_s20 + $0xa8] sm:$0xff]  ;;  %v455_v52 = vmul.f32 %v4100_v20, %v4100_v20 }
  0x69   : > { %3098 = vmatprep.subr.mxu0 %v3724_v0  ;;  %3133 = vmatprep.subr.mxu1 %v3724_v0  ;;  %v457_v62 = vmul.f32 %v4112_v31, %v4112_v31 }
  0x6a   : > { %3099 = vmatpush3.msra.mxu0 %v508_v36  ;;  %3134 = vmatpush3.msra.mxu1 %v508_v36  ;;  %v411_v60 = vadd.f32 %v410_v56, %v4050_v48  ;;  %v479_v28 = vadd.f32 %v478_v22, %v448_v15  ;;  %v4118_v36 = vld [vmem:[%s3902_s20 + $0xb0] sm:$0xff] }
  0x6b   : > { %3100 = vmatprep.subr.mxu0 %v3724_v0  ;;  %3135 = vmatprep.subr.mxu1 %v3724_v0  ;;  %v4142_v56 = vld [vmem:[%s3902_s20 + $0xd0] sm:$0xff] }
  0x6c   : > { %3101 = vmatpush3.msra.mxu0 %v507_v41  ;;  %3136 = vmatpush3.msra.mxu1 %v507_v41  ;;  %v412_v63 = vadd.f32 %v411_v60, %v4061_v53  ;;  %v480_v34 = vadd.f32 %v479_v28, %v449_v21  ;;  %v4124_v41 = vld [vmem:[%s3902_s20 + $0xb8] sm:$0xff]  ;;  %v4166_v21 = vld [vmem:[%s3902_s20 + $0xf0] sm:$0xff] }
  0x6d   : > { %3102 = vmatprep.subr.mxu0 %v3724_v0  ;;  %3137 = vmatprep.subr.mxu1 %v3724_v0  ;;  %v459_v15 = vmul.f32 %v4124_v41, %v4124_v41  ;;  %v4172_v28 = vld [vmem:[%s3902_s20 + $0xf8] sm:$0xff] }
  0x6e   : > { %3103 = vmatpush3.msra.mxu0 %v506_v46  ;;  %3138 = vmatpush3.msra.mxu1 %v506_v46  ;;  %v413_v4 = vadd.f32 %v412_v63, %v4069_v57  ;;  %v481_v39 = vadd.f32 %v480_v34, %v450_v26  ;;  %v4130_v46 = vld [vmem:[%s3902_s20 + $0xc0] sm:$0xff] }
  0x6f   : > { %3104 = vmatprep.subr.mxu0 %v3724_v0  ;;  %3139 = vmatprep.subr.mxu1 %v3724_v0  ;;  %v460_v22 = vmul.f32 %v4130_v46, %v4130_v46 }
  0x70   : > { %3105 = vmatpush3.msra.mxu0 %v505_v51  ;;  %3140 = vmatpush3.msra.mxu1 %v505_v51  ;;  %v414_v12 = vadd.f32 %v413_v4, %v4082_v1  ;;  %v482_v44 = vadd.f32 %v481_v39, %v451_v32  ;;  %v4136_v51 = vld [vmem:[%s3902_s20 + $0xc8] sm:$0xff]  ;;  %v458_v4 = vmul.f32 %v4118_v36, %v4118_v36 }
  0x71   : > { %3144 = vmatprep.subr.mxu0 %v3724_v0  ;;  %3155 = vmatprep.subr.mxu1 %v3724_v0 }
  0x72   : > { %v415_v18 = vadd.f32 %v414_v12, %v4088_v7  ;;  %v483_v49 = vadd.f32 %v482_v44, %v452_v37  ;;  %v4160_v12 = vld [vmem:[%s3902_s20 + $0xe8] sm:$0xff] }
  0x74   : > { %v416_v24 = vadd.f32 %v415_v18, %v4094_v14  ;;  %v484_v54 = vadd.f32 %v483_v49, %v453_v42 }
  0x76   : > { %v417_v30 = vadd.f32 %v416_v24, %v4100_v20  ;;  %v485_v59 = vadd.f32 %v484_v54, %v454_v47 }
  0x78   : > { %v418_v35 = vadd.f32 %v417_v30, %v4106_v25  ;;  %v486_v63 = vadd.f32 %v485_v59, %v455_v52  ;;  %v461_v30 = vmul.f32 %v4136_v51, %v4136_v51 }
  0x7a   : > { %v419_v40 = vadd.f32 %v418_v35, %v4112_v31  ;;  %v487_v9 = vadd.f32 %v486_v63, %v456_v58  ;;  %v462_v35 = vmul.f32 %v4142_v56, %v4142_v56 }
  0x7c   : > { %v420_v45 = vadd.f32 %v419_v40, %v4118_v36  ;;  %v488_v17 = vadd.f32 %v487_v9, %v457_v62  ;;  %v463_v40 = vmul.f32 %v4148_v61, %v4148_v61  ;;  %v672_v9 = vld [vmem:[%s5128_s4 + $0x18] sm:$0xff] }
  0x7e   : > { %v421_v50 = vadd.f32 %v420_v45, %v4124_v41  ;;  %v489_v24 = vadd.f32 %v488_v17, %v458_v4  ;;  %v464_v45 = vmul.f32 %v4154_v3, %v4154_v3 }
  0x80   : > { %v422_v55 = vadd.f32 %v421_v50, %v4130_v46  ;;  %v490_v32 = vadd.f32 %v489_v24, %v459_v15  ;;  %v465_v50 = vmul.f32 %v4160_v12, %v4160_v12  ;;  %v671_v15 = vld [vmem:[%s5128_s4 + $0x10] sm:$0xff] }
  0x82   : > { %v423_v60 = vadd.f32 %v422_v55, %v4136_v51  ;;  %v491_v37 = vadd.f32 %v490_v32, %v460_v22  ;;  %v466_v55 = vmul.f32 %v4166_v21, %v4166_v21  ;;  %v670_v32 = vld [vmem:[%s5128_s4 + $0x8] sm:$0xff] }
  0x84   : > { %v424_v2 = vadd.f32 %v423_v60, %v4142_v56  ;;  %v492_v42 = vadd.f32 %v491_v37, %v461_v30  ;;  %v467_v60 = vmul.f32 %v4172_v28, %v4172_v28 }
  0x86   : > { %v425_v11 = vadd.f32 %v424_v2, %v4148_v61  ;;  %v493_v47 = vadd.f32 %v492_v42, %v462_v35 }
  0x88   : > { %v426_v18 = vadd.f32 %v425_v11, %v4154_v3  ;;  %v494_v52 = vadd.f32 %v493_v47, %v463_v40 }
  0x8a   : > { %v427_v26 = vadd.f32 %v426_v18, %v4160_v12  ;;  %v495_v58 = vadd.f32 %v494_v52, %v464_v45  ;;  %v3328_v52 = vld [vmem:[#allocation5 + $0xa8] ss:$12 sps:$4 sm:$0xff]  }
  0x8c   : > { %v428_v34 = vadd.f32 %v427_v26, %v4166_v21  ;;  %v496_v62 = vadd.f32 %v495_v58, %v465_v50  ;;  %v3334_v58 = vld [vmem:[#allocation5 + $0x94] ss:$12 sps:$4 sm:$0xff]  }
  0x8e   : > { %v429_v39 = vadd.f32 %v428_v34, %v4172_v28  ;;  %v497_v2 = vadd.f32 %v496_v62, %v466_v55  ;;  %v669_v34 = vld [vmem:[%s5128_s4] sm:$0xff]  ;;  %v3331_v55 = vld [vmem:[#allocation5 + $0xb0] ss:$12 sps:$4 sm:$0xff]  }
  0x8f   : > { %v3338_v62 = vld [vmem:[#allocation5 + $0x7c] ss:$12 sps:$4 sm:$0xff]  }
  0x90   : > { %v430_v44 = vrot.slane %v429_v39, 4  ;;  %v498_v11 = vadd.f32 %v497_v2, %v467_v60  ;;  %v3332_v60 = vld [vmem:[#allocation5 + $0x90] ss:$12 sps:$4 sm:$0xff]   ;;  %v3336_v2 = vld [vmem:[#allocation5 + $0x78] ss:$12 sps:$4 sm:$0xff]  }
  0x92   : > { %v431_v49 = vadd.f32 %v430_v44, %v429_v39  ;;  %v499_v17 = vrot.slane %v498_v11, 4 }
  0x94   : > { %v432_v54 = vrot.slane %v431_v49, 2  ;;  %v500_v18 = vadd.f32 %v499_v17, %v498_v11  ;;  %v3340_v11 = vld [vmem:[#allocation5 + $0x60] ss:$12 sps:$4 sm:$0xff]   ;;  %v3347_v17 = vld [vmem:[#allocation5 + $0x50] ss:$12 sps:$4 sm:$0xff]  }
  0x96   : > { %v433_v59 = vadd.f32 %v432_v54, %v431_v49  ;;  %v501_v22 = vrot.slane %v500_v18, 2  ;;  %v3330_v54 = vld [vmem:[#allocation5 + $0xac] ss:$12 sps:$4 sm:$0xff]  }
  0x98   : > { %v434_v63 = vrot.slane %v433_v59, 1  ;;  %v502_v24 = vadd.f32 %v501_v22, %v500_v18  ;;  %v3344_v18 = vld [vmem:[#allocation5 + $0x48] ss:$12 sps:$4 sm:$0xff]  }
  0x99   : > { %v3350_v22 = vld [vmem:[#allocation5 + $0x34] ss:$12 sps:$4 sm:$0xff]  }
  0x9a   : > { %v435_v4 = vadd.f32 %v434_v63, %v433_v59  ;;  %v503_v26 = vrot.slane %v502_v24, 1  ;;  %v3335_v59 = vld [vmem:[#allocation5 + $0x98] ss:$12 sps:$4 sm:$0xff]   ;;  %v3339_v63 = vld [vmem:[#allocation5 + $0x80] ss:$12 sps:$4 sm:$0xff]  }
  0x9c   : > { %3107 = vmatmul.mubr.f32.vlgmr.msra.gmra.mxu0 %v435_v4  ;;  %v504_v30 = vadd.f32 %v503_v26, %v502_v24  ;;  %v3342_v4 = vld [vmem:[#allocation5 + $0x64] ss:$12 sps:$4 sm:$0xff]  }
  0x9d   : > { %3145 = vmatpush3.msra.mxu0 %v672_v9  ;;  %3152 = vmatprep.mubr.msk.f32.mxu0 %vm3725_vm0, %v3724_v0  ;;  %v3348_v24 = vld [vmem:[#allocation5 + $0x30] ss:$12 sps:$4 sm:$0xff]   ;;  %v3351_v26 = vld [vmem:[#allocation5 + $0x38] ss:$12 sps:$4 sm:$0xff]  }
  0x9e   : > { %3146 = vmatprep.subr.mxu0 %v3724_v0  ;;  %3142 = vmatmul.mubr.f32.vlgmr.msra.gmra.mxu1 %v504_v30  ;;  %v3354_v30 = vld [vmem:[#allocation5 + $0x1c] ss:$12 sps:$4 sm:$0xff]  }
  0x9f   : > { %3147 = vmatpush3.msra.mxu0 %v671_v15  ;;  %3156 = vmatpush3.msra.mxu1 %v672_v9  ;;  %v3343_v9 = vld [vmem:[#allocation5 + $0x68] ss:$12 sps:$4 sm:$0xff]  }
  0xa0   : > { %3148 = vmatprep.subr.mxu0 %v3724_v0  ;;  %3163 = vmatprep.mubr.msk.f32.mxu1 %vm3725_vm0, %v3724_v0 }
  0xa1   : > { %3157 = vmatprep.subr.mxu1 %v3724_v0  ;;  %3149 = vmatpush3.msra.mxu0 %v670_v32 }
  0xa2   : > { %3158 = vmatpush3.msra.mxu1 %v671_v15  ;;  %3150 = vmatprep.subr.mxu0 %v3724_v0  ;;  %v3346_v15 = vld [vmem:[#allocation5 + $0x4c] ss:$12 sps:$4 sm:$0xff]  }
  0xa3   : > { %3159 = vmatprep.subr.mxu1 %v3724_v0  ;;  %3151 = vmatpush3.msra.mxu0 %v669_v34 }
  0xa4   : > { %3160 = vmatpush3.msra.mxu1 %v670_v32  ;;  %1092 = vmatprep.subr.bf16.mxu0 %v3330_v54  ;;  %v3352_v32 = vld [vmem:[#allocation5 + $0x18] ss:$12 sps:$4 sm:$0xff]   ;;  %v822_v54 = vld [vmem:[%s5126_s2] sm:$0x1] }
  0xa5   : > { %3161 = vmatprep.subr.mxu1 %v3724_v0 }
  0xa6   : > { %3162 = vmatpush3.msra.mxu1 %v669_v34  ;;  %v3355_v34 = vld [vmem:[#allocation5 + $0x20] ss:$12 sps:$4 sm:$0xff]  }
  0xa7   : > { %3166 = vmatprep.subr.bf16.mxu1 %v3331_v55 }
 0x15c   : > { %v587_v35 = vpop.f32.mrf.mxu0 }
 0x15d   : > { %v662_v37 = vmul.f32 0.0009765625, %v587_v35  ;;  %v3356_v35 = vld [vmem:[#allocation5] ss:$12 sps:$4 sm:$0xff]  }
 0x15e   : > { %v3108_v39 = vpop.f32.mrf.mxu0  ;;  %v657_v42 = vpop.f32.mrf.mxu1 }
 0x15f   : > { %3153 = vmatmul.mubr.msk.f32.vlgmr.msra.gmra.mxu0 %vm673_vm1, %v662_v37  ;;  %v664_v40 = vmul.f32 %v662_v37, %v662_v37  ;;  %v663_v44 = vmul.f32 0.0009765625, %v657_v42  ;;  %v3358_v37 = vld [vmem:[#allocation5 + $0x4] ss:$12 sps:$4 sm:$0xff]   ;;  %v3359_v39 = vld [vmem:[#allocation5 + $0x8] ss:$12 sps:$4 sm:$0xff]  }
 0x160   : > { %v3143_v45 = vpop.f32.mrf.mxu1  ;;  %1093 = vmatpush1.bf16.msra.mxu0 %v3328_v52 }
 0x161   : > { %v665_v47 = vsub.f32 %v663_v44, %v664_v40  ;;  %1094 = vmatprep.subr.bf16.mxu0 %v3334_v58  ;;  %v3726_v40 = vmov 0   ;;  %v825_v45 = vlaneseq }
 0x162   : > { %1124 = vmatprep.mubr.bf16.mxu0 %v3726_v40 }
 0x163   : > { %v666_v49 = vmax.f32 %v665_v47, 0.0  ;;  %v4213_v47 = vshrl.u32 %v825_v45, 7 }
 0x164   : > { %1095 = vmatpush1.bf16.msra.mxu0 %v3332_v60 }
 0x165   : > { %v667_v50 = vadd.f32 1e-06, %v666_v49  ;;  %1096 = vmatprep.subr.bf16.mxu0 %v3338_v62  ;;  %v820_v49 = vld [vmem:[%s5125_s1] sm:$0x1] }
 0x167   : > { %3368 = vrsqrt.f32 %v667_v50  ;;  %v4219_v50 = vsub.s32 0, %v4213_v47 }
 0x168   : > { %1097 = vmatpush1.bf16.msra.mxu0 %v3336_v2 }
 0x169   : > { %1098 = vmatprep.subr.bf16.mxu0 %v3342_v4 }
 0x16c   : > { %1099 = vmatpush1.bf16.msra.mxu0 %v3340_v11 }
 0x16d   : > { %1100 = vmatprep.subr.bf16.mxu0 %v3346_v15 }
 0x170   : > { %1101 = vmatpush1.bf16.msra.mxu0 %v3344_v18 }
 0x171   : > { %1102 = vmatprep.subr.bf16.mxu0 %v3350_v22 }
 0x174   : > { %v3369_v0 = vpop.eup %3368  ;;  %1103 = vmatpush1.bf16.msra.mxu0 %v3348_v24 }
 0x175   : > { %3164 = vmatmul.mubr.msk.f32.vlgmr.msra.gmra.mxu1 %vm673_vm1, %v3369_v0  ;;  %1104 = vmatprep.subr.bf16.mxu0 %v3354_v30 }
 0x176   : > { %3167 = vmatpush3.bf16.msra.mxu1 %v3331_v55 }
 0x177   : > { %3168 = vmatprep.subr.bf16.mxu1 %v3335_v59 }
 0x178   : > { %1105 = vmatpush1.bf16.msra.mxu0 %v3352_v32 }
 0x179   : > { %1106 = vmatprep.subr.bf16.mxu0 %v3358_v37 }
 0x17a   : > { %3169 = vmatpush3.bf16.msra.mxu1 %v3335_v59 }
 0x17b   : > { %3170 = vmatprep.subr.bf16.mxu1 %v3339_v63 }
 0x17c   : > { %1107 = vmatpush1.bf16.msra.mxu0 %v3356_v35 }
 0x17e   : > { %3171 = vmatpush3.bf16.msra.mxu1 %v3339_v63 }
 0x17f   : > { %3172 = vmatprep.subr.bf16.mxu1 %v3343_v9 }
 0x182   : > { %3173 = vmatpush3.bf16.msra.mxu1 %v3343_v9 }
 0x183   : > { %3174 = vmatprep.subr.bf16.mxu1 %v3347_v17 }
 0x186   : > { %3175 = vmatpush3.bf16.msra.mxu1 %v3347_v17 }
 0x187   : > { %3176 = vmatprep.subr.bf16.mxu1 %v3351_v26 }
 0x18a   : > { %3177 = vmatpush3.bf16.msra.mxu1 %v3351_v26 }
 0x18b   : > { %3178 = vmatprep.subr.bf16.mxu1 %v3355_v34 }
 0x18e   : > { %3179 = vmatpush3.bf16.msra.mxu1 %v3355_v34 }
 0x18f   : > { %3180 = vmatprep.subr.bf16.mxu1 %v3359_v39 }
 0x192   : > { %3181 = vmatpush3.bf16.msra.mxu1 %v3359_v39 }
 0x21f   : > { %v743_v42 = vpop.f32.mrf.mxu0 }
 0x221   : > { %v3154_v44 = vpop.f32.mrf.mxu0 }
 0x235   : > { %v816_v0 = vpop.f32.mrf.mxu1 }
 0x236   : > { %v821_v52 = vmul.f32 %v820_v49, %v816_v0 }
 0x237   : > { %v3165_v55 = vpop.f32.mrf.mxu1 }
 0x238   : > { %v823_v58 = vmul.f32 %v821_v52, %v743_v42  ;;  %v4225_v59 = vrot.slane %v821_v52, %v4219_v50 }
 0x23a   : > { %v824_v60 = vsub.f32 %v822_v54, %v823_v58  ;;  %v829_v62 = vmul.f32 %v4225_v59, %v3935_v5  ;;  %v830_v2 = vmul.f32 %v4225_v59, %v3938_v6  ;;  %v831_v4 = vmul.f32 %v4225_v59, %v3946_v8 }
 0x23b   : > { %v832_v9 = vmul.f32 %v4225_v59, %v3951_v10  ;;  %v833_v11 = vmul.f32 %v4225_v59, %v3960_v13  ;;  %v834_v15 = vmul.f32 %v4225_v59, %v3969_v16  ;;  %v835_v16 = vmul.f32 %v4225_v59, %v3978_v19 }
 0x23c   : > { %v4230_v63 = vrot.slane %v824_v60, %v4219_v50  ;;  %v836_v26 = vmul.f32 %v4225_v59, %v3990_v23  ;;  %v837_v30 = vmul.f32 %v4225_v59, %v4002_v27  ;;  %v838_v32 = vmul.f32 %v4225_v59, %v4006_v29 }
 0x23d   : > { %v839_v23 = vmul.f32 %v4225_v59, %v4017_v33  ;;  %v840_v27 = vmul.f32 %v4225_v59, %v4028_v38  ;;  %v841_v29 = vmul.f32 %v4225_v59, %v4039_v43  ;;  %v842_v44 = vmul.f32 %v4225_v59, %v4050_v48 }
 0x23e   : > { %v867_v5 = vadd.f32 %v4230_v63, %v829_v62  ;;  %v868_v17 = vadd.f32 %v4230_v63, %v830_v2  ;;  %v869_v18 = vadd.f32 %v4230_v63, %v831_v4  ;;  %v870_v6 = vadd.f32 %v4230_v63, %v832_v9 }
 0x23f   : > { %v871_v22 = vadd.f32 %v4230_v63, %v833_v11  ;;  %v872_v8 = vadd.f32 %v4230_v63, %v834_v15  ;;  %v873_v34 = vadd.f32 %v4230_v63, %v835_v16  ;;  %v874_v35 = vadd.f32 %v4230_v63, %v836_v26 }
 0x240   : > { %v899_v24 = vpack.c.bf16 %v868_v17, %v867_v5  ;;  %v900_v10 = vpack.c.bf16 %v870_v6, %v869_v18  ;;  %v875_v37 = vadd.f32 %v4230_v63, %v837_v30  ;;  %v876_v39 = vadd.f32 %v4230_v63, %v838_v32 }
 0x241   : > { %v901_v13 = vpack.c.bf16 %v872_v8, %v871_v22  ;;  %v902_v42 = vpack.c.bf16 %v874_v35, %v873_v34  ;;  %v877_v45 = vadd.f32 %v4230_v63, %v839_v23  ;;  %v878_v49 = vadd.f32 %v4230_v63, %v840_v27 }
 0x242   : > { %1125 = vmatmul.mubr.bf16.vlgmr.msra.gmra.mxu0 %v899_v24  ;;  %3182 = vmatprep.mubr.bf16.mxu1 %v899_v24  ;;  %v903_v19 = vpack.c.bf16 %v876_v39, %v875_v37  ;;  %v879_v0 = vadd.f32 %v4230_v63, %v841_v29  ;;  %v880_v52 = vadd.f32 %v4230_v63, %v842_v44 }
 0x243   : > { %3183 = vmatmul.mubr.bf16.vlgmr.msra.gmra.mxu1 %v900_v10  ;;  %1134 = vmatprep.mubr.bf16.mxu0 %v3726_v40  ;;  %v904_v54 = vpack.c.bf16 %v878_v49, %v877_v45  ;;  %v843_v38 = vmul.f32 %v4225_v59, %v4061_v53  ;;  %v844_v43 = vmul.f32 %v4225_v59, %v4069_v57 }
 0x244   : > { %3186 = vmatprep.mubr.bf16.mxu1 %v901_v13  ;;  %v905_v33 = vpack.c.bf16 %v880_v52, %v879_v0  ;;  %v845_v48 = vmul.f32 %v4225_v59, %v4082_v1  ;;  %v846_v55 = vmul.f32 %v4225_v59, %v4088_v7  ;;  %v847_v57 = vmul.f32 %v4225_v59, %v4094_v14 }
 0x245   : > { %v881_v58 = vadd.f32 %v4230_v63, %v843_v38  ;;  %v882_v60 = vadd.f32 %v4230_v63, %v844_v43  ;;  %v848_v1 = vmul.f32 %v4225_v59, %v4100_v20  ;;  %v849_v7 = vmul.f32 %v4225_v59, %v4106_v25 }
 0x246   : > { %v883_v62 = vadd.f32 %v4230_v63, %v845_v48  ;;  %v884_v2 = vadd.f32 %v4230_v63, %v846_v55  ;;  %v850_v9 = vmul.f32 %v4225_v59, %v4112_v31  ;;  %v885_v11 = vadd.f32 %v4230_v63, %v847_v57 }
 0x247   : > { %v906_v4 = vpack.c.bf16 %v882_v60, %v881_v58  ;;  %v886_v15 = vadd.f32 %v4230_v63, %v848_v1  ;;  %v887_v5 = vadd.f32 %v4230_v63, %v849_v7  ;;  %v851_v20 = vmul.f32 %v4225_v59, %v4118_v36 }
 0x248   : > { %v907_v53 = vpack.c.bf16 %v884_v2, %v883_v62  ;;  %v888_v17 = vadd.f32 %v4230_v63, %v850_v9  ;;  %v852_v25 = vmul.f32 %v4225_v59, %v4124_v41  ;;  %v853_v31 = vmul.f32 %v4225_v59, %v4130_v46 }
 0x249   : > { %v908_v18 = vpack.c.bf16 %v886_v15, %v885_v11  ;;  %v854_v6 = vmul.f32 %v4225_v59, %v4136_v51  ;;  %v889_v22 = vadd.f32 %v4230_v63, %v851_v20  ;;  %v855_v41 = vmul.f32 %v4225_v59, %v4142_v56 }
 0x24a   : > { %1135 = vmatmul.mubr.bf16.gmra.mxu0 %v900_v10  ;;  %v909_v14 = vpack.c.bf16 %v888_v17, %v887_v5  ;;  %v890_v8 = vadd.f32 %v4230_v63, %v852_v25  ;;  %v891_v24 = vadd.f32 %v4230_v63, %v853_v31  ;;  %v856_v46 = vmul.f32 %v4225_v59, %v4148_v61 }
 0x24b   : > { %3187 = vmatmul.mubr.bf16.gmra.mxu1 %v902_v42  ;;  %1144 = vmatprep.mubr.bf16.mxu0 %v3726_v40  ;;  %v892_v10 = vadd.f32 %v4230_v63, %v854_v6  ;;  %v857_v51 = vmul.f32 %v4225_v59, %v4154_v3  ;;  %v858_v16 = vmul.f32 %v4225_v59, %v4160_v12 }
 0x24c   : > { %3190 = vmatprep.mubr.bf16.mxu1 %v903_v19  ;;  %v893_v26 = vadd.f32 %v4230_v63, %v855_v41  ;;  %v894_v30 = vadd.f32 %v4230_v63, %v856_v46  ;;  %v859_v61 = vmul.f32 %v4225_v59, %v4166_v21  ;;  %v860_v3 = vmul.f32 %v4225_v59, %v4172_v28  ;;  %v947_v28 = vld [vmem:[%s5130_s6] sm:$0x7] }
 0x24d   : > { %v911_v36 = vpack.c.bf16 %v892_v10, %v891_v24  ;;  %v895_v32 = vadd.f32 %v4230_v63, %v857_v51  ;;  %v896_v34 = vadd.f32 %v4230_v63, %v858_v16  ;;  %v955_v21 = vsub.s32 1, %v4213_v47 }
 0x24e   : > { %v912_v35 = vpack.c.bf16 %v894_v30, %v893_v26  ;;  %v897_v12 = vadd.f32 %v4230_v63, %v859_v61  ;;  %v898_v37 = vadd.f32 %v4230_v63, %v860_v3  ;;  %v959_v59 = vsub.s32 2, %v4213_v47 }
 0x24f   : > { %v913_v56 = vpack.c.bf16 %v896_v34, %v895_v32  ;;  %v4347_v63 = vrot.slane %v947_v28, %v4219_v50 }
 0x250   : > { %v914_v39 = vpack.c.bf16 %v898_v37, %v897_v12  ;;  %v4351_v27 = vrot.slane %v947_v28, %v959_v59 }
 0x252   : > { %1145 = vmatmul.mubr.bf16.gmra.mxu0 %v901_v13  ;;  %v910_v13 = vpack.c.bf16 %v890_v8, %v889_v22 }
 0x253   : > { %3191 = vmatmul.mubr.bf16.gmra.mxu1 %v904_v54  ;;  %1154 = vmatprep.mubr.bf16.mxu0 %v3726_v40 }
 0x254   : > { %3194 = vmatprep.mubr.bf16.mxu1 %v905_v33 }
 0x25a   : > { %1155 = vmatmul.mubr.bf16.gmra.mxu0 %v902_v42  ;;  %v4349_v42 = vrot.slane %v947_v28, %v955_v21 }
 0x25b   : > { %3195 = vmatmul.mubr.bf16.gmra.mxu1 %v906_v4  ;;  %1164 = vmatprep.mubr.bf16.mxu0 %v3726_v40 }
 0x25c   : > { %3198 = vmatprep.mubr.bf16.mxu1 %v907_v53 }
 0x262   : > { %1165 = vmatmul.mubr.bf16.gmra.mxu0 %v903_v19 }
 0x263   : > { %3199 = vmatmul.mubr.bf16.gmra.mxu1 %v908_v18  ;;  %1174 = vmatprep.mubr.bf16.mxu0 %v3726_v40 }
 0x264   : > { %3202 = vmatprep.mubr.bf16.mxu1 %v909_v14 }
 0x26a   : > { %1175 = vmatmul.mubr.bf16.gmra.mxu0 %v904_v54 }
 0x26b   : > { %3203 = vmatmul.mubr.bf16.gmra.mxu1 %v910_v13  ;;  %1184 = vmatprep.mubr.bf16.mxu0 %v3726_v40 }
 0x26c   : > { %3206 = vmatprep.mubr.bf16.mxu1 %v911_v36 }
 0x272   : > { %1185 = vmatmul.mubr.bf16.gmra.mxu0 %v905_v33 }
 0x273   : > { %3207 = vmatmul.mubr.bf16.gmra.mxu1 %v912_v35  ;;  %1194 = vmatprep.mubr.bf16.mxu0 %v3726_v40 }
 0x274   : > { %3210 = vmatprep.mubr.bf16.mxu1 %v913_v56 }
 0x27a   : > { %1195 = vmatmul.mubr.bf16.gmra.mxu0 %v906_v4 }
 0x27b   : > { %3211 = vmatmul.mubr.bf16.gmra.mxu1 %v914_v39  ;;  %1204 = vmatprep.mubr.bf16.mxu0 %v3726_v40 }
 0x282   : > { %1205 = vmatmul.mubr.bf16.gmra.mxu0 %v907_v53 }
 0x283   : > { %1214 = vmatprep.mubr.bf16.mxu0 %v3726_v40 }
 0x28a   : > { %1215 = vmatmul.mubr.bf16.gmra.mxu0 %v908_v18 }
 0x28b   : > { %1224 = vmatprep.mubr.bf16.mxu0 %v3726_v40 }
 0x292   : > { %1225 = vmatmul.mubr.bf16.gmra.mxu0 %v909_v14 }
 0x293   : > { %1234 = vmatprep.mubr.bf16.mxu0 %v3726_v40 }
 0x29a   : > { %1235 = vmatmul.mubr.bf16.gmra.mxu0 %v910_v13 }
 0x29b   : > { %1244 = vmatprep.mubr.bf16.mxu0 %v3726_v40 }
 0x2a2   : > { %1245 = vmatmul.mubr.bf16.gmra.mxu0 %v911_v36 }
 0x2a3   : > { %1254 = vmatprep.mubr.bf16.mxu0 %v3726_v40 }
 0x2aa   : > { %1255 = vmatmul.mubr.bf16.gmra.mxu0 %v912_v35 }
 0x2ab   : > { %1264 = vmatprep.mubr.bf16.mxu0 %v3726_v40 }
 0x2b2   : > { %1265 = vmatmul.mubr.bf16.gmra.mxu0 %v913_v56 }
 0x2b3   : > { %1274 = vmatprep.mubr.bf16.mxu0 %v3726_v40 }
 0x2ba   : > { %1275 = vmatmul.mubr.bf16.gmra.mxu0 %v914_v39 }
 0x302   : > { %v1126_v19 = vpop.f32.mrf.mxu0 }
 0x303   : > { %v3184_v23 = vpop.f32.mrf.mxu1  ;;  %v1127_v40 = vadd.f32 %v1126_v19, %v4347_v63 }
 0x304   : > { %v1128_v29 = vpop.f32.mrf.mxu0  ;;  %v4361_v50 = vadd.f32 %v3184_v23, %v4351_v27 }
 0x305   : > { %v4355_v44 = vadd.f32 %v1128_v29, %v4349_v42  ;;  %v4357_v45 = vpop.f32.mrf.mxu1  ;;  %v1446_v33 = vmul.f32 0.088388346, %v1127_v40 }
 0x306   : > { %v1130_v49 = vpop.f32.mrf.mxu0 }
 0x307   : > { %v1131_v47 = vadd.f32 %v1130_v49, %v4347_v63  ;;  %v3185_v0 = vpop.f32.mrf.mxu1 }
 0x308   : > { %v4364_v52 = vadd.f32 %v3185_v0, %v4351_v27  ;;  %v1132_v54 = vpop.f32.mrf.mxu0 }
 0x309   : > { %v1447_v38 = vmul.f32 0.088388346, %v1131_v47  ;;  %v4367_v43 = vadd.f32 %v1132_v54, %v4349_v42  ;;  %v4369_v48 = vpop.f32.mrf.mxu1 }
 0x30a   : > { %v1136_v58 = vpop.f32.mrf.mxu0 }
 0x30b   : > { %v4373_v60 = vpack.c.bf16 %v1447_v38, %v1446_v33  ;;  %v3188_v2 = vpop.f32.mrf.mxu1  ;;  %v1137_v53 = vadd.f32 %v1136_v58, %v4347_v63 }
 0x30c   : > { %v1138_v4 = vpop.f32.mrf.mxu0  ;;  %v4386_v15 = vadd.f32 %v3188_v2, %v4351_v27 }
 0x30d   : > { %5176 = vst [vmem:[#allocation13_spill] sm:$0xff] %v4373_v60  ;;  %v4379_v57 = vadd.f32 %v1138_v4, %v4349_v42  ;;  %v4381_v1 = vpop.f32.mrf.mxu1  ;;  %2906 = vmatprep.mubr.bf16.mxu1 %v4373_v60  ;;  %v1448_v18 = vmul.f32 0.088388346, %v1137_v53 }
 0x30e   : > { %v1140_v7 = vpop.f32.mrf.mxu0 }
 0x30f   : > { %v1141_v9 = vadd.f32 %v1140_v7, %v4347_v63  ;;  %v3189_v11 = vpop.f32.mrf.mxu1 }
 0x310   : > { %v4389_v5 = vadd.f32 %v3189_v11, %v4351_v27  ;;  %v1142_v17 = vpop.f32.mrf.mxu0 }
 0x311   : > { %v1449_v14 = vmul.f32 0.088388346, %v1141_v9  ;;  %v4392_v20 = vadd.f32 %v1142_v17, %v4349_v42  ;;  %v4394_v25 = vpop.f32.mrf.mxu1 }
 0x312   : > { %v1146_v6 = vpop.f32.mrf.mxu0 }
 0x313   : > { %v4398_v22 = vpack.c.bf16 %v1449_v14, %v1448_v18  ;;  %v4402_v24 = vpop.f32.mrf.mxu1  ;;  %v1147_v13 = vadd.f32 %v1146_v6, %v4347_v63 }
 0x314   : > { %v1148_v10 = vpop.f32.mrf.mxu0 }
 0x315   : > { %5177 = vst [vmem:[#allocation14_spill] sm:$0xff] %v4398_v22  ;;  %v4406_v36 = vadd.f32 %v1148_v10, %v4349_v42  ;;  %v4408_v41 = vpop.f32.mrf.mxu1  ;;  %v1450_v30 = vmul.f32 0.088388346, %v1147_v13 }
 0x316   : > { %v1150_v46 = vpop.f32.mrf.mxu0 }
 0x317   : > { %v1151_v51 = vadd.f32 %v1150_v46, %v4347_v63  ;;  %v4411_v16 = vpop.f32.mrf.mxu1 }
 0x318   : > { %v1152_v26 = vpop.f32.mrf.mxu0 }
 0x319   : > { %v1451_v32 = vmul.f32 0.088388346, %v1151_v51  ;;  %v4414_v34 = vadd.f32 %v1152_v26, %v4349_v42  ;;  %v4416_v35 = vpop.f32.mrf.mxu1 }
 0x31a   : > { %v1156_v56 = vpop.f32.mrf.mxu0 }
 0x31b   : > { %v4418_v61 = vpack.c.bf16 %v1451_v32, %v1450_v30  ;;  %v4422_v12 = vpop.f32.mrf.mxu1  ;;  %v1157_v39 = vadd.f32 %v1156_v56, %v4347_v63 }
 0x31c   : > { %v1158_v37 = vpop.f32.mrf.mxu0 }
 0x31d   : > { %5178 = vst [vmem:[#allocation15_spill] sm:$0xff] %v4418_v61  ;;  %v4426_v21 = vadd.f32 %v1158_v37, %v4349_v42  ;;  %v4428_v28 = vpop.f32.mrf.mxu1  ;;  %v1452_v40 = vmul.f32 0.088388346, %v1157_v39 }
 0x31e   : > { %v1160_v59 = vpop.f32.mrf.mxu0 }
 0x31f   : > { %v1161_v19 = vadd.f32 %v1160_v59, %v4347_v63  ;;  %v4431_v23 = vpop.f32.mrf.mxu1 }
 0x320   : > { %v1162_v29 = vpop.f32.mrf.mxu0 }
 0x321   : > { %v1453_v49 = vmul.f32 0.088388346, %v1161_v19  ;;  %v4434_v47 = vadd.f32 %v1162_v29, %v4349_v42  ;;  %v4436_v0 = vpop.f32.mrf.mxu1 }
 0x322   : > { %v1166_v54 = vpop.f32.mrf.mxu0 }
 0x323   : > { %v4438_v33 = vpack.c.bf16 %v1453_v49, %v1452_v40  ;;  %v4442_v58 = vpop.f32.mrf.mxu1  ;;  %v1167_v4 = vadd.f32 %v1166_v54, %v4347_v63 }
 0x324   : > { %v1168_v2 = vpop.f32.mrf.mxu0 }
 0x325   : > { %5179 = vst [vmem:[#allocation16_spill] sm:$0xff] %v4438_v33  ;;  %v4446_v53 = vadd.f32 %v1168_v2, %v4349_v42  ;;  %v4448_v7 = vpop.f32.mrf.mxu1  ;;  %v1454_v14 = vmul.f32 0.088388346, %v1167_v4 }
 0x326   : > { %v1170_v9 = vpop.f32.mrf.mxu0 }
 0x327   : > { %v1171_v11 = vadd.f32 %v1170_v9, %v4347_v63  ;;  %v4451_v17 = vpop.f32.mrf.mxu1 }
 0x328   : > { %v1172_v18 = vpop.f32.mrf.mxu0 }
 0x329   : > { %v1455_v6 = vmul.f32 0.088388346, %v1171_v11  ;;  %v4454_v10 = vadd.f32 %v1172_v18, %v4349_v42  ;;  %v4456_v13 = vpop.f32.mrf.mxu1 }
 0x32a   : > { %v1176_v46 = vpop.f32.mrf.mxu0 }
 0x32b   : > { %v4458_v51 = vpack.c.bf16 %v1455_v6, %v1454_v14  ;;  %v4462_v30 = vpop.f32.mrf.mxu1  ;;  %v1177_v56 = vadd.f32 %v1176_v46, %v4347_v63 }
 0x32c   : > { %v1178_v32 = vpop.f32.mrf.mxu0 }
 0x32d   : > { %5180 = vst [vmem:[#allocation17_spill] sm:$0xff] %v4458_v51  ;;  %v4466_v37 = vadd.f32 %v1178_v32, %v4349_v42  ;;  %v4468_v39 = vpop.f32.mrf.mxu1  ;;  %v1456_v49 = vmul.f32 0.088388346, %v1177_v56 }
 0x32e   : > { %v1180_v59 = vpop.f32.mrf.mxu0 }
 0x32f   : > { %v1181_v19 = vadd.f32 %v1180_v59, %v4347_v63  ;;  %v4471_v29 = vpop.f32.mrf.mxu1 }
 0x330   : > { %v1182_v40 = vpop.f32.mrf.mxu0 }
 0x331   : > { %v1457_v54 = vmul.f32 0.088388346, %v1181_v19  ;;  %v4474_v2 = vadd.f32 %v1182_v40, %v4349_v42  ;;  %v4476_v4 = vpop.f32.mrf.mxu1 }
 0x332   : > { %v1186_v9 = vpop.f32.mrf.mxu0 }
 0x333   : > { %v4478_v11 = vpack.c.bf16 %v1457_v54, %v1456_v49  ;;  %v3208_v14 = vpop.f32.mrf.mxu1  ;;  %v1187_v46 = vadd.f32 %v1186_v9, %v4347_v63 }
 0x334   : > { %v1188_v6 = vpop.f32.mrf.mxu0 }
 0x335   : > { %5181 = vst [vmem:[#allocation18_spill] sm:$0xff] %v4478_v11  ;;  %v4484_v32 = vadd.f32 %v1188_v6, %v4349_v42  ;;  %v1415_v56 = vpop.f32.mrf.mxu1  ;;  %v1458_v8 = vmul.f32 0.088388346, %v1187_v46 }
 0x336   : > { %v1190_v59 = vpop.f32.mrf.mxu0 }
 0x337   : > { %v1191_v19 = vadd.f32 %v1190_v59, %v4347_v63  ;;  %v3209_v40 = vpop.f32.mrf.mxu1 }
 0x338   : > { %v1192_v62 = vpop.f32.mrf.mxu0 }
 0x339   : > { %v1459_v3 = vmul.f32 0.088388346, %v1191_v19  ;;  %v4488_v49 = vadd.f32 %v1192_v62, %v4349_v42  ;;  %v1418_v54 = vpop.f32.mrf.mxu1  ;;  %v1379_v62 = vadd.f32 %v4431_v23, %v4351_v27 }
 0x33a   : > { %v1196_v38 = vpop.f32.mrf.mxu0 }
 0x33b   : > { %v4490_v26 = vpack.c.bf16 %v1459_v3, %v1458_v8  ;;  %v3212_v6 = vpop.f32.mrf.mxu1  ;;  %v1197_v55 = vadd.f32 %v1196_v38, %v4347_v63 }
 0x33c   : > { %v1198_v18 = vpop.f32.mrf.mxu0  ;;  %v1440_v8 = vadd.f32 %v3212_v6, %v4351_v27 }
 0x33d   : > { %5182 = vst [vmem:[#allocation19_spill] sm:$0xff] %v4490_v26  ;;  %v4496_v59 = vadd.f32 %v1198_v18, %v4349_v42  ;;  %v1431_v31 = vpop.f32.mrf.mxu1  ;;  %v1376_v26 = vadd.f32 %v4422_v12, %v4351_v27  ;;  %v1460_v38 = vmul.f32 0.088388346, %v1197_v55  ;;  %v1427_v12 = vadd.f32 %v3209_v40, %v4351_v27 }
 0x33e   : > { %v1200_v46 = vpop.f32.mrf.mxu0  ;;  %v1432_v61 = vadd.f32 %v1431_v31, %v4351_v27  ;;  %v1368_v31 = vadd.f32 %v4428_v28, %v4351_v27 }
 0x33f   : > { %v1201_v19 = vadd.f32 %v1200_v46, %v4347_v63  ;;  %v3213_v11 = vpop.f32.mrf.mxu1  ;;  %v1517_v60 = vpack.c.bf16 %v1379_v62, %v1376_v26  ;;  %v1363_v62 = vadd.f32 %v4411_v16, %v4351_v27 }
 0x340   : > { %v1443_v3 = vadd.f32 %v3213_v11, %v4351_v27  ;;  %v1202_v9 = vpop.f32.mrf.mxu0  ;;  %v1371_v11 = vadd.f32 %v4436_v0, %v4351_v27  ;;  %v1424_v0 = vadd.f32 %v3208_v14, %v4351_v27  ;;  %v1416_v14 = vadd.f32 %v1415_v56, %v4351_v27 }
 0x341   : > { %v1461_v51 = vmul.f32 0.088388346, %v1201_v19  ;;  %v4506_v18 = vadd.f32 %v1202_v9, %v4349_v42  ;;  %v1434_v33 = vpop.f32.mrf.mxu1 }
 0x342   : > { %v1525_v23 = vpack.c.bf16 %v1443_v3, %v1440_v8  ;;  %v1435_v46 = vadd.f32 %v1434_v33, %v4351_v27  ;;  %v1206_v22 = vpop.f32.mrf.mxu0  ;;  %v1516_v40 = vpack.c.bf16 %v1371_v11, %v1368_v31  ;;  %v1523_v8 = vpack.c.bf16 %v1427_v12, %v1424_v0 }
 0x343   : > { %v4512_v6 = vpack.c.bf16 %v1461_v51, %v1460_v38  ;;  %v1501_v55 = vpack.c.bf16 %v4506_v18, %v4496_v59  ;;  %v1207_v33 = vadd.f32 %v1206_v22, %v4347_v63  ;;  %v1419_v3 = vadd.f32 %v1418_v54, %v4351_v27 }
 0x344   : > { %v1524_v9 = vpack.c.bf16 %v1435_v46, %v1432_v61  ;;  %v1208_v19 = vpop.f32.mrf.mxu0  ;;  %2938 = vmatprep.subr.bf16.mxu0 %v1525_v23  ;;  %v1360_v22 = vadd.f32 %v4402_v24, %v4351_v27  ;;  %v1355_v11 = vadd.f32 %v4416_v35, %v4351_v27  ;;  %v1411_v24 = vadd.f32 %v4471_v29, %v4351_v27 }
 0x345   : > { %v4521_v26 = vadd.f32 %v1208_v19, %v4349_v42  ;;  %2939 = vmatpush3.bf16.msra.mxu0 %v1517_v60  ;;  %v1462_v38 = vmul.f32 0.088388346, %v1207_v33  ;;  %v1352_v31 = vadd.f32 %v4408_v41, %v4351_v27  ;;  %v1408_v35 = vadd.f32 %v4462_v30, %v4351_v27 }
 0x346   : > { %v1210_v51 = vpop.f32.mrf.mxu0  ;;  %2940 = vmatprep.subr.bf16.mxu0 %v1524_v9  ;;  %v1515_v16 = vpack.c.bf16 %v1363_v62, %v1360_v22  ;;  %v1522_v9 = vpack.c.bf16 %v1419_v3, %v1416_v14  ;;  %v1339_v22 = vadd.f32 %v4394_v25, %v4351_v27  ;;  %v5183_v25 = vpack.c.bf16 %v4389_v5, %v4386_v15 }
 0x347   : > { %v1211_v61 = vadd.f32 %v1210_v51, %v4347_v63  ;;  %v1514_v51 = vpack.c.bf16 %v1355_v11, %v1352_v31  ;;  %v1521_v29 = vpack.c.bf16 %v1411_v24, %v1408_v35  ;;  %v1392_v24 = vadd.f32 %v4442_v58, %v4351_v27 }
 0x348   : > { %v1212_v28 = vpop.f32.mrf.mxu0  ;;  %v1384_v15 = vadd.f32 %v4448_v7, %v4351_v27  ;;  %v1323_v58 = vadd.f32 %v4369_v48, %v4351_v27  ;;  %v5184_v7 = vpack.c.bf16 %v4364_v52, %v4361_v50  ;;  %v5186_v59 = vpack.c.bf16 %v4474_v2, %v4466_v37 }
 0x349   : > { %v1463_v23 = vmul.f32 0.088388346, %v1211_v61  ;;  %v4531_v60 = vadd.f32 %v1212_v28, %v4349_v42  ;;  %2941 = vmatpush3.bf16.msra.mxu0 %v1516_v40  ;;  %v1403_v40 = vadd.f32 %v4476_v4, %v4351_v27  ;;  %v1400_v28 = vadd.f32 %v4468_v39, %v4351_v27 }
 0x34a   : > { %v1216_v46 = vpop.f32.mrf.mxu0  ;;  %2942 = vmatprep.subr.bf16.mxu0 %v1523_v8  ;;  %v5189_v37 = vpack.c.bf16 %v4414_v34, %v4406_v36  ;;  %v5193_v36 = vld [vmem:[#allocation14_spill] sm:$0xff]  ;;  %v5194_v34 = vld [vmem:[#allocation15_spill] sm:$0xff] }
 0x34b   : > { %v4536_v12 = vpack.c.bf16 %v1463_v23, %v1462_v38  ;;  %v1502_v54 = vpack.c.bf16 %v4531_v60, %v4521_v26  ;;  %v1217_v56 = vadd.f32 %v1216_v46, %v4347_v63  ;;  %v1395_v23 = vadd.f32 %v4451_v17, %v4351_v27 }
 0x34c   : > { %v1218_v19 = vpop.f32.mrf.mxu0  ;;  %v1520_v14 = vpack.c.bf16 %v1403_v40, %v1400_v28 }
 0x34d   : > { %v4546_v33 = vadd.f32 %v1218_v19, %v4349_v42  ;;  %2943 = vmatpush3.bf16.msra.mxu0 %v1515_v16  ;;  %v1464_v41 = vmul.f32 0.088388346, %v1217_v56  ;;  %v1336_v16 = vadd.f32 %v4381_v1, %v4351_v27  ;;  %v1519_v31 = vpack.c.bf16 %v1395_v23, %v1392_v24 }
 0x34e   : > { %v1220_v0 = vpop.f32.mrf.mxu0  ;;  %2944 = vmatprep.subr.bf16.mxu0 %v1522_v9  ;;  %v1387_v1 = vadd.f32 %v4456_v13, %v4351_v27 }
 0x34f   : > { %v1221_v62 = vadd.f32 %v1220_v0, %v4347_v63  ;;  %v1512_v17 = vpack.c.bf16 %v1339_v22, %v1336_v16 }
 0x350   : > { %v1222_v61 = vpop.f32.mrf.mxu0 }
 0x351   : > { %v1465_v8 = vmul.f32 0.088388346, %v1221_v62  ;;  %v4554_v3 = vadd.f32 %v1222_v61, %v4349_v42  ;;  %2945 = vmatpush3.bf16.msra.mxu0 %v1514_v51  ;;  %v1320_v61 = vadd.f32 %v4357_v45, %v4351_v27 }
 0x352   : > { %v1226_v30 = vpop.f32.mrf.mxu0  ;;  %2946 = vmatprep.subr.bf16.mxu0 %v1521_v29  ;;  %v1518_v29 = vpack.c.bf16 %v1387_v1, %v1384_v15 }
 0x353   : > { %v4560_v38 = vpack.c.bf16 %v1465_v8, %v1464_v41  ;;  %v1503_v4 = vpack.c.bf16 %v4554_v3, %v4546_v33  ;;  %v1227_v39 = vadd.f32 %v1226_v30, %v4347_v63  ;;  %v1510_v48 = vpack.c.bf16 %v1323_v58, %v1320_v61 }
 0x354   : > { %v1228_v46 = vpop.f32.mrf.mxu0 }
 0x355   : > { %v4570_v11 = vadd.f32 %v1228_v46, %v4349_v42  ;;  %2947 = vmatpush3.bf16.msra.mxu0 %v5183_v25  ;;  %v1466_v35 = vmul.f32 0.088388346, %v1227_v39 }
 0x356   : > { %v1230_v9 = vpop.f32.mrf.mxu0  ;;  %2948 = vmatprep.subr.bf16.mxu0 %v1520_v14 }
 0x357   : > { %v1231_v19 = vadd.f32 %v1230_v9, %v4347_v63 }
 0x358   : > { %v1232_v56 = vpop.f32.mrf.mxu0 }
 0x359   : > { %v1467_v0 = vmul.f32 0.088388346, %v1231_v19  ;;  %v4581_v51 = vadd.f32 %v1232_v56, %v4349_v42  ;;  %2949 = vmatpush3.bf16.msra.mxu0 %v1512_v17 }
 0x35a   : > { %v1236_v5 = vpop.f32.mrf.mxu0  ;;  %2950 = vmatprep.subr.bf16.mxu0 %v1519_v31 }
 0x35b   : > { %v4587_v62 = vpack.c.bf16 %v1467_v0, %v1466_v35  ;;  %v1504_v13 = vpack.c.bf16 %v4581_v51, %v4570_v11  ;;  %v1237_v41 = vadd.f32 %v1236_v5, %v4347_v63 }
 0x35c   : > { %v4591_v40 = vpop.f32.mrf.mxu0 }
 0x35d   : > { %2951 = vmatpush3.bf16.msra.mxu0 %v5184_v7  ;;  %v1468_v22 = vmul.f32 0.088388346, %v1237_v41 }
 0x35e   : > { %v1240_v8 = vpop.f32.mrf.mxu0  ;;  %2952 = vmatprep.subr.bf16.mxu0 %v1518_v29 }
 0x35f   : > { %v1241_v28 = vadd.f32 %v1240_v8, %v4347_v63 }
 0x360   : > { %v1242_v30 = vpop.f32.mrf.mxu0 }
 0x361   : > { %v1469_v23 = vmul.f32 0.088388346, %v1241_v28  ;;  %2953 = vmatpush3.bf16.msra.mxu0 %v1510_v48  ;;  %v1243_v18 = vadd.f32 %v1242_v30, %v4349_v42 }
 0x362   : > { %v1246_v14 = vpop.f32.mrf.mxu0 }
 0x363   : > { %v4600_v46 = vpack.c.bf16 %v1469_v23, %v1468_v22  ;;  %v1247_v27 = vadd.f32 %v1246_v14, %v4347_v63 }
 0x364   : > { %v1248_v16 = vpop.f32.mrf.mxu0 }
 0x365   : > { %v1470_v52 = vmul.f32 0.088388346, %v1247_v27 }
 0x366   : > { %v1250_v45 = vpop.f32.mrf.mxu0 }
 0x367   : > { %v1251_v39 = vadd.f32 %v1250_v45, %v4347_v63 }
 0x368   : > { %v1252_v50 = vpop.f32.mrf.mxu0 }
 0x369   : > { %v1471_v25 = vmul.f32 0.088388346, %v1251_v39 }
 0x36a   : > { %v1256_v24 = vpop.f32.mrf.mxu0 }
 0x36b   : > { %v4604_v9 = vpack.c.bf16 %v1471_v25, %v1470_v52  ;;  %v1257_v19 = vadd.f32 %v1256_v24, %v4347_v63 }
 0x36c   : > { %v1258_v17 = vpop.f32.mrf.mxu0 }
 0x36d   : > { %v1472_v35 = vmul.f32 0.088388346, %v1257_v19 }
 0x36e   : > { %v1260_v31 = vpop.f32.mrf.mxu0 }
 0x36f   : > { %v1261_v1 = vadd.f32 %v1260_v31, %v4347_v63 }
 0x370   : > { %v1262_v56 = vpop.f32.mrf.mxu0 }
 0x371   : > { %v1473_v0 = vmul.f32 0.088388346, %v1261_v1 }
 0x372   : > { %v1266_v15 = vpop.f32.mrf.mxu0 }
 0x373   : > { %v4608_v5 = vpack.c.bf16 %v1473_v0, %v1472_v35  ;;  %v1267_v29 = vadd.f32 %v1266_v15, %v4347_v63 }
 0x374   : > { %v1268_v58 = vpop.f32.mrf.mxu0 }
 0x375   : > { %v1474_v8 = vmul.f32 0.088388346, %v1267_v29  ;;  %v1269_v1 = vadd.f32 %v1268_v58, %v4349_v42  ;;  %v1259_v29 = vadd.f32 %v1258_v17, %v4349_v42  ;;  %v1253_v58 = vadd.f32 %v1252_v50, %v4349_v42 }
 0x376   : > { %v1270_v61 = vpop.f32.mrf.mxu0 }
 0x377   : > { %v1271_v41 = vadd.f32 %v1270_v61, %v4347_v63 }
 0x378   : > { %v1272_v7 = vpop.f32.mrf.mxu0 }
 0x379   : > { %v1475_v48 = vmul.f32 0.088388346, %v1271_v41  ;;  %v1273_v39 = vadd.f32 %v1272_v7, %v4349_v42  ;;  %v5185_v41 = vpack.c.bf16 %v4488_v49, %v4484_v32  ;;  %v1249_v7 = vadd.f32 %v1248_v16, %v4349_v42 }
 0x37a   : > { %v1276_v28 = vpop.f32.mrf.mxu0  ;;  %v5187_v32 = vpack.c.bf16 %v4454_v10, %v4446_v53  ;;  %v5188_v49 = vpack.c.bf16 %v4434_v47, %v4426_v21  ;;  %v5191_v21 = vpack.c.bf16 %v4367_v43, %v4355_v44  ;;  %v5192_v47 = vld [vmem:[#allocation13_spill] sm:$0xff]  ;;  %v5197_v44 = vld [vmem:[#allocation18_spill] sm:$0xff]  ;;  %v5198_v43 = vld [vmem:[#allocation19_spill] sm:$0xff] }
 0x37b   : > { %v4612_v22 = vpack.c.bf16 %v1475_v48, %v1474_v8  ;;  %v1277_v14 = vadd.f32 %v1276_v28, %v4347_v63  ;;  %v1508_v15 = vpack.c.bf16 %v1273_v39, %v1269_v1  ;;  %v1506_v8 = vpack.c.bf16 %v1253_v58, %v1249_v7 }
 0x37c   : > { %v1278_v23 = vpop.f32.mrf.mxu0 }
 0x37d   : > { %v1476_v25 = vmul.f32 0.088388346, %v1277_v14  ;;  %v1279_v24 = vadd.f32 %v1278_v23, %v4349_v42 }
 0x37e   : > { %v1280_v27 = vpop.f32.mrf.mxu0 }
 0x37f   : > { %v1281_v45 = vadd.f32 %v1280_v27, %v4347_v63  ;;  %v1263_v63 = vadd.f32 %v1262_v56, %v4349_v42 }
 0x380   : > { %v1282_v52 = vpop.f32.mrf.mxu0 }
 0x381   : > { %v1477_v19 = vmul.f32 0.088388346, %v1281_v45  ;;  %v1283_v31 = vadd.f32 %v1282_v52, %v4349_v42  ;;  %v1507_v61 = vpack.c.bf16 %v1263_v63, %v1259_v29 }
 0x383   : > { %v1493_v35 = vpack.c.bf16 %v1477_v19, %v1476_v25  ;;  %v1509_v0 = vpack.c.bf16 %v1283_v31, %v1279_v24 }
 0x385   : > { %2890 = vmatprep.subr.bf16.mxu1 %v1509_v0 }
 0x386   : > { %2891 = vmatpush3.bf16.xpose.msra.mxu1 %v1501_v55  ;;  %v1239_v55 = vadd.f32 %v4591_v40, %v4349_v42  ;;  %v5190_v42 = vpack.c.bf16 %v4392_v20, %v4379_v57  ;;  %v5195_v57 = vld [vmem:[#allocation16_spill] sm:$0xff]  ;;  %v5196_v20 = vld [vmem:[#allocation17_spill] sm:$0xff] }
 0x387   : > { %2892 = vmatprep.subr.bf16.mxu1 %v1508_v15 }
 0x388   : > { %v1505_v17 = vpack.c.bf16 %v1243_v18, %v1239_v55 }
 0x38e   : > { %2893 = vmatpush3.bf16.xpose.msra.mxu1 %v5185_v41 }
 0x38f   : > { %2894 = vmatprep.subr.bf16.mxu1 %v1507_v61 }
 0x396   : > { %2895 = vmatpush3.bf16.xpose.msra.mxu1 %v5186_v59 }
 0x397   : > { %2896 = vmatprep.subr.bf16.mxu1 %v1506_v8 }
 0x39e   : > { %2897 = vmatpush3.bf16.xpose.msra.mxu1 %v5187_v32 }
 0x39f   : > { %2898 = vmatprep.subr.bf16.mxu1 %v1505_v17 }
 0x3a6   : > { %2899 = vmatpush3.bf16.xpose.msra.mxu1 %v5188_v49 }
 0x3a7   : > { %2900 = vmatprep.subr.bf16.mxu1 %v1504_v13 }
 0x3ae   : > { %2901 = vmatpush3.bf16.xpose.msra.mxu1 %v5189_v37 }
 0x3af   : > { %2902 = vmatprep.subr.bf16.mxu1 %v1503_v4 }
 0x3b6   : > { %2903 = vmatpush3.bf16.xpose.msra.mxu1 %v5190_v42 }
 0x3b7   : > { %2904 = vmatprep.subr.bf16.mxu1 %v1502_v54 }
 0x3be   : > { %2905 = vmatpush3.bf16.xpose.msra.mxu1 %v5191_v21 }
 0x3c5   : > { %2907 = vmatmul.mubr.bf16.vlgmr.msra.gmra.mxu1 %v5192_v47 }
 0x3c6   : > { %2908 = vmatprep.mubr.bf16.mxu1 %v5193_v36 }
 0x3cd   : > { %2909 = vmatmul.mubr.bf16.gmra.mxu1 %v5193_v36 }
 0x3ce   : > { %2910 = vmatprep.mubr.bf16.mxu1 %v5194_v34 }
 0x3d5   : > { %2911 = vmatmul.mubr.bf16.gmra.mxu1 %v5194_v34 }
 0x3d6   : > { %2912 = vmatprep.mubr.bf16.mxu1 %v5195_v57 }
 0x3dd   : > { %2913 = vmatmul.mubr.bf16.gmra.mxu1 %v5195_v57 }
 0x3de   : > { %2914 = vmatprep.mubr.bf16.mxu1 %v5196_v20 }
 0x3e5   : > { %2915 = vmatmul.mubr.bf16.gmra.mxu1 %v5196_v20 }
 0x3e6   : > { %2916 = vmatprep.mubr.bf16.mxu1 %v5197_v44 }
 0x3ed   : > { %2917 = vmatmul.mubr.bf16.gmra.mxu1 %v5197_v44 }
 0x3ee   : > { %2918 = vmatprep.mubr.bf16.mxu1 %v5198_v43 }
 0x3f5   : > { %2919 = vmatmul.mubr.bf16.gmra.mxu1 %v5198_v43 }
 0x3f6   : > { %2920 = vmatprep.mubr.bf16.mxu1 %v4512_v6 }
 0x3fd   : > { %2921 = vmatmul.mubr.bf16.gmra.mxu1 %v4512_v6 }
 0x3fe   : > { %2922 = vmatprep.mubr.bf16.mxu1 %v4536_v12 }
 0x405   : > { %2923 = vmatmul.mubr.bf16.gmra.mxu1 %v4536_v12 }
 0x406   : > { %2924 = vmatprep.mubr.bf16.mxu1 %v4560_v38 }
 0x40d   : > { %2925 = vmatmul.mubr.bf16.gmra.mxu1 %v4560_v38 }
 0x40e   : > { %2926 = vmatprep.mubr.bf16.mxu1 %v4587_v62 }
 0x415   : > { %2927 = vmatmul.mubr.bf16.gmra.mxu1 %v4587_v62 }
 0x416   : > { %2928 = vmatprep.mubr.bf16.mxu1 %v4600_v46 }
 0x41d   : > { %2929 = vmatmul.mubr.bf16.gmra.mxu1 %v4600_v46 }
 0x41e   : > { %2930 = vmatprep.mubr.bf16.mxu1 %v4604_v9 }
 0x425   : > { %2931 = vmatmul.mubr.bf16.gmra.mxu1 %v4604_v9 }
 0x426   : > { %2932 = vmatprep.mubr.bf16.mxu1 %v4608_v5 }
 0x42d   : > { %2933 = vmatmul.mubr.bf16.gmra.mxu1 %v4608_v5 }
 0x42e   : > { %2934 = vmatprep.mubr.bf16.mxu1 %v4612_v22 }
 0x435   : > { %2935 = vmatmul.mubr.bf16.gmra.mxu1 %v4612_v22 }
 0x436   : > { %2936 = vmatprep.mubr.bf16.mxu1 %v1493_v35 }
 0x43d   : > { %2937 = vmatmul.mubr.bf16.gmra.mxu1 %v1493_v35 }
 0x485   : > { %v4689_v53 = vpop.f32.mrf.mxu1 }
 0x487   : > { %v4691_v10 = vpop.f32.mrf.mxu1 }
 0x488   : > { %v1719_v2 = vmax.f32 %v4689_v53, %v4691_v10 }
 0x489   : > { %v4695_v6 = vpop.f32.mrf.mxu1 }
 0x48a   : > { %1720 = vmax.xlane.f32.xlu0 %v1719_v2 }
 0x48b   : > { %v4697_v26 = vpop.f32.mrf.mxu1 }
 0x48c   : > { %v1722_v60 = vmax.f32 %v4695_v6, %v4697_v26 }
 0x48d   : > { %v4701_v12 = vpop.f32.mrf.mxu1 }
 0x48e   : > { %1723 = vmax.xlane.f32.xlu0 %v1722_v60 }
 0x48f   : > { %v4703_v54 = vpop.f32.mrf.mxu1 }
 0x490   : > { %v1725_v33 = vmax.f32 %v4701_v12, %v4703_v54 }
 0x491   : > { %v4707_v3 = vpop.f32.mrf.mxu1 }
 0x492   : > { %1726 = vmax.xlane.f32.xlu1 %v1725_v33 }
 0x493   : > { %v4709_v38 = vpop.f32.mrf.mxu1 }
 0x494   : > { %v1728_v4 = vmax.f32 %v4707_v3, %v4709_v38 }
 0x495   : > { %v4713_v11 = vpop.f32.mrf.mxu1 }
 0x496   : > { %1729 = vmax.xlane.f32.xlu1 %v1728_v4 }
 0x497   : > { %v4715_v51 = vpop.f32.mrf.mxu1 }
 0x498   : > { %v1731_v62 = vmax.f32 %v4713_v11, %v4715_v51 }
 0x499   : > { %v4719_v13 = vpop.f32.mrf.mxu1 }
 0x49a   : > { %1732 = vmax.xlane.f32.xlu0 %v1731_v62 }
 0x49b   : > { %v4721_v40 = vpop.f32.mrf.mxu1 }
 0x49c   : > { %v1734_v30 = vmax.f32 %v4719_v13, %v4721_v40 }
 0x49d   : > { %v4725_v46 = vpop.f32.mrf.mxu1 }
 0x49e   : > { %1735 = vmax.xlane.f32.xlu1 %v1734_v30 }
 0x49f   : > { %v4727_v16 = vpop.f32.mrf.mxu1 }
 0x4a0   : > { %v1737_v50 = vmax.f32 %v4725_v46, %v4727_v16 }
 0x4a1   : > { %v4731_v9 = vpop.f32.mrf.mxu1 }
 0x4a2   : > { %1738 = vmax.xlane.f32.xlu0 %v1737_v50 }
 0x4a3   : > { %v4733_v56 = vpop.f32.mrf.mxu1 }
 0x4a4   : > { %v1740_v5 = vmax.f32 %v4731_v9, %v4733_v56 }
 0x4a5   : > { %v4737_v48 = vpop.f32.mrf.mxu1 }
 0x4a6   : > { %1741 = vmax.xlane.f32.xlu1 %v1740_v5 }
 0x4a7   : > { %v4739_v28 = vpop.f32.mrf.mxu1 }
 0x4a8   : > { %v1743_v22 = vmax.f32 %v4737_v48, %v4739_v28 }
 0x4a9   : > { %v4743_v23 = vpop.f32.mrf.mxu1 }
 0x4aa   : > { %1744 = vmax.xlane.f32.xlu0 %v1743_v22 }
 0x4ab   : > { %v4745_v14 = vpop.f32.mrf.mxu1 }
 0x4ac   : > { %v1746_v27 = vmax.f32 %v4743_v23, %v4745_v14 }
 0x4ad   : > { %v4749_v45 = vpop.f32.mrf.mxu1 }
 0x4ae   : > { %1747 = vmax.xlane.f32.xlu1 %v1746_v27 }
 0x4af   : > { %v4751_v39 = vpop.f32.mrf.mxu1 }
 0x4b0   : > { %v1749_v52 = vmax.f32 %v4749_v45, %v4751_v39 }
 0x4b1   : > { %v4755_v25 = vpop.f32.mrf.mxu1 }
 0x4b2   : > { %1750 = vmax.xlane.f32.xlu0 %v1749_v52 }
 0x4b3   : > { %v4757_v24 = vpop.f32.mrf.mxu1 }
 0x4b4   : > { %v1752_v19 = vmax.f32 %v4755_v25, %v4757_v24 }
 0x4b5   : > { %v4761_v31 = vpop.f32.mrf.mxu1 }
 0x4b6   : > { %1753 = vmax.xlane.f32.xlu1 %v1752_v19 }
 0x4b7   : > { %v4763_v1 = vpop.f32.mrf.mxu1 }
 0x4b8   : > { %v1755_v35 = vmax.f32 %v4761_v31, %v4763_v1 }
 0x4b9   : > { %v4767_v0 = vpop.f32.mrf.mxu1 }
 0x4ba   : > { %1756 = vmax.xlane.f32.xlu0 %v1755_v35 }
 0x4bb   : > { %v4769_v15 = vpop.f32.mrf.mxu1 }
 0x4bc   : > { %v1758_v63 = vmax.f32 %v4767_v0, %v4769_v15 }
 0x4bd   : > { %v4773_v29 = vpop.f32.mrf.mxu1 }
 0x4be   : > { %1759 = vmax.xlane.f32.xlu1 %v1758_v63 }
 0x4bf   : > { %v4775_v61 = vpop.f32.mrf.mxu1 }
 0x4c0   : > { %v1761_v41 = vmax.f32 %v4773_v29, %v4775_v61 }
 0x4c1   : > { %v4779_v58 = vpop.f32.mrf.mxu1 }
 0x4c2   : > { %1762 = vmax.xlane.f32.xlu0 %v1761_v41 }
 0x4c3   : > { %v4781_v7 = vpop.f32.mrf.mxu1 }
 0x4c4   : > { %v1764_v8 = vmax.f32 %v4779_v58, %v4781_v7 }
 0x4c5   : > { %v4785_v59 = vpop.f32.mrf.mxu1 }
 0x4c6   : > { %1765 = vmax.xlane.f32.xlu1 %v1764_v8 }
 0x4c7   : > { %v4787_v18 = vpop.f32.mrf.mxu1 }
 0x4c8   : > { %v1767_v55 = vmax.f32 %v4785_v59, %v4787_v18 }
 0x4c9   : > { %v4791_v17 = vpop.f32.mrf.mxu1 }
 0x4ca   : > { %1768 = vmax.xlane.f32.xlu0 %v1767_v55 }
 0x4cb   : > { %v4793_v32 = vpop.f32.mrf.mxu1 }
 0x4cc   : > { %v1770_v49 = vmax.f32 %v4791_v17, %v4793_v32 }
 0x4cd   : > { %v4797_v37 = vpop.f32.mrf.mxu1 }
 0x4ce   : > { %1771 = vmax.xlane.f32.xlu1 %v1770_v49 }
 0x4cf   : > { %v4799_v42 = vpop.f32.mrf.mxu1 }
 0x4d0   : > { %v1773_v21 = vmax.f32 %v4797_v37, %v4799_v42 }
 0x4d1   : > { %v4803_v47 = vpop.f32.mrf.mxu1 }
 0x4d2   : > { %1774 = vmax.xlane.f32.xlu0 %v1773_v21 }
 0x4d3   : > { %v4805_v36 = vpop.f32.mrf.mxu1 }
 0x4d4   : > { %v1776_v34 = vmax.f32 %v4803_v47, %v4805_v36 }
 0x4d5   : > { %v4809_v57 = vpop.f32.mrf.mxu1 }
 0x4d6   : > { %1777 = vmax.xlane.f32.xlu1 %v1776_v34 }
 0x4d7   : > { %v4811_v20 = vpop.f32.mrf.mxu1 }
 0x4d8   : > { %v1779_v44 = vmax.f32 %v4809_v57, %v4811_v20 }
 0x4d9   : > { %v4815_v43 = vpop.f32.mrf.mxu1 }
 0x4da   : > { %1780 = vmax.xlane.f32.xlu0 %v1779_v44 }
 0x4db   : > { %v4817_v2 = vpop.f32.mrf.mxu1 }
 0x4dc   : > { %v1782_v60 = vmax.f32 %v4815_v43, %v4817_v2 }
 0x4dd   : > { %v4821_v33 = vpop.f32.mrf.mxu1 }
 0x4de   : > { %1783 = vmax.xlane.f32.xlu1 %v1782_v60 }
 0x4df   : > { %v4823_v4 = vpop.f32.mrf.mxu1 }
 0x4e0   : > { %v1785_v62 = vmax.f32 %v4821_v33, %v4823_v4 }
 0x4e1   : > { %v4827_v30 = vpop.f32.mrf.mxu1 }
 0x4e2   : > { %1786 = vmax.xlane.f32.xlu0 %v1785_v62 }
 0x4e3   : > { %v4829_v50 = vpop.f32.mrf.mxu1 }
 0x4e4   : > { %v1788_v5 = vmax.f32 %v4827_v30, %v4829_v50 }
 0x4e5   : > { %v4833_v22 = vpop.f32.mrf.mxu1 }
 0x4e6   : > { %1789 = vmax.xlane.f32.xlu1 %v1788_v5 }
 0x4e7   : > { %v4835_v27 = vpop.f32.mrf.mxu1 }
 0x4e8   : > { %v1791_v52 = vmax.f32 %v4833_v22, %v4835_v27 }
 0x4e9   : > { %v4839_v19 = vpop.f32.mrf.mxu1 }
 0x4ea   : > { %5199 = vst [vmem:[#allocation13_spill] sm:$0xff] %v4839_v19  ;;  %1792 = vmax.xlane.f32.xlu0 %v1791_v52 }
 0x4eb   : > { %v4841_v35 = vpop.f32.mrf.mxu1 }
 0x4ec   : > { %5200 = vst [vmem:[#allocation14_spill] sm:$0xff] %v4841_v35  ;;  %v1794_v63 = vmax.f32 %v4839_v19, %v4841_v35 }
 0x4ed   : > { %v4845_v41 = vpop.f32.mrf.mxu1 }
 0x4ee   : > { %5201 = vst [vmem:[#allocation15_spill] sm:$0xff] %v4845_v41  ;;  %1795 = vmax.xlane.f32.xlu1 %v1794_v63 }
 0x4ef   : > { %v4847_v8 = vpop.f32.mrf.mxu1 }
 0x4f0   : > { %5202 = vst [vmem:[#allocation16_spill] sm:$0xff] %v4847_v8  ;;  %v1797_v55 = vmax.f32 %v4845_v41, %v4847_v8 }
 0x4f1   : > { %v4851_v49 = vpop.f32.mrf.mxu1 }
 0x4f2   : > { %5203 = vst [vmem:[#allocation17_spill] sm:$0xff] %v4851_v49  ;;  %1798 = vmax.xlane.f32.xlu0 %v1797_v55 }
 0x4f3   : > { %v4853_v21 = vpop.f32.mrf.mxu1 }
 0x4f4   : > { %5204 = vst [vmem:[#allocation18_spill] sm:$0xff] %v4853_v21  ;;  %v1800_v34 = vmax.f32 %v4851_v49, %v4853_v21 }
 0x4f5   : > { %v4857_v44 = vpop.f32.mrf.mxu1 }
 0x4f6   : > { %5205 = vst [vmem:[#allocation19_spill] sm:$0xff] %v4857_v44  ;;  %1801 = vmax.xlane.f32.xlu1 %v1800_v34 }
 0x4f7   : > { %v4859_v60 = vpop.f32.mrf.mxu1 }
 0x4f8   : > { %5206 = vst [vmem:[#allocation20_spill] sm:$0xff] %v4859_v60  ;;  %v1803_v62 = vmax.f32 %v4857_v44, %v4859_v60 }
 0x4f9   : > { %v4863_v5 = vpop.f32.mrf.mxu1 }
 0x4fa   : > { %5207 = vst [vmem:[#allocation21_spill] sm:$0xff] %v4863_v5  ;;  %1804 = vmax.xlane.f32.xlu0 %v1803_v62 }
 0x4fb   : > { %v4865_v52 = vpop.f32.mrf.mxu1 }
 0x4fc   : > { %5208 = vst [vmem:[#allocation22_spill] sm:$0xff] %v4865_v52  ;;  %v1806_v63 = vmax.f32 %v4863_v5, %v4865_v52 }
 0x4fd   : > { %v4869_v55 = vpop.f32.mrf.mxu1 }
 0x4fe   : > { %5209 = vst [vmem:[#allocation23_spill] sm:$0xff] %v4869_v55  ;;  %1807 = vmax.xlane.f32.xlu1 %v1806_v63 }
 0x4ff   : > { %v4871_v21 = vpop.f32.mrf.mxu1 }
 0x500   : > { %5210 = vst [vmem:[#allocation24_spill] sm:$0xff] %v4871_v21  ;;  %v1809_v34 = vmax.f32 %v4869_v55, %v4871_v21 }
 0x501   : > { %v4875_v49 = vpop.f32.mrf.mxu1 }
 0x502   : > { %1810 = vmax.xlane.f32.xlu0 %v1809_v34 }
 0x503   : > { %v4877_v60 = vpop.f32.mrf.mxu1 }
 0x504   : > { %5211 = vst [vmem:[#allocation25_spill] sm:$0xff] %v4877_v60  ;;  %v1812_v62 = vmax.f32 %v4875_v49, %v4877_v60 }
 0x506   : > { %1813 = vmax.xlane.f32.xlu1 %v1812_v62 }
 0x513   : > { %v1721_v44 = vpop.xlane.xlu0 %1720 }
 0x514   : > { %v1815_v52 = vsub.f32 %v4689_v53, %v1721_v44  ;;  %v1816_v5 = vsub.f32 %v4691_v10, %v1721_v44 }
 0x516   : > { %v1879_v63 = vmul.f32 1.442695, %v1815_v52  ;;  %v1881_v8 = vmul.f32 1.442695, %v1816_v5 }
 0x517   : > { %v1724_v41 = vpop.xlane.xlu0 %1723 }
 0x518   : > { %3370 = vpow2.f32 %v1879_v63  ;;  %v1817_v21 = vsub.f32 %v4695_v6, %v1724_v41  ;;  %v1818_v55 = vsub.f32 %v4697_v26, %v1724_v41 }
 0x519   : > { %3372 = vpow2.f32 %v1881_v8 }
 0x51a   : > { %v1883_v34 = vmul.f32 1.442695, %v1817_v21  ;;  %v1885_v35 = vmul.f32 1.442695, %v1818_v55 }
 0x51b   : > { %v1727_v19 = vpop.xlane.xlu1 %1726 }
 0x51c   : > { %3374 = vpow2.f32 %v1883_v34  ;;  %v1819_v62 = vsub.f32 %v4701_v12, %v1727_v19  ;;  %v1820_v60 = vsub.f32 %v4703_v54, %v1727_v19 }
 0x51d   : > { %3376 = vpow2.f32 %v1885_v35 }
 0x51e   : > { %v1887_v53 = vmul.f32 1.442695, %v1819_v62  ;;  %v1889_v10 = vmul.f32 1.442695, %v1820_v60 }
 0x51f   : > { %v1730_v44 = vpop.xlane.xlu1 %1729 }
 0x520   : > { %3378 = vpow2.f32 %v1887_v53  ;;  %v1821_v5 = vsub.f32 %v4707_v3, %v1730_v44  ;;  %v1822_v6 = vsub.f32 %v4709_v38, %v1730_v44 }
 0x521   : > { %3380 = vpow2.f32 %v1889_v10 }
 0x522   : > { %v1891_v26 = vmul.f32 1.442695, %v1821_v5  ;;  %v1893_v41 = vmul.f32 1.442695, %v1822_v6 }
 0x523   : > { %v1733_v8 = vpop.xlane.xlu0 %1732 }
 0x524   : > { %3382 = vpow2.f32 %v1891_v26  ;;  %v1823_v21 = vsub.f32 %v4713_v11, %v1733_v8  ;;  %v1824_v12 = vsub.f32 %v4715_v51, %v1733_v8 }
 0x525   : > { %v3371_v52 = vpop.eup %3370  ;;  %3384 = vpow2.f32 %v1893_v41 }
 0x526   : > { %v3373_v54 = vpop.eup %3372  ;;  %v1895_v19 = vmul.f32 1.442695, %v1823_v21  ;;  %v1897_v35 = vmul.f32 1.442695, %v1824_v12 }
 0x527   : > { %v1736_v60 = vpop.xlane.xlu1 %1735  ;;  %v2007_v55 = vadd.f32 %v3373_v54, %v3371_v52 }
 0x528   : > { %3386 = vpow2.f32 %v1895_v19  ;;  %v1825_v3 = vsub.f32 %v4719_v13, %v1736_v60  ;;  %v1826_v38 = vsub.f32 %v4721_v40, %v1736_v60 }
 0x529   : > { %v3375_v63 = vpop.eup %3374  ;;  %3388 = vpow2.f32 %v1897_v35  ;;  %2008 = vadd.xlane.f32.xlu0 %v2007_v55 }
 0x52a   : > { %v3377_v34 = vpop.eup %3376  ;;  %v1899_v62 = vmul.f32 1.442695, %v1825_v3  ;;  %v1901_v11 = vmul.f32 1.442695, %v1826_v38  ;;  %v2103_v53 = vpack.c.bf16 %v3375_v63, %v3371_v52 }
 0x52b   : > { %v1739_v51 = vpop.xlane.xlu0 %1738  ;;  %v2104_v10 = vpack.c.bf16 %v3377_v34, %v3373_v54  ;;  %v2010_v44 = vadd.f32 %v3377_v34, %v3375_v63 }
 0x52c   : > { %3390 = vpow2.f32 %v1899_v62  ;;  %v1827_v5 = vsub.f32 %v4725_v46, %v1739_v51  ;;  %v1828_v6 = vsub.f32 %v4727_v16, %v1739_v51 }
 0x52d   : > { %v3379_v26 = vpop.eup %3378  ;;  %3392 = vpow2.f32 %v1901_v11  ;;  %2167 = vmatprep.mubr.bf16.mxu0 %v2104_v10  ;;  %2011 = vadd.xlane.f32.xlu1 %v2010_v44 }
 0x52e   : > { %v3381_v13 = vpop.eup %3380  ;;  %v1903_v40 = vmul.f32 1.442695, %v1827_v5  ;;  %v1905_v41 = vmul.f32 1.442695, %v1828_v6  ;;  %2168 = vmatmul.mubr.bf16.vlgmr.msra.gmra.mxu0 %v2103_v53 }
 0x52f   : > { %v1742_v8 = vpop.xlane.xlu1 %1741  ;;  %v2013_v21 = vadd.f32 %v3381_v13, %v3379_v26 }
 0x530   : > { %3394 = vpow2.f32 %v1903_v40  ;;  %v1829_v12 = vsub.f32 %v4731_v9, %v1742_v8  ;;  %v1830_v52 = vsub.f32 %v4733_v56, %v1742_v8 }
 0x531   : > { %v3383_v54 = vpop.eup %3382  ;;  %3396 = vpow2.f32 %v1905_v41  ;;  %2014 = vadd.xlane.f32.xlu0 %v2013_v21  ;;  %v3360_v41 = vld [vmem:[%s5131_s7 + $0x38] sm:$0xff]  }
 0x532   : > { %v3385_v46 = vpop.eup %3384  ;;  %v1907_v16 = vmul.f32 1.442695, %v1829_v12  ;;  %v1909_v19 = vmul.f32 1.442695, %v1830_v52  ;;  %v2105_v35 = vpack.c.bf16 %v3383_v54, %v3379_v26  ;;  %3214 = vmatprep.subr.bf16.mxu1 %v3360_v41 }
 0x533   : > { %v1745_v60 = vpop.xlane.xlu0 %1744  ;;  %v2106_v55 = vpack.c.bf16 %v3385_v46, %v3381_v13  ;;  %v2016_v3 = vadd.f32 %v3385_v46, %v3383_v54  ;;  %3215 = vmatpush3.bf16.msra.mxu1 %v3360_v41 }
 0x534   : > { %3398 = vpow2.f32 %v1907_v16  ;;  %v1831_v38 = vsub.f32 %v4737_v48, %v1745_v60  ;;  %v1832_v63 = vsub.f32 %v4739_v28, %v1745_v60 }
 0x535   : > { %v3387_v34 = vpop.eup %3386  ;;  %3400 = vpow2.f32 %v1909_v19  ;;  %2175 = vmatprep.mubr.bf16.mxu0 %v2106_v55  ;;  %2017 = vadd.xlane.f32.xlu1 %v2016_v3 }
 0x536   : > { %v3389_v9 = vpop.eup %3388  ;;  %v1911_v56 = vmul.f32 1.442695, %v1831_v38  ;;  %v1913_v62 = vmul.f32 1.442695, %v1832_v63  ;;  %2176 = vmatmul.mubr.bf16.gmra.mxu0 %v2105_v35 }
 0x537   : > { %v1748_v11 = vpop.xlane.xlu1 %1747  ;;  %v2019_v53 = vadd.f32 %v3389_v9, %v3387_v34 }
 0x538   : > { %3402 = vpow2.f32 %v1911_v56  ;;  %v1833_v51 = vsub.f32 %v4743_v23, %v1748_v11  ;;  %v1834_v10 = vsub.f32 %v4745_v14, %v1748_v11 }
 0x539   : > { %v3391_v44 = vpop.eup %3390  ;;  %3404 = vpow2.f32 %v1913_v62  ;;  %2020 = vadd.xlane.f32.xlu0 %v2019_v53 }
 0x53a   : > { %v3393_v48 = vpop.eup %3392  ;;  %v1915_v28 = vmul.f32 1.442695, %v1833_v51  ;;  %v1917_v5 = vmul.f32 1.442695, %v1834_v10  ;;  %v2107_v6 = vpack.c.bf16 %v3391_v44, %v3387_v34 }
 0x53b   : > { %v1751_v26 = vpop.xlane.xlu0 %1750  ;;  %v2108_v13 = vpack.c.bf16 %v3393_v48, %v3389_v9  ;;  %v2022_v40 = vadd.f32 %v3393_v48, %v3391_v44 }
 0x53c   : > { %3406 = vpow2.f32 %v1915_v28  ;;  %v1835_v8 = vsub.f32 %v4749_v45, %v1751_v26  ;;  %v1836_v23 = vsub.f32 %v4751_v39, %v1751_v26 }
 0x53d   : > { %v3395_v14 = vpop.eup %3394  ;;  %3408 = vpow2.f32 %v1917_v5  ;;  %2183 = vmatprep.mubr.bf16.mxu0 %v2108_v13  ;;  %2023 = vadd.xlane.f32.xlu1 %v2022_v40  ;;  %v3361_v13 = vld [vmem:[%s5131_s7 + $0x30] sm:$0xff]  }
 0x53e   : > { %v3397_v21 = vpop.eup %3396  ;;  %v1919_v12 = vmul.f32 1.442695, %v1835_v8  ;;  %v1921_v52 = vmul.f32 1.442695, %v1836_v23  ;;  %2184 = vmatmul.mubr.bf16.gmra.mxu0 %v2107_v6  ;;  %3216 = vmatprep.subr.bf16.mxu1 %v3361_v13 }
 0x53f   : > { %v1754_v54 = vpop.xlane.xlu1 %1753  ;;  %v2025_v46 = vadd.f32 %v3397_v21, %v3395_v14  ;;  %3217 = vmatpush3.bf16.msra.mxu1 %v3361_v13 }
 0x540   : > { %3410 = vpow2.f32 %v1919_v12  ;;  %v1837_v16 = vsub.f32 %v4755_v25, %v1754_v54  ;;  %v1838_v19 = vsub.f32 %v4757_v24, %v1754_v54 }
 0x541   : > { %v3399_v45 = vpop.eup %3398  ;;  %3412 = vpow2.f32 %v1921_v52  ;;  %2026 = vadd.xlane.f32.xlu0 %v2025_v46 }
 0x542   : > { %v3401_v39 = vpop.eup %3400  ;;  %v1923_v35 = vmul.f32 1.442695, %v1837_v16  ;;  %v1925_v60 = vmul.f32 1.442695, %v1838_v19  ;;  %v2109_v55 = vpack.c.bf16 %v3399_v45, %v3395_v14 }
 0x543   : > { %v1757_v3 = vpop.xlane.xlu0 %1756  ;;  %v2110_v38 = vpack.c.bf16 %v3401_v39, %v3397_v21  ;;  %v2028_v63 = vadd.f32 %v3401_v39, %v3399_v45 }
 0x544   : > { %3414 = vpow2.f32 %v1923_v35  ;;  %v1839_v34 = vsub.f32 %v4761_v31, %v1757_v3  ;;  %v1840_v9 = vsub.f32 %v4763_v1, %v1757_v3 }
 0x545   : > { %v3403_v56 = vpop.eup %3402  ;;  %3416 = vpow2.f32 %v1925_v60  ;;  %2191 = vmatprep.mubr.bf16.mxu0 %v2110_v38  ;;  %2029 = vadd.xlane.f32.xlu1 %v2028_v63 }
 0x546   : > { %v3405_v25 = vpop.eup %3404  ;;  %v1927_v24 = vmul.f32 1.442695, %v1839_v34  ;;  %v1929_v62 = vmul.f32 1.442695, %v1840_v9  ;;  %2192 = vmatmul.mubr.bf16.gmra.mxu0 %v2109_v55 }
 0x547   : > { %v1760_v11 = vpop.xlane.xlu1 %1759  ;;  %v2031_v53 = vadd.f32 %v3405_v25, %v3403_v56 }
 0x548   : > { %3418 = vpow2.f32 %v1927_v24  ;;  %v1841_v51 = vsub.f32 %v4767_v0, %v1760_v11  ;;  %v1842_v10 = vsub.f32 %v4769_v15, %v1760_v11 }
 0x549   : > { %v3407_v44 = vpop.eup %3406  ;;  %3420 = vpow2.f32 %v1929_v62  ;;  %2032 = vadd.xlane.f32.xlu0 %v2031_v53 }
 0x54a   : > { %v3409_v31 = vpop.eup %3408  ;;  %v1931_v1 = vmul.f32 1.442695, %v1841_v51  ;;  %v1933_v48 = vmul.f32 1.442695, %v1842_v10  ;;  %v2111_v28 = vpack.c.bf16 %v3407_v44, %v3403_v56  ;;  %v3362_v51 = vld [vmem:[%s5131_s7 + $0x28] sm:$0xff]  }
 0x54b   : > { %v1763_v5 = vpop.xlane.xlu0 %1762  ;;  %v2112_v6 = vpack.c.bf16 %v3409_v31, %v3405_v25  ;;  %v2034_v26 = vadd.f32 %v3409_v31, %v3407_v44  ;;  %3218 = vmatprep.subr.bf16.mxu1 %v3362_v51 }
 0x54c   : > { %3422 = vpow2.f32 %v1931_v1  ;;  %v1843_v40 = vsub.f32 %v4773_v29, %v1763_v5  ;;  %v1844_v0 = vsub.f32 %v4775_v61, %v1763_v5  ;;  %3219 = vmatpush3.bf16.msra.mxu1 %v3362_v51 }
 0x54d   : > { %v3411_v15 = vpop.eup %3410  ;;  %3424 = vpow2.f32 %v1933_v48  ;;  %2199 = vmatprep.mubr.bf16.mxu0 %v2112_v6  ;;  %2035 = vadd.xlane.f32.xlu1 %v2034_v26 }
 0x54e   : > { %v3413_v41 = vpop.eup %3412  ;;  %v1935_v8 = vmul.f32 1.442695, %v1843_v40  ;;  %v1937_v23 = vmul.f32 1.442695, %v1844_v0  ;;  %2200 = vmatmul.mubr.bf16.gmra.mxu0 %v2111_v28 }
 0x54f   : > { %v1766_v14 = vpop.xlane.xlu1 %1765  ;;  %v2037_v21 = vadd.f32 %v3413_v41, %v3411_v15 }
 0x550   : > { %3426 = vpow2.f32 %v1935_v8  ;;  %v1845_v12 = vsub.f32 %v4779_v58, %v1766_v14  ;;  %v1846_v52 = vsub.f32 %v4781_v7, %v1766_v14 }
 0x551   : > { %v3415_v29 = vpop.eup %3414  ;;  %3428 = vpow2.f32 %v1937_v23  ;;  %2038 = vadd.xlane.f32.xlu0 %v2037_v21 }
 0x552   : > { %v3417_v61 = vpop.eup %3416  ;;  %v1939_v54 = vmul.f32 1.442695, %v1845_v12  ;;  %v1941_v46 = vmul.f32 1.442695, %v1846_v52  ;;  %v2113_v16 = vpack.c.bf16 %v3415_v29, %v3411_v15 }
 0x553   : > { %v1769_v19 = vpop.xlane.xlu0 %1768  ;;  %v2114_v45 = vpack.c.bf16 %v3417_v61, %v3413_v41  ;;  %v2040_v39 = vadd.f32 %v3417_v61, %v3415_v29 }
 0x554   : > { %3430 = vpow2.f32 %v1939_v54  ;;  %v1847_v35 = vsub.f32 %v4785_v59, %v1769_v19  ;;  %v1848_v60 = vsub.f32 %v4787_v18, %v1769_v19 }
 0x555   : > { %v3419_v55 = vpop.eup %3418  ;;  %3432 = vpow2.f32 %v1941_v46  ;;  %2207 = vmatprep.mubr.bf16.mxu0 %v2114_v45  ;;  %2041 = vadd.xlane.f32.xlu1 %v2040_v39 }
 0x556   : > { %v3421_v58 = vpop.eup %3420  ;;  %v1943_v7 = vmul.f32 1.442695, %v1847_v35  ;;  %v1945_v3 = vmul.f32 1.442695, %v1848_v60  ;;  %2208 = vmatmul.mubr.bf16.gmra.mxu0 %v2113_v16  ;;  %v3363_v35 = vld [vmem:[%s5131_s7 + $0x20] sm:$0xff]  }
 0x557   : > { %v1772_v38 = vpop.xlane.xlu1 %1771  ;;  %v2043_v63 = vadd.f32 %v3421_v58, %v3419_v55  ;;  %3220 = vmatprep.subr.bf16.mxu1 %v3363_v35 }
 0x558   : > { %3434 = vpow2.f32 %v1943_v7  ;;  %v1849_v34 = vsub.f32 %v4791_v17, %v1772_v38  ;;  %v1850_v9 = vsub.f32 %v4793_v32, %v1772_v38  ;;  %3221 = vmatpush3.bf16.msra.mxu1 %v3363_v35 }
 0x559   : > { %v3423_v56 = vpop.eup %3422  ;;  %3436 = vpow2.f32 %v1945_v3  ;;  %2044 = vadd.xlane.f32.xlu0 %v2043_v63 }
 0x55a   : > { %v3425_v59 = vpop.eup %3424  ;;  %v1947_v18 = vmul.f32 1.442695, %v1849_v34  ;;  %v1949_v25 = vmul.f32 1.442695, %v1850_v9  ;;  %v2115_v24 = vpack.c.bf16 %v3423_v56, %v3419_v55 }
 0x55b   : > { %v1775_v62 = vpop.xlane.xlu0 %1774  ;;  %v2116_v11 = vpack.c.bf16 %v3425_v59, %v3421_v58  ;;  %v2046_v53 = vadd.f32 %v3425_v59, %v3423_v56 }
 0x55c   : > { %3438 = vpow2.f32 %v1947_v18  ;;  %v1851_v10 = vsub.f32 %v4797_v37, %v1775_v62  ;;  %v1852_v17 = vsub.f32 %v4799_v42, %v1775_v62  ;;  %v3364_v62 = vld [vmem:[%s5131_s7 + $0x18] sm:$0xff]  }
 0x55d   : > { %v3427_v32 = vpop.eup %3426  ;;  %3440 = vpow2.f32 %v1949_v25  ;;  %2215 = vmatprep.mubr.bf16.mxu0 %v2116_v11  ;;  %2047 = vadd.xlane.f32.xlu1 %v2046_v53 }
 0x55e   : > { %v3429_v44 = vpop.eup %3428  ;;  %v1951_v31 = vmul.f32 1.442695, %v1851_v10  ;;  %v1953_v1 = vmul.f32 1.442695, %v1852_v17  ;;  %2216 = vmatmul.mubr.bf16.gmra.mxu0 %v2115_v24  ;;  %3222 = vmatprep.subr.bf16.mxu1 %v3364_v62 }
 0x55f   : > { %v1778_v48 = vpop.xlane.xlu1 %1777  ;;  %v2049_v28 = vadd.f32 %v3429_v44, %v3427_v32  ;;  %3223 = vmatpush3.bf16.msra.mxu1 %v3364_v62 }
 0x560   : > { %3442 = vpow2.f32 %v1951_v31  ;;  %v1853_v5 = vsub.f32 %v4803_v47, %v1778_v48  ;;  %v1854_v6 = vsub.f32 %v4805_v36, %v1778_v48 }
 0x561   : > { %v3431_v37 = vpop.eup %3430  ;;  %3444 = vpow2.f32 %v1953_v1  ;;  %2050 = vadd.xlane.f32.xlu0 %v2049_v28 }
 0x562   : > { %v3433_v42 = vpop.eup %3432  ;;  %v1955_v26 = vmul.f32 1.442695, %v1853_v5  ;;  %v1957_v13 = vmul.f32 1.442695, %v1854_v6  ;;  %v2117_v40 = vpack.c.bf16 %v3431_v37, %v3427_v32 }
 0x563   : > { %v1781_v0 = vpop.xlane.xlu0 %1780  ;;  %v2118_v15 = vpack.c.bf16 %v3433_v42, %v3429_v44  ;;  %v2052_v41 = vadd.f32 %v3433_v42, %v3431_v37  ;;  %v3365_v44 = vld [vmem:[%s5131_s7 + $0x10] sm:$0xff]  }
 0x564   : > { %3446 = vpow2.f32 %v1955_v26  ;;  %v1855_v8 = vsub.f32 %v4809_v57, %v1781_v0  ;;  %v1856_v23 = vsub.f32 %v4811_v20, %v1781_v0  ;;  %3224 = vmatprep.subr.bf16.mxu1 %v3365_v44  ;;  %v5214_v0 = vld [vmem:[#allocation15_spill] sm:$0xff] }
 0x565   : > { %v3435_v14 = vpop.eup %3434  ;;  %3448 = vpow2.f32 %v1957_v13  ;;  %2223 = vmatprep.mubr.bf16.mxu0 %v2118_v15  ;;  %2053 = vadd.xlane.f32.xlu1 %v2052_v41  ;;  %v5215_v41 = vld [vmem:[#allocation16_spill] sm:$0xff] }
 0x566   : > { %v3437_v47 = vpop.eup %3436  ;;  %v1959_v36 = vmul.f32 1.442695, %v1855_v8  ;;  %v1961_v21 = vmul.f32 1.442695, %v1856_v23  ;;  %2224 = vmatmul.mubr.bf16.gmra.mxu0 %v2117_v40  ;;  %3225 = vmatpush3.bf16.msra.mxu1 %v3365_v44  ;;  %v3366_v40 = vld [vmem:[%s5131_s7 + $0x8] sm:$0xff]  }
 0x567   : > { %v1784_v12 = vpop.xlane.xlu1 %1783  ;;  %v2055_v52 = vadd.f32 %v3437_v47, %v3435_v14  ;;  %3226 = vmatprep.subr.bf16.mxu1 %v3366_v40 }
 0x568   : > { %3450 = vpow2.f32 %v1959_v36  ;;  %v1857_v29 = vsub.f32 %v4815_v43, %v1784_v12  ;;  %v1858_v61 = vsub.f32 %v4817_v2, %v1784_v12 }
 0x569   : > { %v3439_v54 = vpop.eup %3438  ;;  %3452 = vpow2.f32 %v1961_v21  ;;  %2056 = vadd.xlane.f32.xlu0 %v2055_v52  ;;  %v5216_v52 = vld [vmem:[#allocation17_spill] sm:$0xff] }
 0x56a   : > { %v3441_v57 = vpop.eup %3440  ;;  %v1963_v20 = vmul.f32 1.442695, %v1857_v29  ;;  %v1965_v46 = vmul.f32 1.442695, %v1858_v61  ;;  %v2119_v16 = vpack.c.bf16 %v3439_v54, %v3435_v14  ;;  %3227 = vmatpush3.bf16.msra.mxu1 %v3366_v40  ;;  %v5217_v61 = vld [vmem:[#allocation18_spill] sm:$0xff] }
 0x56b   : > { %v1787_v19 = vpop.xlane.xlu0 %1786  ;;  %v2120_v45 = vpack.c.bf16 %v3441_v57, %v3437_v47  ;;  %v2058_v39 = vadd.f32 %v3441_v57, %v3439_v54 }
 0x56c   : > { %3454 = vpow2.f32 %v1963_v20  ;;  %v1859_v60 = vsub.f32 %v4821_v33, %v1787_v19  ;;  %v1860_v43 = vsub.f32 %v4823_v4, %v1787_v19  ;;  %v3367_v20 = vld [vmem:[%s5131_s7] sm:$0xff]  }
 0x56d   : > { %v3443_v2 = vpop.eup %3442  ;;  %3456 = vpow2.f32 %v1965_v46  ;;  %2231 = vmatprep.mubr.bf16.mxu0 %v2120_v45  ;;  %2059 = vadd.xlane.f32.xlu1 %v2058_v39 }
 0x56e   : > { %v3445_v55 = vpop.eup %3444  ;;  %v1967_v58 = vmul.f32 1.442695, %v1859_v60  ;;  %v1969_v7 = vmul.f32 1.442695, %v1860_v43  ;;  %2232 = vmatmul.mubr.bf16.gmra.mxu0 %v2119_v16  ;;  %3228 = vmatprep.subr.bf16.mxu1 %v3367_v20  ;;  %v5218_v43 = vld [vmem:[#allocation19_spill] sm:$0xff] }
 0x56f   : > { %v1790_v3 = vpop.xlane.xlu1 %1789  ;;  %v2061_v38 = vadd.f32 %v3445_v55, %v3443_v2  ;;  %3229 = vmatpush3.bf16.msra.mxu1 %v3367_v20 }
 0x570   : > { %3458 = vpow2.f32 %v1967_v58  ;;  %v1861_v63 = vsub.f32 %v4827_v30, %v1790_v3  ;;  %v1862_v34 = vsub.f32 %v4829_v50, %v1790_v3 }
 0x571   : > { %v3447_v33 = vpop.eup %3446  ;;  %3460 = vpow2.f32 %v1969_v7  ;;  %2062 = vadd.xlane.f32.xlu0 %v2061_v38 }
 0x572   : > { %v3449_v4 = vpop.eup %3448  ;;  %v1971_v9 = vmul.f32 1.442695, %v1861_v63  ;;  %v1973_v56 = vmul.f32 1.442695, %v1862_v34  ;;  %v2121_v59 = vpack.c.bf16 %v3447_v33, %v3443_v2 }
 0x573   : > { %v1793_v18 = vpop.xlane.xlu0 %1792  ;;  %v2122_v25 = vpack.c.bf16 %v3449_v4, %v3445_v55  ;;  %v2064_v24 = vadd.f32 %v3449_v4, %v3447_v33  ;;  %v5219_v55 = vld [vmem:[#allocation20_spill] sm:$0xff]  ;;  %v5220_v4 = vld [vmem:[#allocation21_spill] sm:$0xff] }
 0x574   : > { %3462 = vpow2.f32 %v1971_v9  ;;  %v1863_v11 = vsub.f32 %v4833_v22, %v1793_v18  ;;  %v1864_v30 = vsub.f32 %v4835_v27, %v1793_v18  ;;  %v5212_v22 = vld [vmem:[#allocation13_spill] sm:$0xff]  ;;  %v5213_v27 = vld [vmem:[#allocation14_spill] sm:$0xff] }
 0x575   : > { %v3451_v50 = vpop.eup %3450  ;;  %3464 = vpow2.f32 %v1973_v56  ;;  %2239 = vmatprep.mubr.bf16.mxu0 %v2122_v25  ;;  %2065 = vadd.xlane.f32.xlu1 %v2064_v24  ;;  %v5221_v56 = vld [vmem:[#allocation22_spill] sm:$0xff] }
 0x576   : > { %v3453_v53 = vpop.eup %3452  ;;  %v1975_v51 = vmul.f32 1.442695, %v1863_v11  ;;  %v1977_v10 = vmul.f32 1.442695, %v1864_v30  ;;  %2240 = vmatmul.mubr.bf16.gmra.mxu0 %v2121_v59 }
 0x577   : > { %v1796_v17 = vpop.xlane.xlu1 %1795  ;;  %v2067_v32 = vadd.f32 %v3453_v53, %v3451_v50 }
 0x578   : > { %3466 = vpow2.f32 %v1975_v51  ;;  %v1865_v31 = vsub.f32 %v5212_v22, %v1796_v17  ;;  %v1866_v1 = vsub.f32 %v5213_v27, %v1796_v17  ;;  %v5222_v51 = vld [vmem:[#allocation23_spill] sm:$0xff]  ;;  %v5223_v17 = vld [vmem:[#allocation24_spill] sm:$0xff] }
 0x579   : > { %v3455_v48 = vpop.eup %3454  ;;  %3468 = vpow2.f32 %v1977_v10  ;;  %2068 = vadd.xlane.f32.xlu0 %v2067_v32 }
 0x57a   : > { %v3457_v28 = vpop.eup %3456  ;;  %v1979_v5 = vmul.f32 1.442695, %v1865_v31  ;;  %v1981_v6 = vmul.f32 1.442695, %v1866_v1  ;;  %v2123_v37 = vpack.c.bf16 %v3455_v48, %v3451_v50 }
 0x57b   : > { %v1799_v42 = vpop.xlane.xlu0 %1798  ;;  %v2124_v26 = vpack.c.bf16 %v3457_v28, %v3453_v53  ;;  %v2070_v13 = vadd.f32 %v3457_v28, %v3455_v48 }
 0x57c   : > { %3470 = vpow2.f32 %v1979_v5  ;;  %v1867_v15 = vsub.f32 %v5214_v0, %v1799_v42  ;;  %v1868_v8 = vsub.f32 %v5215_v41, %v1799_v42  ;;  %v5224_v5 = vld [vmem:[#allocation25_spill] sm:$0xff] }
 0x57d   : > { %v3459_v23 = vpop.eup %3458  ;;  %3472 = vpow2.f32 %v1981_v6  ;;  %2247 = vmatprep.mubr.bf16.mxu0 %v2124_v26  ;;  %2071 = vadd.xlane.f32.xlu1 %v2070_v13 }
 0x57e   : > { %v3461_v14 = vpop.eup %3460  ;;  %v1983_v47 = vmul.f32 1.442695, %v1867_v15  ;;  %v1985_v36 = vmul.f32 1.442695, %v1868_v8  ;;  %2248 = vmatmul.mubr.bf16.gmra.mxu0 %v2123_v37 }
 0x57f   : > { %v1802_v21 = vpop.xlane.xlu1 %1801  ;;  %v2073_v12 = vadd.f32 %v3461_v14, %v3459_v23 }
 0x580   : > { %3474 = vpow2.f32 %v1983_v47  ;;  %v1869_v29 = vsub.f32 %v5216_v52, %v1802_v21  ;;  %v1870_v54 = vsub.f32 %v5217_v61, %v1802_v21 }
 0x581   : > { %v3463_v57 = vpop.eup %3462  ;;  %3476 = vpow2.f32 %v1985_v36  ;;  %2074 = vadd.xlane.f32.xlu0 %v2073_v12 }
 0x582   : > { %v3465_v46 = vpop.eup %3464  ;;  %v1987_v16 = vmul.f32 1.442695, %v1869_v29  ;;  %v1989_v19 = vmul.f32 1.442695, %v1870_v54  ;;  %v2125_v45 = vpack.c.bf16 %v3463_v57, %v3459_v23 }
 0x583   : > { %v1805_v39 = vpop.xlane.xlu0 %1804  ;;  %v2126_v35 = vpack.c.bf16 %v3465_v46, %v3461_v14  ;;  %v2076_v60 = vadd.f32 %v3465_v46, %v3463_v57 }
 0x584   : > { %3478 = vpow2.f32 %v1987_v16  ;;  %v1871_v2 = vsub.f32 %v5218_v43, %v1805_v39  ;;  %v1872_v58 = vsub.f32 %v5219_v55, %v1805_v39 }
 0x585   : > { %v3467_v7 = vpop.eup %3466  ;;  %3480 = vpow2.f32 %v1989_v19  ;;  %2255 = vmatprep.mubr.bf16.mxu0 %v2126_v35  ;;  %2077 = vadd.xlane.f32.xlu1 %v2076_v60 }
 0x586   : > { %v3469_v3 = vpop.eup %3468  ;;  %v1991_v38 = vmul.f32 1.442695, %v1871_v2  ;;  %v1993_v63 = vmul.f32 1.442695, %v1872_v58  ;;  %2256 = vmatmul.mubr.bf16.gmra.mxu0 %v2125_v45 }
 0x587   : > { %v1808_v34 = vpop.xlane.xlu1 %1807  ;;  %v2079_v33 = vadd.f32 %v3469_v3, %v3467_v7 }
 0x588   : > { %3482 = vpow2.f32 %v1991_v38  ;;  %v1873_v9 = vsub.f32 %v5220_v4, %v1808_v34  ;;  %v1874_v59 = vsub.f32 %v5221_v56, %v1808_v34 }
 0x589   : > { %v3471_v18 = vpop.eup %3470  ;;  %3484 = vpow2.f32 %v1993_v63  ;;  %2080 = vadd.xlane.f32.xlu0 %v2079_v33 }
 0x58a   : > { %v3473_v25 = vpop.eup %3472  ;;  %v1995_v24 = vmul.f32 1.442695, %v1873_v9  ;;  %v1997_v62 = vmul.f32 1.442695, %v1874_v59  ;;  %v2127_v11 = vpack.c.bf16 %v3471_v18, %v3467_v7 }
 0x58b   : > { %v1811_v30 = vpop.xlane.xlu0 %1810  ;;  %v2128_v50 = vpack.c.bf16 %v3473_v25, %v3469_v3  ;;  %v2082_v53 = vadd.f32 %v3473_v25, %v3471_v18 }
 0x58c   : > { %3486 = vpow2.f32 %v1995_v24  ;;  %v1875_v10 = vsub.f32 %v5222_v51, %v1811_v30  ;;  %v1876_v32 = vsub.f32 %v5223_v17, %v1811_v30 }
 0x58d   : > { %v3475_v44 = vpop.eup %3474  ;;  %3488 = vpow2.f32 %v1997_v62  ;;  %2263 = vmatprep.mubr.bf16.mxu0 %v2128_v50  ;;  %2083 = vadd.xlane.f32.xlu1 %v2082_v53 }
 0x58e   : > { %v3477_v22 = vpop.eup %3476  ;;  %v1999_v31 = vmul.f32 1.442695, %v1875_v10  ;;  %v2001_v27 = vmul.f32 1.442695, %v1876_v32  ;;  %2264 = vmatmul.mubr.bf16.gmra.mxu0 %v2127_v11 }
 0x58f   : > { %v1814_v1 = vpop.xlane.xlu1 %1813  ;;  %v2085_v48 = vadd.f32 %v3477_v22, %v3475_v44 }
 0x590   : > { %3490 = vpow2.f32 %v1999_v31  ;;  %v1877_v28 = vsub.f32 %v4875_v49, %v1814_v1  ;;  %v1878_v6 = vsub.f32 %v5224_v5, %v1814_v1 }
 0x591   : > { %v3479_v37 = vpop.eup %3478  ;;  %3492 = vpow2.f32 %v2001_v27  ;;  %2086 = vadd.xlane.f32.xlu0 %v2085_v48 }
 0x592   : > { %v3481_v42 = vpop.eup %3480  ;;  %v2003_v26 = vmul.f32 1.442695, %v1877_v28  ;;  %v2005_v13 = vmul.f32 1.442695, %v1878_v6  ;;  %v2129_v40 = vpack.c.bf16 %v3479_v37, %v3475_v44 }
 0x593   : > { %v2130_v0 = vpack.c.bf16 %v3481_v42, %v3477_v22  ;;  %v2088_v15 = vadd.f32 %v3481_v42, %v3479_v37 }
 0x594   : > { %3494 = vpow2.f32 %v2003_v26 }
 0x595   : > { %v3483_v41 = vpop.eup %3482  ;;  %3496 = vpow2.f32 %v2005_v13  ;;  %2271 = vmatprep.mubr.bf16.mxu0 %v2130_v0  ;;  %2089 = vadd.xlane.f32.xlu1 %v2088_v15 }
 0x596   : > { %v3485_v8 = vpop.eup %3484  ;;  %2272 = vmatmul.mubr.bf16.gmra.mxu0 %v2129_v40 }
 0x597   : > { %v2091_v23 = vadd.f32 %v3485_v8, %v3483_v41 }
 0x599   : > { %v3487_v49 = vpop.eup %3486  ;;  %2092 = vadd.xlane.f32.xlu0 %v2091_v23 }
 0x59a   : > { %v3489_v14 = vpop.eup %3488  ;;  %v2131_v47 = vpack.c.bf16 %v3487_v49, %v3483_v41 }
 0x59b   : > { %v2132_v36 = vpack.c.bf16 %v3489_v14, %v3485_v8  ;;  %v2094_v21 = vadd.f32 %v3489_v14, %v3487_v49 }
 0x59d   : > { %v3491_v12 = vpop.eup %3490  ;;  %2279 = vmatprep.mubr.bf16.mxu0 %v2132_v36  ;;  %2095 = vadd.xlane.f32.xlu1 %v2094_v21 }
 0x59e   : > { %v3493_v52 = vpop.eup %3492  ;;  %2280 = vmatmul.mubr.bf16.gmra.mxu0 %v2131_v47 }
 0x59f   : > { %v2097_v29 = vadd.f32 %v3493_v52, %v3491_v12 }
 0x5a1   : > { %v3495_v61 = vpop.eup %3494  ;;  %2098 = vadd.xlane.f32.xlu0 %v2097_v29 }
 0x5a2   : > { %v3497_v54 = vpop.eup %3496  ;;  %v2133_v57 = vpack.c.bf16 %v3495_v61, %v3491_v12 }
 0x5a3   : > { %v2134_v20 = vpack.c.bf16 %v3497_v54, %v3493_v52  ;;  %v2100_v46 = vadd.f32 %v3497_v54, %v3495_v61 }
 0x5a5   : > { %2287 = vmatprep.mubr.bf16.mxu0 %v2134_v20  ;;  %2101 = vadd.xlane.f32.xlu1 %v2100_v46 }
 0x5a6   : > { %2288 = vmatmul.mubr.bf16.gmra.mxu0 %v2133_v57 }
 0x5b2   : > { %v2009_v16 = vpop.xlane.xlu0 %2008 }
 0x5b3   : > { %3498 = vrcp.f32 %v2009_v16 }
 0x5b6   : > { %v2012_v19 = vpop.xlane.xlu1 %2011 }
 0x5b7   : > { %3500 = vrcp.f32 %v2012_v19 }
 0x5ba   : > { %v2015_v45 = vpop.xlane.xlu0 %2014 }
 0x5bb   : > { %3502 = vrcp.f32 %v2015_v45 }
 0x5be   : > { %v2018_v39 = vpop.xlane.xlu1 %2017 }
 0x5bf   : > { %3504 = vrcp.f32 %v2018_v39 }
 0x5c0   : > { %v3499_v58 = vpop.eup %3498 }
 0x5c2   : > { %v2021_v7 = vpop.xlane.xlu0 %2020 }
 0x5c3   : > { %3506 = vrcp.f32 %v2021_v7 }
 0x5c4   : > { %v3501_v38 = vpop.eup %3500 }
 0x5c6   : > { %v2024_v63 = vpop.xlane.xlu1 %2023 }
 0x5c7   : > { %3508 = vrcp.f32 %v2024_v63 }
 0x5c8   : > { %v3503_v24 = vpop.eup %3502 }
 0x5ca   : > { %v2027_v62 = vpop.xlane.xlu0 %2026 }
 0x5cb   : > { %3510 = vrcp.f32 %v2027_v62 }
 0x5cc   : > { %v3505_v30 = vpop.eup %3504 }
 0x5ce   : > { %v2030_v50 = vpop.xlane.xlu1 %2029 }
 0x5cf   : > { %3512 = vrcp.f32 %v2030_v50 }
 0x5d0   : > { %v3507_v27 = vpop.eup %3506 }
 0x5d2   : > { %v2033_v1 = vpop.xlane.xlu0 %2032 }
 0x5d3   : > { %3514 = vrcp.f32 %v2033_v1 }
 0x5d4   : > { %v3509_v28 = vpop.eup %3508 }
 0x5d6   : > { %v2036_v5 = vpop.xlane.xlu1 %2035 }
 0x5d7   : > { %3516 = vrcp.f32 %v2036_v5 }
 0x5d8   : > { %v3511_v41 = vpop.eup %3510 }
 0x5da   : > { %v2039_v8 = vpop.xlane.xlu0 %2038 }
 0x5db   : > { %3518 = vrcp.f32 %v2039_v8 }
 0x5dc   : > { %v3513_v49 = vpop.eup %3512 }
 0x5de   : > { %v2042_v14 = vpop.xlane.xlu1 %2041 }
 0x5df   : > { %3520 = vrcp.f32 %v2042_v14 }
 0x5e0   : > { %v3515_v57 = vpop.eup %3514 }
 0x5e2   : > { %v2045_v20 = vpop.xlane.xlu0 %2044 }
 0x5e3   : > { %3522 = vrcp.f32 %v2045_v20 }
 0x5e4   : > { %v3517_v16 = vpop.eup %3516 }
 0x5e6   : > { %v2048_v19 = vpop.xlane.xlu1 %2047 }
 0x5e7   : > { %3524 = vrcp.f32 %v2048_v19 }
 0x5e8   : > { %v3519_v7 = vpop.eup %3518 }
 0x5ec   : > { %v3521_v63 = vpop.eup %3520 }
 0x5ee   : > { %v2954_v35 = vpop.f32.mrf.mxu0 }
 0x5f0   : > { %v2955_v60 = vpop.f32.mrf.mxu0  ;;  %v3523_v62 = vpop.eup %3522 }
 0x5f1   : > { %v2956_v2 = vadd.f32 %v2955_v60, %v2954_v35 }
 0x5f2   : > { %v2957_v43 = vpop.f32.mrf.mxu0 }
 0x5f3   : > { %v2297_v33 = vmul.f32 %v3499_v58, %v2956_v2 }
 0x5f4   : > { %v2958_v55 = vpop.f32.mrf.mxu0  ;;  %v3525_v50 = vpop.eup %3524 }
 0x5f5   : > { %v2959_v3 = vadd.f32 %v2958_v55, %v2957_v43 }
 0x5f6   : > { %v2960_v34 = vpop.f32.mrf.mxu0 }
 0x5f7   : > { %v2299_v4 = vmul.f32 %v3501_v38, %v2959_v3  ;;  %v2051_v3 = vpop.xlane.xlu0 %2050 }
 0x5f8   : > { %v2961_v9 = vpop.f32.mrf.mxu0  ;;  %3526 = vrcp.f32 %v2051_v3 }
 0x5f9   : > { %v2360_v56 = vpack.c.bf16 %v2299_v4, %v2297_v33  ;;  %v2962_v18 = vadd.f32 %v2961_v9, %v2960_v34  ;;  %v2054_v34 = vpop.xlane.xlu1 %2053 }
 0x5fa   : > { %v2963_v59 = vpop.f32.mrf.mxu0  ;;  %3528 = vrcp.f32 %v2054_v34 }
 0x5fb   : > { %3230 = vmatprep.mubr.bf16.mxu1 %v2360_v56  ;;  %v2301_v51 = vmul.f32 %v3503_v24, %v2962_v18 }
 0x5fc   : > { %v2964_v25 = vpop.f32.mrf.mxu0 }
 0x5fd   : > { %v2965_v11 = vadd.f32 %v2964_v25, %v2963_v59 }
 0x5fe   : > { %v2966_v53 = vpop.f32.mrf.mxu0 }
 0x5ff   : > { %v2303_v10 = vmul.f32 %v3505_v30, %v2965_v11  ;;  %v2057_v11 = vpop.xlane.xlu0 %2056 }
 0x600   : > { %v2967_v17 = vpop.f32.mrf.mxu0  ;;  %3530 = vrcp.f32 %v2057_v11 }
 0x601   : > { %v2361_v32 = vpack.c.bf16 %v2303_v10, %v2301_v51  ;;  %v2968_v22 = vadd.f32 %v2967_v17, %v2966_v53  ;;  %v2060_v53 = vpop.xlane.xlu1 %2059 }
 0x602   : > { %v2969_v44 = vpop.f32.mrf.mxu0  ;;  %3532 = vrcp.f32 %v2060_v53 }
 0x603   : > { %3231 = vmatmul.mubr.bf16.vlgmr.msra.gmra.mxu1 %v2361_v32  ;;  %v2305_v37 = vmul.f32 %v3507_v27, %v2968_v22 }
 0x604   : > { %v2970_v31 = vpop.f32.mrf.mxu0 }
 0x605   : > { %v2971_v48 = vadd.f32 %v2970_v31, %v2969_v44  ;;  %v3527_v1 = vpop.eup %3526 }
 0x606   : > { %v2972_v6 = vpop.f32.mrf.mxu0 }
 0x607   : > { %v2307_v42 = vmul.f32 %v3509_v28, %v2971_v48  ;;  %v2063_v48 = vpop.xlane.xlu0 %2062  ;;  %v3529_v5 = vpop.eup %3528 }
 0x608   : > { %v2973_v26 = vpop.f32.mrf.mxu0  ;;  %3534 = vrcp.f32 %v2063_v48 }
 0x609   : > { %v2362_v13 = vpack.c.bf16 %v2307_v42, %v2305_v37  ;;  %v2974_v0 = vadd.f32 %v2973_v26, %v2972_v6  ;;  %v2066_v6 = vpop.xlane.xlu1 %2065 }
 0x60a   : > { %v2975_v40 = vpop.f32.mrf.mxu0  ;;  %3536 = vrcp.f32 %v2066_v6 }
 0x60b   : > { %3234 = vmatprep.mubr.bf16.mxu1 %v2362_v13  ;;  %v2309_v36 = vmul.f32 %v3511_v41, %v2974_v0 }
 0x60c   : > { %v2976_v15 = vpop.f32.mrf.mxu0 }
 0x60d   : > { %v2977_v23 = vadd.f32 %v2976_v15, %v2975_v40  ;;  %v3531_v8 = vpop.eup %3530 }
 0x60e   : > { %v2978_v47 = vpop.f32.mrf.mxu0 }
 0x60f   : > { %v2311_v21 = vmul.f32 %v3513_v49, %v2977_v23  ;;  %v2069_v23 = vpop.xlane.xlu0 %2068  ;;  %v3533_v14 = vpop.eup %3532 }
 0x610   : > { %v2979_v12 = vpop.f32.mrf.mxu0  ;;  %3538 = vrcp.f32 %v2069_v23 }
 0x611   : > { %v2363_v52 = vpack.c.bf16 %v2311_v21, %v2309_v36  ;;  %v2980_v61 = vadd.f32 %v2979_v12, %v2978_v47  ;;  %v2072_v47 = vpop.xlane.xlu1 %2071 }
 0x612   : > { %v2981_v29 = vpop.f32.mrf.mxu0  ;;  %3540 = vrcp.f32 %v2072_v47 }
 0x613   : > { %3235 = vmatmul.mubr.bf16.gmra.mxu1 %v2363_v52  ;;  %v2313_v39 = vmul.f32 %v3515_v57, %v2980_v61 }
 0x614   : > { %v2982_v54 = vpop.f32.mrf.mxu0 }
 0x615   : > { %v2983_v46 = vadd.f32 %v2982_v54, %v2981_v29  ;;  %v3535_v20 = vpop.eup %3534 }
 0x616   : > { %v2984_v45 = vpop.f32.mrf.mxu0 }
 0x617   : > { %v2315_v35 = vmul.f32 %v3517_v16, %v2983_v46  ;;  %v2075_v46 = vpop.xlane.xlu0 %2074  ;;  %v3537_v19 = vpop.eup %3536 }
 0x618   : > { %v2985_v60 = vpop.f32.mrf.mxu0  ;;  %3542 = vrcp.f32 %v2075_v46 }
 0x619   : > { %v2364_v43 = vpack.c.bf16 %v2315_v35, %v2313_v39  ;;  %v2986_v55 = vadd.f32 %v2985_v60, %v2984_v45  ;;  %v2078_v45 = vpop.xlane.xlu1 %2077 }
 0x61a   : > { %v2987_v2 = vpop.f32.mrf.mxu0  ;;  %3544 = vrcp.f32 %v2078_v45 }
 0x61b   : > { %3238 = vmatprep.mubr.bf16.mxu1 %v2364_v43  ;;  %v2317_v4 = vmul.f32 %v3519_v7, %v2986_v55 }
 0x61c   : > { %v2988_v58 = vpop.f32.mrf.mxu0 }
 0x61d   : > { %v2989_v38 = vadd.f32 %v2988_v58, %v2987_v2  ;;  %v3539_v3 = vpop.eup %3538 }
 0x61e   : > { %v2990_v33 = vpop.f32.mrf.mxu0 }
 0x61f   : > { %v2319_v9 = vmul.f32 %v3521_v63, %v2989_v38  ;;  %v2081_v38 = vpop.xlane.xlu0 %2080  ;;  %v3541_v34 = vpop.eup %3540 }
 0x620   : > { %v2991_v56 = vpop.f32.mrf.mxu0  ;;  %3546 = vrcp.f32 %v2081_v38 }
 0x621   : > { %v2365_v59 = vpack.c.bf16 %v2319_v9, %v2317_v4  ;;  %v2992_v25 = vadd.f32 %v2991_v56, %v2990_v33  ;;  %v2084_v33 = vpop.xlane.xlu1 %2083 }
 0x622   : > { %v2993_v18 = vpop.f32.mrf.mxu0  ;;  %3548 = vrcp.f32 %v2084_v33 }
 0x623   : > { %3239 = vmatmul.mubr.bf16.gmra.mxu1 %v2365_v59  ;;  %v2321_v10 = vmul.f32 %v3523_v62, %v2992_v25 }
 0x624   : > { %v2994_v24 = vpop.f32.mrf.mxu0 }
 0x625   : > { %v2995_v30 = vadd.f32 %v2994_v24, %v2993_v18  ;;  %v3543_v11 = vpop.eup %3542 }
 0x626   : > { %v2996_v51 = vpop.f32.mrf.mxu0 }
 0x627   : > { %v2323_v17 = vmul.f32 %v3525_v50, %v2995_v30  ;;  %v2087_v30 = vpop.xlane.xlu0 %2086  ;;  %v3545_v53 = vpop.eup %3544 }
 0x628   : > { %v2997_v32 = vpop.f32.mrf.mxu0  ;;  %3550 = vrcp.f32 %v2087_v30 }
 0x629   : > { %v2366_v44 = vpack.c.bf16 %v2323_v17, %v2321_v10  ;;  %v2998_v31 = vadd.f32 %v2997_v32, %v2996_v51  ;;  %v2090_v51 = vpop.xlane.xlu1 %2089 }
 0x62a   : > { %v2999_v22 = vpop.f32.mrf.mxu0  ;;  %3552 = vrcp.f32 %v2090_v51  ;;  %v3564_v51 = vld [vmem:[%s3902_s20 + $0x18] sm:$0xff] }
 0x62b   : > { %3242 = vmatprep.mubr.bf16.mxu1 %v2366_v44  ;;  %v2325_v42 = vmul.f32 %v3527_v1, %v2998_v31 }
 0x62c   : > { %v3000_v27 = vpop.f32.mrf.mxu0 }
 0x62d   : > { %v3001_v28 = vadd.f32 %v3000_v27, %v2999_v22  ;;  %v3547_v48 = vpop.eup %3546 }
 0x62e   : > { %v3002_v37 = vpop.f32.mrf.mxu0 }
 0x62f   : > { %v2327_v26 = vmul.f32 %v3529_v5, %v3001_v28  ;;  %v2093_v28 = vpop.xlane.xlu0 %2092  ;;  %v3549_v6 = vpop.eup %3548 }
 0x630   : > { %v3003_v13 = vpop.f32.mrf.mxu0  ;;  %3554 = vrcp.f32 %v2093_v28 }
 0x631   : > { %v2367_v40 = vpack.c.bf16 %v2327_v26, %v2325_v42  ;;  %v3004_v15 = vadd.f32 %v3003_v13, %v3002_v37  ;;  %v2096_v37 = vpop.xlane.xlu1 %2095 }
 0x632   : > { %v3005_v0 = vpop.f32.mrf.mxu0  ;;  %3556 = vrcp.f32 %v2096_v37 }
 0x633   : > { %3243 = vmatmul.mubr.bf16.gmra.mxu1 %v2367_v40  ;;  %v2329_v21 = vmul.f32 %v3531_v8, %v3004_v15 }
 0x634   : > { %v3006_v41 = vpop.f32.mrf.mxu0 }
 0x635   : > { %v3007_v49 = vadd.f32 %v3006_v41, %v3005_v0  ;;  %v3551_v23 = vpop.eup %3550 }
 0x636   : > { %v3008_v36 = vpop.f32.mrf.mxu0 }
 0x637   : > { %v2331_v12 = vmul.f32 %v3533_v14, %v3007_v49  ;;  %v2099_v49 = vpop.xlane.xlu0 %2098  ;;  %v3553_v47 = vpop.eup %3552 }
 0x638   : > { %v3009_v52 = vpop.f32.mrf.mxu0  ;;  %3558 = vrcp.f32 %v2099_v49 }
 0x639   : > { %v2368_v29 = vpack.c.bf16 %v2331_v12, %v2329_v21  ;;  %v3010_v54 = vadd.f32 %v3009_v52, %v3008_v36  ;;  %v2102_v36 = vpop.xlane.xlu1 %2101 }
 0x63a   : > { %v3011_v61 = vpop.f32.mrf.mxu0  ;;  %3560 = vrcp.f32 %v2102_v36 }
 0x63b   : > { %3246 = vmatprep.mubr.bf16.mxu1 %v2368_v29  ;;  %v2333_v35 = vmul.f32 %v3535_v20, %v3010_v54 }
 0x63c   : > { %v3012_v57 = vpop.f32.mrf.mxu0 }
 0x63d   : > { %v3013_v16 = vadd.f32 %v3012_v57, %v3011_v61  ;;  %v3555_v46 = vpop.eup %3554 }
 0x63e   : > { %v3014_v39 = vpop.f32.mrf.mxu0 }
 0x63f   : > { %v2335_v60 = vmul.f32 %v3537_v19, %v3013_v16  ;;  %v3557_v19 = vpop.eup %3556 }
 0x640   : > { %v3015_v43 = vpop.f32.mrf.mxu0 }
 0x641   : > { %v2369_v2 = vpack.c.bf16 %v2335_v60, %v2333_v35  ;;  %v3016_v58 = vadd.f32 %v3015_v43, %v3014_v39 }
 0x642   : > { %v3017_v55 = vpop.f32.mrf.mxu0 }
 0x643   : > { %3247 = vmatmul.mubr.bf16.gmra.mxu1 %v2369_v2  ;;  %v2337_v9 = vmul.f32 %v3539_v3, %v3016_v58 }
 0x644   : > { %v3018_v7 = vpop.f32.mrf.mxu0 }
 0x645   : > { %v3019_v63 = vadd.f32 %v3018_v7, %v3017_v55  ;;  %v3559_v7 = vpop.eup %3558 }
 0x646   : > { %v3020_v4 = vpop.f32.mrf.mxu0 }
 0x647   : > { %v2339_v56 = vmul.f32 %v3541_v34, %v3019_v63  ;;  %v3561_v38 = vpop.eup %3560 }
 0x648   : > { %v3021_v59 = vpop.f32.mrf.mxu0 }
 0x649   : > { %v2370_v18 = vpack.c.bf16 %v2339_v56, %v2337_v9  ;;  %v3022_v24 = vadd.f32 %v3021_v59, %v3020_v4  ;;  %v4972_v4 = vld [vmem:[%s5132_s8] ss:$0 sm:$0xff] }
 0x64a   : > { %v3023_v25 = vpop.f32.mrf.mxu0 }
 0x64b   : > { %3250 = vmatprep.mubr.bf16.mxu1 %v2370_v18  ;;  %v2341_v17 = vmul.f32 %v3543_v11, %v3022_v24  ;;  %v3562_v18 = vld [vmem:[%s3902_s20 + $0x10] sm:$0xff]  ;;  %v3563_v11 = vld [vmem:[%s3902_s20] sm:$0xff] }
 0x64c   : > { %v3024_v62 = vpop.f32.mrf.mxu0 }
 0x64d   : > { %v3025_v50 = vadd.f32 %v3024_v62, %v3023_v25 }
 0x64e   : > { %v3026_v10 = vpop.f32.mrf.mxu0 }
 0x64f   : > { %v2343_v32 = vmul.f32 %v3545_v53, %v3025_v50 }
 0x650   : > { %v3027_v44 = vpop.f32.mrf.mxu0 }
 0x651   : > { %v2371_v22 = vpack.c.bf16 %v2343_v32, %v2341_v17  ;;  %v3028_v27 = vadd.f32 %v3027_v44, %v3026_v10  ;;  %v3565_v32 = vld [vmem:[%s3902_s20 + $0x8] sm:$0xff] }
 0x652   : > { %v3029_v31 = vpop.f32.mrf.mxu0 }
 0x653   : > { %3251 = vmatmul.mubr.bf16.gmra.mxu1 %v2371_v22  ;;  %v2345_v26 = vmul.f32 %v3547_v48, %v3028_v27 }
 0x654   : > { %v3030_v1 = vpop.f32.mrf.mxu0 }
 0x655   : > { %v3031_v5 = vadd.f32 %v3030_v1, %v3029_v31  ;;  %v3566_v1 = vld [vmem:[%s3902_s20 + $0x30] sm:$0xff] }
 0x656   : > { %v3032_v42 = vpop.f32.mrf.mxu0 }
 0x657   : > { %v2347_v13 = vmul.f32 %v3549_v6, %v3031_v5  ;;  %v3567_v6 = vld [vmem:[%s3902_s20 + $0x20] sm:$0xff] }
 0x658   : > { %v3033_v40 = vpop.f32.mrf.mxu0 }
 0x659   : > { %v2372_v0 = vpack.c.bf16 %v2347_v13, %v2345_v26  ;;  %v3034_v41 = vadd.f32 %v3033_v40, %v3032_v42  ;;  %v3568_v13 = vld [vmem:[%s3902_s20 + $0x38] sm:$0xff] }
 0x65a   : > { %v3035_v15 = vpop.f32.mrf.mxu0 }
 0x65b   : > { %3254 = vmatprep.mubr.bf16.mxu1 %v2372_v0  ;;  %v2349_v12 = vmul.f32 %v3551_v23, %v3034_v41 }
 0x65c   : > { %v3036_v8 = vpop.f32.mrf.mxu0 }
 0x65d   : > { %v3037_v14 = vadd.f32 %v3036_v8, %v3035_v15  ;;  %v3569_v15 = vld [vmem:[%s3902_s20 + $0x28] sm:$0xff] }
 0x65e   : > { %v3038_v21 = vpop.f32.mrf.mxu0 }
 0x65f   : > { %v2351_v52 = vmul.f32 %v3553_v47, %v3037_v14  ;;  %v3570_v14 = vld [vmem:[%s3902_s20 + $0x50] sm:$0xff] }
 0x660   : > { %v3039_v29 = vpop.f32.mrf.mxu0 }
 0x661   : > { %v2373_v61 = vpack.c.bf16 %v2351_v52, %v2349_v12  ;;  %v3040_v57 = vadd.f32 %v3039_v29, %v3038_v21  ;;  %v3571_v12 = vld [vmem:[%s3902_s20 + $0x40] sm:$0xff] }
 0x662   : > { %v3041_v54 = vpop.f32.mrf.mxu0 }
 0x663   : > { %3255 = vmatmul.mubr.bf16.gmra.mxu1 %v2373_v61  ;;  %v2353_v39 = vmul.f32 %v3555_v46, %v3040_v57  ;;  %v3573_v46 = vld [vmem:[%s3902_s20 + $0x48] sm:$0xff] }
 0x664   : > { %v3042_v20 = vpop.f32.mrf.mxu0 }
 0x665   : > { %v3043_v16 = vadd.f32 %v3042_v20, %v3041_v54  ;;  %v3572_v54 = vld [vmem:[%s3902_s20 + $0x58] sm:$0xff] }
 0x666   : > { %v3044_v45 = vpop.f32.mrf.mxu0 }
 0x667   : > { %v2355_v35 = vmul.f32 %v3557_v19, %v3043_v16 }
 0x668   : > { %v3045_v60 = vpop.f32.mrf.mxu0 }
 0x669   : > { %v2374_v43 = vpack.c.bf16 %v2355_v35, %v2353_v39  ;;  %v3046_v55 = vadd.f32 %v3045_v60, %v3044_v45  ;;  %v3574_v35 = vld [vmem:[%s3902_s20 + $0x70] sm:$0xff] }
 0x66a   : > { %v3047_v2 = vpop.f32.mrf.mxu0 }
 0x66b   : > { %3258 = vmatprep.mubr.bf16.mxu1 %v2374_v43  ;;  %v2357_v63 = vmul.f32 %v3559_v7, %v3046_v55  ;;  %v3575_v55 = vld [vmem:[%s3902_s20 + $0x60] sm:$0xff] }
 0x66c   : > { %v3048_v58 = vpop.f32.mrf.mxu0 }
 0x66d   : > { %v3049_v3 = vadd.f32 %v3048_v58, %v3047_v2 }
 0x66f   : > { %v2359_v34 = vmul.f32 %v3561_v38, %v3049_v3  ;;  %v3576_v38 = vld [vmem:[%s3902_s20 + $0x78] sm:$0xff] }
 0x671   : > { %v2375_v33 = vpack.c.bf16 %v2359_v34, %v2357_v63 }
 0x673   : > { %3259 = vmatmul.mubr.bf16.gmra.mxu1 %v2375_v33  ;;  %v3577_v33 = vld [vmem:[%s3902_s20 + $0x68] sm:$0xff] }
 0x6c3   : > { %v3232_v9 = vpop.f32.mrf.mxu1 }
 0x6c4   : > { %v2490_v56 = vadd.f32 %v3232_v9, %v4972_v4 }
 0x6c5   : > { %v2481_v59 = vpop.f32.mrf.mxu1 }
 0x6c6   : > { %v2610_v25 = vadd.f32 %v3562_v18, %v2490_v56  ;;  %v2482_v24 = vadd.f32 %v4972_v4, %v2481_v59 }
 0x6c7   : > { %v3233_v62 = vpop.f32.mrf.mxu1 }
 0x6c8   : > { %2642 = vst [vmem:[%s4979_s23 + $0x10] sm:$0xff] %v2610_v25  ;;  %v2608_v30 = vadd.f32 %v3563_v11, %v2482_v24  ;;  %v2493_v50 = vadd.f32 %v3233_v62, %v4972_v4  ;;  %v3578_v25 = vld [vmem:[%s3902_s20 + $0x90] sm:$0xff] }
 0x6c9   : > { %v2484_v53 = vpop.f32.mrf.mxu1 }
 0x6ca   : > { %2640 = vst [vmem:[%s4979_s23] sm:$0xff] %v2608_v30  ;;  %v2611_v10 = vadd.f32 %v3564_v51, %v2493_v50  ;;  %v2485_v17 = vadd.f32 %v4972_v4, %v2484_v53  ;;  %v3579_v30 = vld [vmem:[%s3902_s20 + $0x80] sm:$0xff] }
 0x6cc   : > { %2643 = vst [vmem:[%s4979_s23 + $0x18] sm:$0xff] %v2611_v10  ;;  %v2609_v44 = vadd.f32 %v3565_v32, %v2485_v17  ;;  %v3580_v10 = vld [vmem:[%s3902_s20 + $0x98] sm:$0xff] }
 0x6ce   : > { %2641 = vst [vmem:[%s4979_s23 + $0x8] sm:$0xff] %v2609_v44  ;;  %v3581_v44 = vld [vmem:[%s3902_s20 + $0x88] sm:$0xff] }
 0x6d3   : > { %v3236_v22 = vpop.f32.mrf.mxu1 }
 0x6d4   : > { %v2506_v31 = vadd.f32 %v3236_v22, %v4972_v4 }
 0x6d5   : > { %v2497_v27 = vpop.f32.mrf.mxu1 }
 0x6d6   : > { %v2614_v48 = vadd.f32 %v3566_v1, %v2506_v31  ;;  %v2498_v28 = vadd.f32 %v4972_v4, %v2497_v27 }
 0x6d7   : > { %v3237_v5 = vpop.f32.mrf.mxu1 }
 0x6d8   : > { %2646 = vst [vmem:[%s4979_s23 + $0x30] sm:$0xff] %v2614_v48  ;;  %v2612_v37 = vadd.f32 %v3567_v6, %v2498_v28  ;;  %v2509_v42 = vadd.f32 %v3237_v5, %v4972_v4  ;;  %v3582_v48 = vld [vmem:[%s3902_s20 + $0xb0] sm:$0xff] }
 0x6d9   : > { %v2500_v26 = vpop.f32.mrf.mxu1 }
 0x6da   : > { %2644 = vst [vmem:[%s4979_s23 + $0x20] sm:$0xff] %v2612_v37  ;;  %v2615_v40 = vadd.f32 %v3568_v13, %v2509_v42  ;;  %v2501_v0 = vadd.f32 %v4972_v4, %v2500_v26  ;;  %v3583_v37 = vld [vmem:[%s3902_s20 + $0xa0] sm:$0xff] }
 0x6dc   : > { %2647 = vst [vmem:[%s4979_s23 + $0x38] sm:$0xff] %v2615_v40  ;;  %v2613_v41 = vadd.f32 %v3569_v15, %v2501_v0  ;;  %v3584_v40 = vld [vmem:[%s3902_s20 + $0xb8] sm:$0xff] }
 0x6de   : > { %2645 = vst [vmem:[%s4979_s23 + $0x28] sm:$0xff] %v2613_v41  ;;  %v3585_v41 = vld [vmem:[%s3902_s20 + $0xa8] sm:$0xff] }
 0x6e3   : > { %v3240_v8 = vpop.f32.mrf.mxu1 }
 0x6e4   : > { %v2522_v23 = vadd.f32 %v3240_v8, %v4972_v4 }
 0x6e5   : > { %v2513_v49 = vpop.f32.mrf.mxu1 }
 0x6e6   : > { %v2618_v47 = vadd.f32 %v3570_v14, %v2522_v23  ;;  %v2514_v36 = vadd.f32 %v4972_v4, %v2513_v49 }
 0x6e7   : > { %v3241_v21 = vpop.f32.mrf.mxu1 }
 0x6e8   : > { %2650 = vst [vmem:[%s4979_s23 + $0x50] sm:$0xff] %v2618_v47  ;;  %v2616_v52 = vadd.f32 %v3571_v12, %v2514_v36  ;;  %v2525_v29 = vadd.f32 %v3241_v21, %v4972_v4  ;;  %v3586_v47 = vld [vmem:[%s3902_s20 + $0xd0] sm:$0xff] }
 0x6e9   : > { %v2516_v61 = vpop.f32.mrf.mxu1 }
 0x6ea   : > { %2648 = vst [vmem:[%s4979_s23 + $0x40] sm:$0xff] %v2616_v52  ;;  %v2619_v57 = vadd.f32 %v3572_v54, %v2525_v29  ;;  %v2517_v20 = vadd.f32 %v4972_v4, %v2516_v61  ;;  %v3587_v52 = vld [vmem:[%s3902_s20 + $0xc0] sm:$0xff] }
 0x6ec   : > { %2651 = vst [vmem:[%s4979_s23 + $0x58] sm:$0xff] %v2619_v57  ;;  %v2617_v16 = vadd.f32 %v3573_v46, %v2517_v20  ;;  %v3588_v57 = vld [vmem:[%s3902_s20 + $0xd8] sm:$0xff] }
 0x6ee   : > { %2649 = vst [vmem:[%s4979_s23 + $0x48] sm:$0xff] %v2617_v16  ;;  %v3589_v16 = vld [vmem:[%s3902_s20 + $0xc8] sm:$0xff] }
 0x6f3   : > { %v3244_v19 = vpop.f32.mrf.mxu1 }
 0x6f4   : > { %v2538_v45 = vadd.f32 %v3244_v19, %v4972_v4 }
 0x6f5   : > { %v2529_v39 = vpop.f32.mrf.mxu1 }
 0x6f6   : > { %v2622_v60 = vadd.f32 %v3574_v35, %v2538_v45  ;;  %v2530_v43 = vadd.f32 %v4972_v4, %v2529_v39 }
 0x6f7   : > { %v3245_v2 = vpop.f32.mrf.mxu1 }
 0x6f8   : > { %2654 = vst [vmem:[%s4979_s23 + $0x70] sm:$0xff] %v2622_v60  ;;  %v2620_v58 = vadd.f32 %v3575_v55, %v2530_v43  ;;  %v2541_v7 = vadd.f32 %v3245_v2, %v4972_v4  ;;  %v3590_v60 = vld [vmem:[%s3902_s20 + $0xf0] sm:$0xff] }
 0x6f9   : > { %v2532_v3 = vpop.f32.mrf.mxu1 }
 0x6fa   : > { %2652 = vst [vmem:[%s4979_s23 + $0x60] sm:$0xff] %v2620_v58  ;;  %v2623_v63 = vadd.f32 %v3576_v38, %v2541_v7  ;;  %v2533_v34 = vadd.f32 %v4972_v4, %v2532_v3  ;;  %v3591_v58 = vld [vmem:[%s3902_s20 + $0xe0] sm:$0xff] }
 0x6fc   : > { %2655 = vst [vmem:[%s4979_s23 + $0x78] sm:$0xff] %v2623_v63  ;;  %v2621_v9 = vadd.f32 %v3577_v33, %v2533_v34  ;;  %v3592_v63 = vld [vmem:[%s3902_s20 + $0xf8] sm:$0xff] }
 0x6fe   : > { %2653 = vst [vmem:[%s4979_s23 + $0x68] sm:$0xff] %v2621_v9  ;;  %v3593_v9 = vld [vmem:[%s3902_s20 + $0xe8] sm:$0xff] }
 0x703   : > { %v3248_v56 = vpop.f32.mrf.mxu1 }
 0x704   : > { %v2554_v59 = vadd.f32 %v3248_v56, %v4972_v4 }
 0x705   : > { %v2545_v18 = vpop.f32.mrf.mxu1 }
 0x706   : > { %v2626_v24 = vadd.f32 %v3578_v25, %v2554_v59  ;;  %v2546_v62 = vadd.f32 %v4972_v4, %v2545_v18 }
 0x707   : > { %v3249_v11 = vpop.f32.mrf.mxu1 }
 0x708   : > { %2658 = vst [vmem:[%s4979_s23 + $0x90] sm:$0xff] %v2626_v24  ;;  %v2624_v50 = vadd.f32 %v3579_v30, %v2546_v62  ;;  %v2557_v53 = vadd.f32 %v3249_v11, %v4972_v4 }
 0x709   : > { %v2548_v51 = vpop.f32.mrf.mxu1 }
 0x70a   : > { %2656 = vst [vmem:[%s4979_s23 + $0x80] sm:$0xff] %v2624_v50  ;;  %v2627_v17 = vadd.f32 %v3580_v10, %v2557_v53  ;;  %v2549_v32 = vadd.f32 %v4972_v4, %v2548_v51 }
 0x70c   : > { %2659 = vst [vmem:[%s4979_s23 + $0x98] sm:$0xff] %v2627_v17  ;;  %v2625_v22 = vadd.f32 %v3581_v44, %v2549_v32 }
 0x70e   : > { %2657 = vst [vmem:[%s4979_s23 + $0x88] sm:$0xff] %v2625_v22 }
 0x713   : > { %v3252_v31 = vpop.f32.mrf.mxu1 }
 0x714   : > { %v2570_v27 = vadd.f32 %v3252_v31, %v4972_v4 }
 0x715   : > { %v2561_v1 = vpop.f32.mrf.mxu1 }
 0x716   : > { %v2630_v28 = vadd.f32 %v3582_v48, %v2570_v27  ;;  %v2562_v5 = vadd.f32 %v4972_v4, %v2561_v1 }
 0x717   : > { %v3253_v6 = vpop.f32.mrf.mxu1 }
 0x718   : > { %2662 = vst [vmem:[%s4979_s23 + $0xb0] sm:$0xff] %v2630_v28  ;;  %v2628_v42 = vadd.f32 %v3583_v37, %v2562_v5  ;;  %v2573_v26 = vadd.f32 %v3253_v6, %v4972_v4 }
 0x719   : > { %v2564_v13 = vpop.f32.mrf.mxu1 }
 0x71a   : > { %2660 = vst [vmem:[%s4979_s23 + $0xa0] sm:$0xff] %v2628_v42  ;;  %v2631_v0 = vadd.f32 %v3584_v40, %v2573_v26  ;;  %v2565_v15 = vadd.f32 %v4972_v4, %v2564_v13 }
 0x71c   : > { %2663 = vst [vmem:[%s4979_s23 + $0xb8] sm:$0xff] %v2631_v0  ;;  %v2629_v8 = vadd.f32 %v3585_v41, %v2565_v15 }
 0x71e   : > { %2661 = vst [vmem:[%s4979_s23 + $0xa8] sm:$0xff] %v2629_v8 }
 0x723   : > { %v3256_v23 = vpop.f32.mrf.mxu1 }
 0x724   : > { %v2586_v49 = vadd.f32 %v3256_v23, %v4972_v4 }
 0x725   : > { %v2577_v14 = vpop.f32.mrf.mxu1 }
 0x726   : > { %v2634_v36 = vadd.f32 %v3586_v47, %v2586_v49  ;;  %v2578_v21 = vadd.f32 %v4972_v4, %v2577_v14 }
 0x727   : > { %v3257_v12 = vpop.f32.mrf.mxu1 }
 0x728   : > { %2666 = vst [vmem:[%s4979_s23 + $0xd0] sm:$0xff] %v2634_v36  ;;  %v2632_v29 = vadd.f32 %v3587_v52, %v2578_v21  ;;  %v2589_v61 = vadd.f32 %v3257_v12, %v4972_v4 }
 0x729   : > { %v2580_v54 = vpop.f32.mrf.mxu1 }
 0x72a   : > { %2664 = vst [vmem:[%s4979_s23 + $0xc0] sm:$0xff] %v2632_v29  ;;  %v2635_v20 = vadd.f32 %v3588_v57, %v2589_v61  ;;  %v2581_v46 = vadd.f32 %v4972_v4, %v2580_v54 }
 0x72c   : > { %2667 = vst [vmem:[%s4979_s23 + $0xd8] sm:$0xff] %v2635_v20  ;;  %v2633_v19 = vadd.f32 %v3589_v16, %v2581_v46 }
 0x72e   : > { %2665 = vst [vmem:[%s4979_s23 + $0xc8] sm:$0xff] %v2633_v19 }
 0x733   : > { %v3260_v45 = vpop.f32.mrf.mxu1 }
 0x734   : > { %v2602_v39 = vadd.f32 %v3260_v45, %v4972_v4 }
 0x735   : > { %v2593_v35 = vpop.f32.mrf.mxu1 }
 0x736   : > { %v2638_v43 = vadd.f32 %v3590_v60, %v2602_v39  ;;  %v2594_v2 = vadd.f32 %v4972_v4, %v2593_v35 }
 0x737   : > { %v3261_v55 = vpop.f32.mrf.mxu1 }
 0x738   : > { %2670 = vst [vmem:[%s4979_s23 + $0xf0] sm:$0xff] %v2638_v43  ;;  %v2636_v7 = vadd.f32 %v3591_v58, %v2594_v2  ;;  %v2605_v3 = vadd.f32 %v3261_v55, %v4972_v4 }
 0x739   : > { %v2596_v38 = vpop.f32.mrf.mxu1 }
 0x73a   : > { %2668 = vst [vmem:[%s4979_s23 + $0xe0] sm:$0xff] %v2636_v7  ;;  %v2639_v34 = vadd.f32 %v3592_v63, %v2605_v3  ;;  %v2597_v33 = vadd.f32 %v4972_v4, %v2596_v38 }
 0x73c   : > { %2671 = vst [vmem:[%s4979_s23 + $0xf8] sm:$0xff] %v2639_v34  ;;  %v2637_v56 = vadd.f32 %v3593_v9, %v2597_v33 }
 0x73e   : > { %2669 = vst [vmem:[%s4979_s23 + $0xe8] sm:$0xff] %v2637_v56 }
 0x73f   : > { %3661 = shalt.err (!%p3658_p0)
}
 0x740   : > { %s3662_s20 = scalar_lea.hbm %s5076_s16, 4096  ;;  %s3666_s22 = scalar_lea.hbm %s5133_s9, 8192 }
 0x741   : > { %p3663_p5 = scmp.ne.s32.totalorder %s5076_s16, %s3662_s20  ;;  %p3667_p4 = scmp.lt.s32.totalorder %s5076_s16, %s5133_s9 }
 0x742   : > { %p3668_p6 = scmp.lt.s32.totalorder %s3666_s22, %s3662_s20 }
 0x743   : > { %p3664_p9 = pnand %p3663_p5, %p5225_p11 }
 0x744   : > { %p3669_p8 = por %p3668_p6, %p3667_p4 }
 0x745   : > { %p3665_p1 = pneg %p3664_p9 }
 0x747   : > { %p3670_p3 = pnand %p3669_p8, %p3665_p1 }
 0x749   : > { %3673 = shalt.err (!%p3670_p3)
}
 0x74a   : > { %s3728_s18 = smov 128   ;;  %s3729_s19 = smov 8  }
 0x74b   : > { %3268 = dma.vmem_to_hbm [thread:$0]  (%p5225_p11), %s5078_s25, 4096, %s5076_s16, %s2673_s13, %s3728_s18, %s3728_s18, %s3729_s19  }
 0x74c PF: > { %s5226_s26 = sld [smem:[#allocation11_spill]]  ;;  %s2701_s28 = sand.u32 1, %s3704_s30  }
 0x74d   : > { %p5228_p12 = scmp.ge.s32.totalorder %s3716_s12, 2  ;;  %s2702_s24 = scalar_lea.sflag [#allocation4], %s2701_s28 }
 0x752   : > { %p5227_p7 = scmp.ne.s32.totalorder %s5226_s26, 0 }
 0x754   : > { %p3279_p10 = pnand %p5228_p12, %p5227_p7 }
 0x756   : > { %p3280_p2 = pneg %p3279_p10 }
 0x758   : > { %3699 = dma.done.wait (%p3280_p2), %s2702_s24, 4096  }
 0x759   : > { %3701 = vsyncadd (%p3280_p2), %s2702_s24, 4294963200  ;;  %s5229_s12 = sld [smem:[#allocation12_spill]]  ;;  %s5230_s30 = smov %s3708_s10 }
 0x75a   : > { %s5231_s10 = smov %s3712_s11  ;;  %s5232_s11 = smov %s3851_s29 }
 0x75f   : > { %p23_p13 = scmp.ge.s32.totalorder %s5229_s12, 4  }
 0x761   :  { %25 = sbr.rel (!%p23_p13) target bundleno = 8 (0x8), region = 105 }
 0x766   :  { %2707 = vsyncpa [#allocation3], 1 }
 0x767   :  { %2709 = vsyncpa [#allocation3 + $0x1], 1 }
 0x768   :  { %2710 = vsyncpa [#allocation6], 1 }
 0x769   :  { %2711 = vsyncpa [#allocation4], 1 }
 0x76a   :  { %2713 = vsyncpa [#allocation4 + $0x1], 1 }

</bundles_post_ra>
